<compile_context>
chip_gen: v6e
topology: v6e:2x2x1
jax: 0.10.0
libtpu: 0.0.40
codegen_flags: <defaults>
</compile_context>

<pallas_src>
import jax
import jax.numpy as jnp
from jax.experimental import pallas as pl
from jax.experimental.pallas import tpu as pltpu

NEG_SLOPE = 0.1
LANES = 128

# ---------------------------------------------------------------------------
# Per-grid-step (single batch element) slab row counts.
# conv1 output row index = 28*h + w  (h, w in [0, 28)) -> 784 valid rows.
# pool1/conv2 rows share that index space: pool output (hp, wp) sits at
# 56*hp + 2*wp, conv2 output (ho, wo) at 56*ho + 2*wo.
# ---------------------------------------------------------------------------
C2R = 536               # conv2 slab: pool2 reads up to (112*4+4*4)+58+7 = 529
P1J = C2R + 224         # conv2 kh-tap i reads p1j[r + 56*i], i <= 4
R1 = ((P1J + 29 + 7) // 8) * 8   # pool1 reads c1[r + {0,1,28,29}]  -> 792


# ---------------------------------------------------------------------------
# The fused kernel: one batch element per invocation, everything in VMEM.
# ---------------------------------------------------------------------------
def _kernel(xr, w1, b1, w2, b2, wf1, bf1, wf2, bf2, wf3, bf3,
            o_ref, c1, p1j, c2, fc1lhs):
    cdt = w1.dtype  # bf16 compute dtype for MXU operands

    def leaky(v):
        return jnp.where(v > 0, v, NEG_SLOPE * v)

    # ---- conv1: ONE wide-K matmul (K=256, 195 used). Output lane group g
    # (8 lanes) holds the conv1 result shifted by 2g columns. --------------
    c1[...] = leaky(
        jnp.dot(xr[0], w1[...], preferred_element_type=jnp.float32) + b1[...])

    # ---- pool1 (2x2/2): max of 4 row-shifted slices.  Lane group g of the
    # result is pool1 at (hp, wp + g), i.e. already kw-tap-packed for conv2.
    p1j[...] = jnp.maximum(
        jnp.maximum(c1[0:P1J, :], c1[1:P1J + 1, :]),
        jnp.maximum(c1[28:P1J + 28, :], c1[29:P1J + 29, :]))

    # ---- conv2: 5 kh-tap matmuls, each K=128 (40 useful lanes), 4 adds. ----
    acc = None
    for i in range(5):
        lhs = p1j[56 * i:56 * i + C2R, :].astype(cdt)
        part = jnp.dot(lhs, w2[i], preferred_element_type=jnp.float32)
        acc = part if acc is None else acc + part
    c2[...] = leaky(acc + b2[...])

    # ---- pool2 + flatten: lane-pack the 25 pooled 5x5 positions (16 lanes
    # each) into the fc1 LHS.  Row 0 is the real batch row; rows 1..7 are
    # benign padding that is discarded after fc3. ---------------------------
    for k in range(25):
        base = 112 * (k // 5) + 4 * (k % 5)
        blk = jnp.maximum(
            jnp.maximum(c2[base:base + 8, 0:16],
                        c2[base + 2:base + 10, 0:16]),
            jnp.maximum(c2[base + 56:base + 64, 0:16],
                        c2[base + 58:base + 66, 0:16]))
        fc1lhs[:, 16 * k:16 * (k + 1)] = blk

    # ---- fc1 (400->120) as one wide-K matmul, fc2 (120->84), fc3 (84->10).
    f = jnp.dot(fc1lhs[...].astype(cdt), wf1[...],
                preferred_element_type=jnp.float32)
    f = leaky(f + bf1[...])
    f = jnp.dot(f.astype(cdt), wf2[...], preferred_element_type=jnp.float32)
    f = leaky(f + bf2[...])
    f = jnp.dot(f.astype(cdt), wf3[...],
                preferred_element_type=jnp.float32) + bf3[...]
    o_ref[0] = f                                   # lane-dense (8, 128) store


# ---------------------------------------------------------------------------
# One-time repack of PyTorch-layout parameters into kernel layout (bf16).
# ---------------------------------------------------------------------------
def prepare_params(params, compute_dtype=jnp.bfloat16):
    f32 = jnp.float32

    def pad2(a, rows, cols):
        return jnp.pad(a, ((0, rows - a.shape[0]), (0, cols - a.shape[1])))

    def bias(v):
        return jnp.pad(v, (0, LANES - v.shape[0])).reshape(1, LANES).astype(f32)

    # conv1, tap-folded and column-shift-replicated:
    #   W1[(kh*13 + kw)*3 + cin, 8*g + oc] = conv1_w[oc, cin, kh, kw - 2g]
    w1_k = jnp.transpose(params["conv1_w"], (2, 3, 1, 0))   # (kh, kw, cin, oc)
    groups = []
    for g in range(5):
        blk = jnp.zeros((5, 13, 3, 8), f32)
        blk = blk.at[:, 2 * g:2 * g + 5, :, 0:6].set(w1_k)
        groups.append(blk.reshape(195, 8))
    w1 = pad2(jnp.concatenate(groups, axis=1), 256, LANES)
    b1 = bias(jnp.tile(jnp.pad(params["conv1_b"], (0, 2)), 5))   # 5 groups x 8

    # conv2, kh-grouped with (kw, cin) folded into K: W2[kh, 8*kw + cin, oc].
    w2_k = jnp.transpose(params["conv2_w"], (2, 3, 1, 0))   # (kh, kw, cin, oc)
    w2 = jnp.zeros((5, LANES, LANES), f32)
    for i in range(5):
        for j in range(5):
            w2 = w2.at[i, 8 * j:8 * j + 6, 0:16].set(w2_k[i, j])
    b2 = bias(params["conv2_b"])

    # fc1 as one wide-K matmul: LHS lane 16*(5*hp2 + wp2) + c corresponds to
    # torch flatten index c*25 + 5*hp2 + wp2.
    wf1 = params["fc1_w"].reshape(120, 16, 25).transpose(2, 1, 0)
    wf1 = wf1.reshape(400, 120)

    return {
        "w1": w1.astype(compute_dtype),
        "b1": b1,
        "w2": w2.astype(compute_dtype),
        "b2": b2,
        "wf1": pad2(wf1, 400, LANES).astype(compute_dtype),
        "bf1": bias(params["fc1_b"]),
        "wf2": pad2(params["fc2_w"].T, LANES, LANES).astype(compute_dtype),
        "bf2": bias(params["fc2_b"]),
        "wf3": pad2(params["fc3_w"].T, LANES, LANES).astype(compute_dtype),
        "bf3": bias(params["fc3_b"]),
    }


# ---------------------------------------------------------------------------
# Forward pass (mirrors Net_Leaky.forward).
# ---------------------------------------------------------------------------
def net_leaky_forward(prepared, x):
    n, c, h, w = x.shape
    assert (c, h, w) == (3, 32, 32), "Net_Leaky requires 3x32x32 inputs"

    # Wide im2col in the wrapper (cheap XLA glue), cast to bf16 ONCE:
    #   row  = 28*h + w            (conv1 output position)
    #   lane = (kh*13 + kw)*3 + cin, kw in [0, 13)  (5-tap window + 4 extra
    #          2-column shifts for the 5 replicated output groups)
    xp = jnp.pad(x, ((0, 0), (0, 0), (0, 0), (0, 8)))        # width 32 -> 40
    cols = []
    for i in range(5):
        for jc in range(13):
            cols.append(xp[:, :, i:i + 28, jc:jc + 28])
    pat = jnp.stack(cols, axis=-1)                            # (n,3,28,28,65)
    pat = jnp.transpose(pat, (0, 2, 3, 4, 1)).reshape(n, 784, 195)
    pat = jnp.pad(pat, ((0, 0), (0, R1 - 784), (0, 256 - 195)))
    pat = pat.astype(jnp.bfloat16)

    grid_spec = pltpu.PrefetchScalarGridSpec(
        num_scalar_prefetch=0,
        grid=(n,),
        in_specs=[
            pl.BlockSpec((1, R1, 256), lambda b: (b, 0, 0)),        # patches
            pl.BlockSpec((256, LANES), lambda b: (0, 0)),           # w1
            pl.BlockSpec((1, LANES), lambda b: (0, 0)),             # b1
            pl.BlockSpec((5, LANES, LANES), lambda b: (0, 0, 0)),   # w2
            pl.BlockSpec((1, LANES), lambda b: (0, 0)),             # b2
            pl.BlockSpec((400, LANES), lambda b: (0, 0)),           # wf1
            pl.BlockSpec((1, LANES), lambda b: (0, 0)),             # bf1
            pl.BlockSpec((LANES, LANES), lambda b: (0, 0)),         # wf2
            pl.BlockSpec((1, LANES), lambda b: (0, 0)),             # bf2
            pl.BlockSpec((LANES, LANES), lambda b: (0, 0)),         # wf3
            pl.BlockSpec((1, LANES), lambda b: (0, 0)),             # bf3
        ],
        out_specs=pl.BlockSpec((1, 8, LANES), lambda b: (b, 0, 0)),
        scratch_shapes=[
            pltpu.VMEM((R1, LANES), jnp.float32),    # conv1 (wide) output
            pltpu.VMEM((P1J, LANES), jnp.float32),   # pool1, kw-tap packed
            pltpu.VMEM((C2R, LANES), jnp.float32),   # conv2 output
            pltpu.VMEM((8, 400), jnp.float32),       # lane-packed fc1 LHS
        ],
    )

    out = pl.pallas_call(
        _kernel,
        out_shape=jax.ShapeDtypeStruct((n, 8, LANES), jnp.float32),
        grid_spec=grid_spec,
        compiler_params=pltpu.CompilerParams(
            dimension_semantics=("parallel",)),
    )(pat, prepared["w1"], prepared["b1"], prepared["w2"], prepared["b2"],
      prepared["wf1"], prepared["bf1"], prepared["wf2"], prepared["bf2"],
      prepared["wf3"], prepared["bf3"])
    return out[:, 0, :10]


# ---------------------------------------------------------------------------
# Deterministic PyTorch-default-style parameters.
# ---------------------------------------------------------------------------
def init_params(key):
    def uniform(key, shape, fan_in):
        bound = 1.0 / jnp.sqrt(jnp.float32(fan_in))
        return jax.random.uniform(key, shape, jnp.float32, -bound, bound)

    keys = jax.random.split(key, 10)
    return {
        "conv1_w": uniform(keys[0], (6, 3, 5, 5), 3 * 5 * 5),
        "conv1_b": uniform(keys[1], (6,), 3 * 5 * 5),
        "conv2_w": uniform(keys[2], (16, 6, 5, 5), 6 * 5 * 5),
        "conv2_b": uniform(keys[3], (16,), 6 * 5 * 5),
        "fc1_w": uniform(keys[4], (120, 16 * 5 * 5), 16 * 5 * 5),
        "fc1_b": uniform(keys[5], (120,), 16 * 5 * 5),
        "fc2_w": uniform(keys[6], (84, 120), 120),
        "fc2_b": uniform(keys[7], (84,), 120),
        "fc3_w": uniform(keys[8], (10, 84), 84),
        "fc3_b": uniform(keys[9], (10,), 84),
    }


# Pure-JAX f32 reference (documents the semantics; used as a sanity check).
def reference_forward(params, x):
    def leaky(v):
        return jnp.where(v > 0, v, NEG_SLOPE * v)

    def conv(x, w, b):
        y = jax.lax.conv_general_dilated(
            x, w, window_strides=(1, 1), padding="VALID",
            dimension_numbers=("NCHW", "OIHW", "NCHW"))
        return leaky(y + b[None, :, None, None])

    def pool(x):
        return jax.lax.reduce_window(x, -jnp.inf, jax.lax.max,
                                     (1, 1, 2, 2), (1, 1, 2, 2), "VALID")

    x = pool(conv(x, params["conv1_w"], params["conv1_b"]))
    x = pool(conv(x, params["conv2_w"], params["conv2_b"]))
    x = x.reshape(x.shape[0], -1)
    x = leaky(x @ params["fc1_w"].T + params["fc1_b"])
    x = leaky(x @ params["fc2_w"].T + params["fc2_b"])
    return x @ params["fc3_w"].T + params["fc3_b"]


if __name__ == "__main__":
    key = jax.random.PRNGKey(0)
    pkey, xkey = jax.random.split(key)
    params = init_params(pkey)
    prepared = prepare_params(params)            # one-time bf16 weight repack
    x = jax.random.normal(xkey, (2, 3, 32, 32), dtype=jnp.float32)

    fwd = jax.jit(net_leaky_forward)
    out = fwd(prepared, x)
    jax.block_until_ready(out)

    assert out.shape == (2, 10), out.shape
    assert bool(jnp.all(jnp.isfinite(out)))

    # Loose tolerance: MXU operands are bf16 (f32 accumulation).
    ref = reference_forward(params, x)
    err = float(jnp.max(jnp.abs(out - ref)))
    scale = float(jnp.max(jnp.abs(ref)))
    assert err <= 0.05 + 0.05 * scale, (err, scale)

    print("KERNEL_OK")
</pallas_src>

<mosaic_0001>
module attributes {stable_mosaic.version = 11 : i64} {
  func.func @_kernel(%arg0: i32, %arg1: memref<1x792x256xbf16, #tpu.memory_space<vmem>>, %arg2: memref<256x128xbf16, #tpu.memory_space<vmem>>, %arg3: memref<1x128xf32, #tpu.memory_space<vmem>>, %arg4: memref<5x128x128xbf16, #tpu.memory_space<vmem>>, %arg5: memref<1x128xf32, #tpu.memory_space<vmem>>, %arg6: memref<400x128xbf16, #tpu.memory_space<vmem>>, %arg7: memref<1x128xf32, #tpu.memory_space<vmem>>, %arg8: memref<128x128xbf16, #tpu.memory_space<vmem>>, %arg9: memref<1x128xf32, #tpu.memory_space<vmem>>, %arg10: memref<128x128xbf16, #tpu.memory_space<vmem>>, %arg11: memref<1x128xf32, #tpu.memory_space<vmem>>, %arg12: memref<1x8x128xf32, #tpu.memory_space<vmem>>, %arg13: memref<792x128xf32, #tpu.memory_space<vmem>>, %arg14: memref<760x128xf32, #tpu.memory_space<vmem>>, %arg15: memref<536x128xf32, #tpu.memory_space<vmem>>, %arg16: memref<8x400xf32, #tpu.memory_space<vmem>>) attributes {dimension_semantics = [#tpu.dimension_semantics<parallel>], iteration_bounds = array<i64: 2>, scalar_prefetch = 0 : i64, scratch_operands = 4 : i64, tpu.core_type = #tpu.core_type<tc>, window_params = [{transform_indices = @transform_0, window_bounds = array<i64: 1, 792, 256>}, {pipeline_mode = #tpu.pipeline_mode<synchronous>, transform_indices = @transform_1, window_bounds = array<i64: 256, 128>}, {pipeline_mode = #tpu.pipeline_mode<synchronous>, transform_indices = @transform_2, window_bounds = array<i64: 1, 128>}, {pipeline_mode = #tpu.pipeline_mode<synchronous>, transform_indices = @transform_3, window_bounds = array<i64: 5, 128, 128>}, {pipeline_mode = #tpu.pipeline_mode<synchronous>, transform_indices = @transform_4, window_bounds = array<i64: 1, 128>}, {pipeline_mode = #tpu.pipeline_mode<synchronous>, transform_indices = @transform_5, window_bounds = array<i64: 400, 128>}, {pipeline_mode = #tpu.pipeline_mode<synchronous>, transform_indices = @transform_6, window_bounds = array<i64: 1, 128>}, {pipeline_mode = #tpu.pipeline_mode<synchronous>, transform_indices = @transform_7, window_bounds = array<i64: 128, 128>}, {pipeline_mode = #tpu.pipeline_mode<synchronous>, transform_indices = @transform_8, window_bounds = array<i64: 1, 128>}, {pipeline_mode = #tpu.pipeline_mode<synchronous>, transform_indices = @transform_9, window_bounds = array<i64: 128, 128>}, {pipeline_mode = #tpu.pipeline_mode<synchronous>, transform_indices = @transform_10, window_bounds = array<i64: 1, 128>}, {transform_indices = @transform_11, window_bounds = array<i64: 1, 8, 128>}]} {
    %c0 = arith.constant 0 : index
    %c0_0 = arith.constant 0 : index
    %c0_1 = arith.constant 0 : index
    %0 = vector.load %arg1[%c0, %c0_0, %c0_1] : memref<1x792x256xbf16, #tpu.memory_space<vmem>>, vector<1x792x256xbf16>
    %1 = vector.shape_cast %0 : vector<1x792x256xbf16> to vector<792x256xbf16>
    %c0_2 = arith.constant 0 : index
    %c0_3 = arith.constant 0 : index
    %2 = vector.load %arg2[%c0_2, %c0_3] : memref<256x128xbf16, #tpu.memory_space<vmem>>, vector<256x128xbf16>
    %cst = arith.constant dense<0.000000e+00> : vector<792x128xf32>
    %3 = tpu.matmul %1, %2, %cst {dimension_numbers = #tpu.dot_dimension_numbers<[1], [0], [0], [1], [0, 0, 1, 1], [], []>} : vector<792x256xbf16>, vector<256x128xbf16>, vector<792x128xf32> -> vector<792x128xf32>
    %c0_4 = arith.constant 0 : index
    %c0_5 = arith.constant 0 : index
    %4 = vector.load %arg3[%c0_4, %c0_5] : memref<1x128xf32, #tpu.memory_space<vmem>>, vector<1x128xf32>
    %5 = vector.broadcast %4 : vector<1x128xf32> to vector<792x128xf32>
    %6 = arith.addf %3, %5 : vector<792x128xf32>
    %cst_6 = arith.constant 0.000000e+00 : f32
    %7 = vector.broadcast %cst_6 : f32 to vector<792x128xf32>
    %8 = arith.cmpf ogt, %6, %7 : vector<792x128xf32>
    %cst_7 = arith.constant 1.000000e-01 : f32
    %9 = vector.broadcast %cst_7 : f32 to vector<792x128xf32>
    %10 = arith.mulf %9, %6 : vector<792x128xf32>
    %11 = arith.select %8, %6, %10 : vector<792x128xi1>, vector<792x128xf32>
    %c0_8 = arith.constant 0 : index
    %c0_9 = arith.constant 0 : index
    %12 = vector.load %arg13[%c0_8, %c0_9] : memref<792x128xf32, #tpu.memory_space<vmem>>, vector<792x128xf32>
    tpu.vector_store %arg13[%c0_8, %c0_9], %11 {strides = array<i32>} : memref<792x128xf32, #tpu.memory_space<vmem>>, vector<792x128xf32>,
    %c0_10 = arith.constant 0 : index
    %c0_11 = arith.constant 0 : index
    %13 = vector.load %arg13[%c0_10, %c0_11] : memref<792x128xf32, #tpu.memory_space<vmem>>, vector<760x128xf32>
    %c1 = arith.constant 1 : index
    %c0_12 = arith.constant 0 : index
    %14 = vector.load %arg13[%c1, %c0_12] : memref<792x128xf32, #tpu.memory_space<vmem>>, vector<760x128xf32>
    %15 = arith.maximumf %13, %14 : vector<760x128xf32>
    %c28 = arith.constant 28 : index
    %c0_13 = arith.constant 0 : index
    %16 = vector.load %arg13[%c28, %c0_13] : memref<792x128xf32, #tpu.memory_space<vmem>>, vector<760x128xf32>
    %c29 = arith.constant 29 : index
    %c0_14 = arith.constant 0 : index
    %17 = vector.load %arg13[%c29, %c0_14] : memref<792x128xf32, #tpu.memory_space<vmem>>, vector<760x128xf32>
    %18 = arith.maximumf %16, %17 : vector<760x128xf32>
    %19 = arith.maximumf %15, %18 : vector<760x128xf32>
    %c0_15 = arith.constant 0 : index
    %c0_16 = arith.constant 0 : index
    %20 = vector.load %arg14[%c0_15, %c0_16] : memref<760x128xf32, #tpu.memory_space<vmem>>, vector<760x128xf32>
    tpu.vector_store %arg14[%c0_15, %c0_16], %19 {strides = array<i32>} : memref<760x128xf32, #tpu.memory_space<vmem>>, vector<760x128xf32>,
    %c0_17 = arith.constant 0 : index
    %c0_18 = arith.constant 0 : index
    %21 = vector.load %arg14[%c0_17, %c0_18] : memref<760x128xf32, #tpu.memory_space<vmem>>, vector<536x128xf32>
    %22 = arith.truncf %21 : vector<536x128xf32> to vector<536x128xbf16>
    %c0_19 = arith.constant 0 : index
    %c0_20 = arith.constant 0 : index
    %c0_21 = arith.constant 0 : index
    %23 = vector.load %arg4[%c0_19, %c0_20, %c0_21] : memref<5x128x128xbf16, #tpu.memory_space<vmem>>, vector<1x128x128xbf16>
    %24 = vector.shape_cast %23 : vector<1x128x128xbf16> to vector<128x128xbf16>
    %cst_22 = arith.constant dense<0.000000e+00> : vector<536x128xf32>
    %25 = tpu.matmul %22, %24, %cst_22 {dimension_numbers = #tpu.dot_dimension_numbers<[1], [0], [0], [1], [0, 0, 1, 1], [], []>} : vector<536x128xbf16>, vector<128x128xbf16>, vector<536x128xf32> -> vector<536x128xf32>
    %c56 = arith.constant 56 : index
    %c0_23 = arith.constant 0 : index
    %26 = vector.load %arg14[%c56, %c0_23] : memref<760x128xf32, #tpu.memory_space<vmem>>, vector<536x128xf32>
    %27 = arith.truncf %26 : vector<536x128xf32> to vector<536x128xbf16>
    %c1_24 = arith.constant 1 : index
    %c0_25 = arith.constant 0 : index
    %c0_26 = arith.constant 0 : index
    %28 = vector.load %arg4[%c1_24, %c0_25, %c0_26] : memref<5x128x128xbf16, #tpu.memory_space<vmem>>, vector<1x128x128xbf16>
    %29 = vector.shape_cast %28 : vector<1x128x128xbf16> to vector<128x128xbf16>
    %cst_27 = arith.constant dense<0.000000e+00> : vector<536x128xf32>
    %30 = tpu.matmul %27, %29, %cst_27 {dimension_numbers = #tpu.dot_dimension_numbers<[1], [0], [0], [1], [0, 0, 1, 1], [], []>} : vector<536x128xbf16>, vector<128x128xbf16>, vector<536x128xf32> -> vector<536x128xf32>
    %31 = arith.addf %25, %30 : vector<536x128xf32>
    %c112 = arith.constant 112 : index
    %c0_28 = arith.constant 0 : index
    %32 = vector.load %arg14[%c112, %c0_28] : memref<760x128xf32, #tpu.memory_space<vmem>>, vector<536x128xf32>
    %33 = arith.truncf %32 : vector<536x128xf32> to vector<536x128xbf16>
    %c2 = arith.constant 2 : index
    %c0_29 = arith.constant 0 : index
    %c0_30 = arith.constant 0 : index
    %34 = vector.load %arg4[%c2, %c0_29, %c0_30] : memref<5x128x128xbf16, #tpu.memory_space<vmem>>, vector<1x128x128xbf16>
    %35 = vector.shape_cast %34 : vector<1x128x128xbf16> to vector<128x128xbf16>
    %cst_31 = arith.constant dense<0.000000e+00> : vector<536x128xf32>
    %36 = tpu.matmul %33, %35, %cst_31 {dimension_numbers = #tpu.dot_dimension_numbers<[1], [0], [0], [1], [0, 0, 1, 1], [], []>} : vector<536x128xbf16>, vector<128x128xbf16>, vector<536x128xf32> -> vector<536x128xf32>
    %37 = arith.addf %31, %36 : vector<536x128xf32>
    %c168 = arith.constant 168 : index
    %c0_32 = arith.constant 0 : index
    %38 = vector.load %arg14[%c168, %c0_32] : memref<760x128xf32, #tpu.memory_space<vmem>>, vector<536x128xf32>
    %39 = arith.truncf %38 : vector<536x128xf32> to vector<536x128xbf16>
    %c3 = arith.constant 3 : index
    %c0_33 = arith.constant 0 : index
    %c0_34 = arith.constant 0 : index
    %40 = vector.load %arg4[%c3, %c0_33, %c0_34] : memref<5x128x128xbf16, #tpu.memory_space<vmem>>, vector<1x128x128xbf16>
    %41 = vector.shape_cast %40 : vector<1x128x128xbf16> to vector<128x128xbf16>
    %cst_35 = arith.constant dense<0.000000e+00> : vector<536x128xf32>
    %42 = tpu.matmul %39, %41, %cst_35 {dimension_numbers = #tpu.dot_dimension_numbers<[1], [0], [0], [1], [0, 0, 1, 1], [], []>} : vector<536x128xbf16>, vector<128x128xbf16>, vector<536x128xf32> -> vector<536x128xf32>
    %43 = arith.addf %37, %42 : vector<536x128xf32>
    %c224 = arith.constant 224 : index
    %c0_36 = arith.constant 0 : index
    %44 = vector.load %arg14[%c224, %c0_36] : memref<760x128xf32, #tpu.memory_space<vmem>>, vector<536x128xf32>
    %45 = arith.truncf %44 : vector<536x128xf32> to vector<536x128xbf16>
    %c4 = arith.constant 4 : index
    %c0_37 = arith.constant 0 : index
    %c0_38 = arith.constant 0 : index
    %46 = vector.load %arg4[%c4, %c0_37, %c0_38] : memref<5x128x128xbf16, #tpu.memory_space<vmem>>, vector<1x128x128xbf16>
    %47 = vector.shape_cast %46 : vector<1x128x128xbf16> to vector<128x128xbf16>
    %cst_39 = arith.constant dense<0.000000e+00> : vector<536x128xf32>
    %48 = tpu.matmul %45, %47, %cst_39 {dimension_numbers = #tpu.dot_dimension_numbers<[1], [0], [0], [1], [0, 0, 1, 1], [], []>} : vector<536x128xbf16>, vector<128x128xbf16>, vector<536x128xf32> -> vector<536x128xf32>
    %49 = arith.addf %43, %48 : vector<536x128xf32>
    %c0_40 = arith.constant 0 : index
    %c0_41 = arith.constant 0 : index
    %50 = vector.load %arg5[%c0_40, %c0_41] : memref<1x128xf32, #tpu.memory_space<vmem>>, vector<1x128xf32>
    %51 = vector.broadcast %50 : vector<1x128xf32> to vector<536x128xf32>
    %52 = arith.addf %49, %51 : vector<536x128xf32>
    %cst_42 = arith.constant 0.000000e+00 : f32
    %53 = vector.broadcast %cst_42 : f32 to vector<536x128xf32>
    %54 = arith.cmpf ogt, %52, %53 : vector<536x128xf32>
    %cst_43 = arith.constant 1.000000e-01 : f32
    %55 = vector.broadcast %cst_43 : f32 to vector<536x128xf32>
    %56 = arith.mulf %55, %52 : vector<536x128xf32>
    %57 = arith.select %54, %52, %56 : vector<536x128xi1>, vector<536x128xf32>
    %c0_44 = arith.constant 0 : index
    %c0_45 = arith.constant 0 : index
    %58 = vector.load %arg15[%c0_44, %c0_45] : memref<536x128xf32, #tpu.memory_space<vmem>>, vector<536x128xf32>
    tpu.vector_store %arg15[%c0_44, %c0_45], %57 {strides = array<i32>} : memref<536x128xf32, #tpu.memory_space<vmem>>, vector<536x128xf32>,
    %c0_46 = arith.constant 0 : index
    %c0_47 = arith.constant 0 : index
    %59 = vector.load %arg15[%c0_46, %c0_47] : memref<536x128xf32, #tpu.memory_space<vmem>>, vector<8x16xf32>
    %c2_48 = arith.constant 2 : index
    %c0_49 = arith.constant 0 : index
    %60 = vector.load %arg15[%c2_48, %c0_49] : memref<536x128xf32, #tpu.memory_space<vmem>>, vector<8x16xf32>
    %61 = arith.maximumf %59, %60 : vector<8x16xf32>
    %c56_50 = arith.constant 56 : index
    %c0_51 = arith.constant 0 : index
    %62 = vector.load %arg15[%c56_50, %c0_51] : memref<536x128xf32, #tpu.memory_space<vmem>>, vector<8x16xf32>
    %c58 = arith.constant 58 : index
    %c0_52 = arith.constant 0 : index
    %63 = vector.load %arg15[%c58, %c0_52] : memref<536x128xf32, #tpu.memory_space<vmem>>, vector<8x16xf32>
    %64 = arith.maximumf %62, %63 : vector<8x16xf32>
    %65 = arith.maximumf %61, %64 : vector<8x16xf32>
    %c0_53 = arith.constant 0 : index
    %c0_54 = arith.constant 0 : index
    %66 = vector.load %arg16[%c0_53, %c0_54] : memref<8x400xf32, #tpu.memory_space<vmem>>, vector<8x16xf32>
    tpu.vector_store %arg16[%c0_53, %c0_54], %65 {strides = array<i32>} : memref<8x400xf32, #tpu.memory_space<vmem>>, vector<8x16xf32>,
    %c4_55 = arith.constant 4 : index
    %c0_56 = arith.constant 0 : index
    %67 = vector.load %arg15[%c4_55, %c0_56] : memref<536x128xf32, #tpu.memory_space<vmem>>, vector<8x16xf32>
    %c6 = arith.constant 6 : index
    %c0_57 = arith.constant 0 : index
    %68 = vector.load %arg15[%c6, %c0_57] : memref<536x128xf32, #tpu.memory_space<vmem>>, vector<8x16xf32>
    %69 = arith.maximumf %67, %68 : vector<8x16xf32>
    %c60 = arith.constant 60 : index
    %c0_58 = arith.constant 0 : index
    %70 = vector.load %arg15[%c60, %c0_58] : memref<536x128xf32, #tpu.memory_space<vmem>>, vector<8x16xf32>
    %c62 = arith.constant 62 : index
    %c0_59 = arith.constant 0 : index
    %71 = vector.load %arg15[%c62, %c0_59] : memref<536x128xf32, #tpu.memory_space<vmem>>, vector<8x16xf32>
    %72 = arith.maximumf %70, %71 : vector<8x16xf32>
    %73 = arith.maximumf %69, %72 : vector<8x16xf32>
    %c0_60 = arith.constant 0 : index
    %c16 = arith.constant 16 : index
    %74 = vector.load %arg16[%c0_60, %c16] : memref<8x400xf32, #tpu.memory_space<vmem>>, vector<8x16xf32>
    tpu.vector_store %arg16[%c0_60, %c16], %73 {strides = array<i32>} : memref<8x400xf32, #tpu.memory_space<vmem>>, vector<8x16xf32>,
    %c8 = arith.constant 8 : index
    %c0_61 = arith.constant 0 : index
    %75 = vector.load %arg15[%c8, %c0_61] : memref<536x128xf32, #tpu.memory_space<vmem>>, vector<8x16xf32>
    %c10 = arith.constant 10 : index
    %c0_62 = arith.constant 0 : index
    %76 = vector.load %arg15[%c10, %c0_62] : memref<536x128xf32, #tpu.memory_space<vmem>>, vector<8x16xf32>
    %77 = arith.maximumf %75, %76 : vector<8x16xf32>
    %c64 = arith.constant 64 : index
    %c0_63 = arith.constant 0 : index
    %78 = vector.load %arg15[%c64, %c0_63] : memref<536x128xf32, #tpu.memory_space<vmem>>, vector<8x16xf32>
    %c66 = arith.constant 66 : index
    %c0_64 = arith.constant 0 : index
    %79 = vector.load %arg15[%c66, %c0_64] : memref<536x128xf32, #tpu.memory_space<vmem>>, vector<8x16xf32>
    %80 = arith.maximumf %78, %79 : vector<8x16xf32>
    %81 = arith.maximumf %77, %80 : vector<8x16xf32>
    %c0_65 = arith.constant 0 : index
    %c32 = arith.constant 32 : index
    %82 = vector.load %arg16[%c0_65, %c32] : memref<8x400xf32, #tpu.memory_space<vmem>>, vector<8x16xf32>
    tpu.vector_store %arg16[%c0_65, %c32], %81 {strides = array<i32>} : memref<8x400xf32, #tpu.memory_space<vmem>>, vector<8x16xf32>,
    %c12 = arith.constant 12 : index
    %c0_66 = arith.constant 0 : index
    %83 = vector.load %arg15[%c12, %c0_66] : memref<536x128xf32, #tpu.memory_space<vmem>>, vector<8x16xf32>
    %c14 = arith.constant 14 : index
    %c0_67 = arith.constant 0 : index
    %84 = vector.load %arg15[%c14, %c0_67] : memref<536x128xf32, #tpu.memory_space<vmem>>, vector<8x16xf32>
    %85 = arith.maximumf %83, %84 : vector<8x16xf32>
    %c68 = arith.constant 68 : index
    %c0_68 = arith.constant 0 : index
    %86 = vector.load %arg15[%c68, %c0_68] : memref<536x128xf32, #tpu.memory_space<vmem>>, vector<8x16xf32>
    %c70 = arith.constant 70 : index
    %c0_69 = arith.constant 0 : index
    %87 = vector.load %arg15[%c70, %c0_69] : memref<536x128xf32, #tpu.memory_space<vmem>>, vector<8x16xf32>
    %88 = arith.maximumf %86, %87 : vector<8x16xf32>
    %89 = arith.maximumf %85, %88 : vector<8x16xf32>
    %c0_70 = arith.constant 0 : index
    %c48 = arith.constant 48 : index
    %90 = vector.load %arg16[%c0_70, %c48] : memref<8x400xf32, #tpu.memory_space<vmem>>, vector<8x16xf32>
    tpu.vector_store %arg16[%c0_70, %c48], %89 {strides = array<i32>} : memref<8x400xf32, #tpu.memory_space<vmem>>, vector<8x16xf32>,
    %c16_71 = arith.constant 16 : index
    %c0_72 = arith.constant 0 : index
    %91 = vector.load %arg15[%c16_71, %c0_72] : memref<536x128xf32, #tpu.memory_space<vmem>>, vector<8x16xf32>
    %c18 = arith.constant 18 : index
    %c0_73 = arith.constant 0 : index
    %92 = vector.load %arg15[%c18, %c0_73] : memref<536x128xf32, #tpu.memory_space<vmem>>, vector<8x16xf32>
    %93 = arith.maximumf %91, %92 : vector<8x16xf32>
    %c72 = arith.constant 72 : index
    %c0_74 = arith.constant 0 : index
    %94 = vector.load %arg15[%c72, %c0_74] : memref<536x128xf32, #tpu.memory_space<vmem>>, vector<8x16xf32>
    %c74 = arith.constant 74 : index
    %c0_75 = arith.constant 0 : index
    %95 = vector.load %arg15[%c74, %c0_75] : memref<536x128xf32, #tpu.memory_space<vmem>>, vector<8x16xf32>
    %96 = arith.maximumf %94, %95 : vector<8x16xf32>
    %97 = arith.maximumf %93, %96 : vector<8x16xf32>
    %c0_76 = arith.constant 0 : index
    %c64_77 = arith.constant 64 : index
    %98 = vector.load %arg16[%c0_76, %c64_77] : memref<8x400xf32, #tpu.memory_space<vmem>>, vector<8x16xf32>
    tpu.vector_store %arg16[%c0_76, %c64_77], %97 {strides = array<i32>} : memref<8x400xf32, #tpu.memory_space<vmem>>, vector<8x16xf32>,
    %c112_78 = arith.constant 112 : index
    %c0_79 = arith.constant 0 : index
    %99 = vector.load %arg15[%c112_78, %c0_79] : memref<536x128xf32, #tpu.memory_space<vmem>>, vector<8x16xf32>
    %c114 = arith.constant 114 : index
    %c0_80 = arith.constant 0 : index
    %100 = vector.load %arg15[%c114, %c0_80] : memref<536x128xf32, #tpu.memory_space<vmem>>, vector<8x16xf32>
    %101 = arith.maximumf %99, %100 : vector<8x16xf32>
    %c168_81 = arith.constant 168 : index
    %c0_82 = arith.constant 0 : index
    %102 = vector.load %arg15[%c168_81, %c0_82] : memref<536x128xf32, #tpu.memory_space<vmem>>, vector<8x16xf32>
    %c170 = arith.constant 170 : index
    %c0_83 = arith.constant 0 : index
    %103 = vector.load %arg15[%c170, %c0_83] : memref<536x128xf32, #tpu.memory_space<vmem>>, vector<8x16xf32>
    %104 = arith.maximumf %102, %103 : vector<8x16xf32>
    %105 = arith.maximumf %101, %104 : vector<8x16xf32>
    %c0_84 = arith.constant 0 : index
    %c80 = arith.constant 80 : index
    %106 = vector.load %arg16[%c0_84, %c80] : memref<8x400xf32, #tpu.memory_space<vmem>>, vector<8x16xf32>
    tpu.vector_store %arg16[%c0_84, %c80], %105 {strides = array<i32>} : memref<8x400xf32, #tpu.memory_space<vmem>>, vector<8x16xf32>,
    %c116 = arith.constant 116 : index
    %c0_85 = arith.constant 0 : index
    %107 = vector.load %arg15[%c116, %c0_85] : memref<536x128xf32, #tpu.memory_space<vmem>>, vector<8x16xf32>
    %c118 = arith.constant 118 : index
    %c0_86 = arith.constant 0 : index
    %108 = vector.load %arg15[%c118, %c0_86] : memref<536x128xf32, #tpu.memory_space<vmem>>, vector<8x16xf32>
    %109 = arith.maximumf %107, %108 : vector<8x16xf32>
    %c172 = arith.constant 172 : index
    %c0_87 = arith.constant 0 : index
    %110 = vector.load %arg15[%c172, %c0_87] : memref<536x128xf32, #tpu.memory_space<vmem>>, vector<8x16xf32>
    %c174 = arith.constant 174 : index
    %c0_88 = arith.constant 0 : index
    %111 = vector.load %arg15[%c174, %c0_88] : memref<536x128xf32, #tpu.memory_space<vmem>>, vector<8x16xf32>
    %112 = arith.maximumf %110, %111 : vector<8x16xf32>
    %113 = arith.maximumf %109, %112 : vector<8x16xf32>
    %c0_89 = arith.constant 0 : index
    %c96 = arith.constant 96 : index
    %114 = vector.load %arg16[%c0_89, %c96] : memref<8x400xf32, #tpu.memory_space<vmem>>, vector<8x16xf32>
    tpu.vector_store %arg16[%c0_89, %c96], %113 {strides = array<i32>} : memref<8x400xf32, #tpu.memory_space<vmem>>, vector<8x16xf32>,
    %c120 = arith.constant 120 : index
    %c0_90 = arith.constant 0 : index
    %115 = vector.load %arg15[%c120, %c0_90] : memref<536x128xf32, #tpu.memory_space<vmem>>, vector<8x16xf32>
    %c122 = arith.constant 122 : index
    %c0_91 = arith.constant 0 : index
    %116 = vector.load %arg15[%c122, %c0_91] : memref<536x128xf32, #tpu.memory_space<vmem>>, vector<8x16xf32>
    %117 = arith.maximumf %115, %116 : vector<8x16xf32>
    %c176 = arith.constant 176 : index
    %c0_92 = arith.constant 0 : index
    %118 = vector.load %arg15[%c176, %c0_92] : memref<536x128xf32, #tpu.memory_space<vmem>>, vector<8x16xf32>
    %c178 = arith.constant 178 : index
    %c0_93 = arith.constant 0 : index
    %119 = vector.load %arg15[%c178, %c0_93] : memref<536x128xf32, #tpu.memory_space<vmem>>, vector<8x16xf32>
    %120 = arith.maximumf %118, %119 : vector<8x16xf32>
    %121 = arith.maximumf %117, %120 : vector<8x16xf32>
    %c0_94 = arith.constant 0 : index
    %c112_95 = arith.constant 112 : index
    %122 = vector.load %arg16[%c0_94, %c112_95] : memref<8x400xf32, #tpu.memory_space<vmem>>, vector<8x16xf32>
    tpu.vector_store %arg16[%c0_94, %c112_95], %121 {strides = array<i32>} : memref<8x400xf32, #tpu.memory_space<vmem>>, vector<8x16xf32>,
    %c124 = arith.constant 124 : index
    %c0_96 = arith.constant 0 : index
    %123 = vector.load %arg15[%c124, %c0_96] : memref<536x128xf32, #tpu.memory_space<vmem>>, vector<8x16xf32>
    %c126 = arith.constant 126 : index
    %c0_97 = arith.constant 0 : index
    %124 = vector.load %arg15[%c126, %c0_97] : memref<536x128xf32, #tpu.memory_space<vmem>>, vector<8x16xf32>
    %125 = arith.maximumf %123, %124 : vector<8x16xf32>
    %c180 = arith.constant 180 : index
    %c0_98 = arith.constant 0 : index
    %126 = vector.load %arg15[%c180, %c0_98] : memref<536x128xf32, #tpu.memory_space<vmem>>, vector<8x16xf32>
    %c182 = arith.constant 182 : index
    %c0_99 = arith.constant 0 : index
    %127 = vector.load %arg15[%c182, %c0_99] : memref<536x128xf32, #tpu.memory_space<vmem>>, vector<8x16xf32>
    %128 = arith.maximumf %126, %127 : vector<8x16xf32>
    %129 = arith.maximumf %125, %128 : vector<8x16xf32>
    %c0_100 = arith.constant 0 : index
    %c128 = arith.constant 128 : index
    %130 = vector.load %arg16[%c0_100, %c128] : memref<8x400xf32, #tpu.memory_space<vmem>>, vector<8x16xf32>
    tpu.vector_store %arg16[%c0_100, %c128], %129 {strides = array<i32>} : memref<8x400xf32, #tpu.memory_space<vmem>>, vector<8x16xf32>,
    %c128_101 = arith.constant 128 : index
    %c0_102 = arith.constant 0 : index
    %131 = vector.load %arg15[%c128_101, %c0_102] : memref<536x128xf32, #tpu.memory_space<vmem>>, vector<8x16xf32>
    %c130 = arith.constant 130 : index
    %c0_103 = arith.constant 0 : index
    %132 = vector.load %arg15[%c130, %c0_103] : memref<536x128xf32, #tpu.memory_space<vmem>>, vector<8x16xf32>
    %133 = arith.maximumf %131, %132 : vector<8x16xf32>
    %c184 = arith.constant 184 : index
    %c0_104 = arith.constant 0 : index
    %134 = vector.load %arg15[%c184, %c0_104] : memref<536x128xf32, #tpu.memory_space<vmem>>, vector<8x16xf32>
    %c186 = arith.constant 186 : index
    %c0_105 = arith.constant 0 : index
    %135 = vector.load %arg15[%c186, %c0_105] : memref<536x128xf32, #tpu.memory_space<vmem>>, vector<8x16xf32>
    %136 = arith.maximumf %134, %135 : vector<8x16xf32>
    %137 = arith.maximumf %133, %136 : vector<8x16xf32>
    %c0_106 = arith.constant 0 : index
    %c144 = arith.constant 144 : index
    %138 = vector.load %arg16[%c0_106, %c144] : memref<8x400xf32, #tpu.memory_space<vmem>>, vector<8x16xf32>
    tpu.vector_store %arg16[%c0_106, %c144], %137 {strides = array<i32>} : memref<8x400xf32, #tpu.memory_space<vmem>>, vector<8x16xf32>,
    %c224_107 = arith.constant 224 : index
    %c0_108 = arith.constant 0 : index
    %139 = vector.load %arg15[%c224_107, %c0_108] : memref<536x128xf32, #tpu.memory_space<vmem>>, vector<8x16xf32>
    %c226 = arith.constant 226 : index
    %c0_109 = arith.constant 0 : index
    %140 = vector.load %arg15[%c226, %c0_109] : memref<536x128xf32, #tpu.memory_space<vmem>>, vector<8x16xf32>
    %141 = arith.maximumf %139, %140 : vector<8x16xf32>
    %c280 = arith.constant 280 : index
    %c0_110 = arith.constant 0 : index
    %142 = vector.load %arg15[%c280, %c0_110] : memref<536x128xf32, #tpu.memory_space<vmem>>, vector<8x16xf32>
    %c282 = arith.constant 282 : index
    %c0_111 = arith.constant 0 : index
    %143 = vector.load %arg15[%c282, %c0_111] : memref<536x128xf32, #tpu.memory_space<vmem>>, vector<8x16xf32>
    %144 = arith.maximumf %142, %143 : vector<8x16xf32>
    %145 = arith.maximumf %141, %144 : vector<8x16xf32>
    %c0_112 = arith.constant 0 : index
    %c160 = arith.constant 160 : index
    %146 = vector.load %arg16[%c0_112, %c160] : memref<8x400xf32, #tpu.memory_space<vmem>>, vector<8x16xf32>
    tpu.vector_store %arg16[%c0_112, %c160], %145 {strides = array<i32>} : memref<8x400xf32, #tpu.memory_space<vmem>>, vector<8x16xf32>,
    %c228 = arith.constant 228 : index
    %c0_113 = arith.constant 0 : index
    %147 = vector.load %arg15[%c228, %c0_113] : memref<536x128xf32, #tpu.memory_space<vmem>>, vector<8x16xf32>
    %c230 = arith.constant 230 : index
    %c0_114 = arith.constant 0 : index
    %148 = vector.load %arg15[%c230, %c0_114] : memref<536x128xf32, #tpu.memory_space<vmem>>, vector<8x16xf32>
    %149 = arith.maximumf %147, %148 : vector<8x16xf32>
    %c284 = arith.constant 284 : index
    %c0_115 = arith.constant 0 : index
    %150 = vector.load %arg15[%c284, %c0_115] : memref<536x128xf32, #tpu.memory_space<vmem>>, vector<8x16xf32>
    %c286 = arith.constant 286 : index
    %c0_116 = arith.constant 0 : index
    %151 = vector.load %arg15[%c286, %c0_116] : memref<536x128xf32, #tpu.memory_space<vmem>>, vector<8x16xf32>
    %152 = arith.maximumf %150, %151 : vector<8x16xf32>
    %153 = arith.maximumf %149, %152 : vector<8x16xf32>
    %c0_117 = arith.constant 0 : index
    %c176_118 = arith.constant 176 : index
    %154 = vector.load %arg16[%c0_117, %c176_118] : memref<8x400xf32, #tpu.memory_space<vmem>>, vector<8x16xf32>
    tpu.vector_store %arg16[%c0_117, %c176_118], %153 {strides = array<i32>} : memref<8x400xf32, #tpu.memory_space<vmem>>, vector<8x16xf32>,
    %c232 = arith.constant 232 : index
    %c0_119 = arith.constant 0 : index
    %155 = vector.load %arg15[%c232, %c0_119] : memref<536x128xf32, #tpu.memory_space<vmem>>, vector<8x16xf32>
    %c234 = arith.constant 234 : index
    %c0_120 = arith.constant 0 : index
    %156 = vector.load %arg15[%c234, %c0_120] : memref<536x128xf32, #tpu.memory_space<vmem>>, vector<8x16xf32>
    %157 = arith.maximumf %155, %156 : vector<8x16xf32>
    %c288 = arith.constant 288 : index
    %c0_121 = arith.constant 0 : index
    %158 = vector.load %arg15[%c288, %c0_121] : memref<536x128xf32, #tpu.memory_space<vmem>>, vector<8x16xf32>
    %c290 = arith.constant 290 : index
    %c0_122 = arith.constant 0 : index
    %159 = vector.load %arg15[%c290, %c0_122] : memref<536x128xf32, #tpu.memory_space<vmem>>, vector<8x16xf32>
    %160 = arith.maximumf %158, %159 : vector<8x16xf32>
    %161 = arith.maximumf %157, %160 : vector<8x16xf32>
    %c0_123 = arith.constant 0 : index
    %c192 = arith.constant 192 : index
    %162 = vector.load %arg16[%c0_123, %c192] : memref<8x400xf32, #tpu.memory_space<vmem>>, vector<8x16xf32>
    tpu.vector_store %arg16[%c0_123, %c192], %161 {strides = array<i32>} : memref<8x400xf32, #tpu.memory_space<vmem>>, vector<8x16xf32>,
    %c236 = arith.constant 236 : index
    %c0_124 = arith.constant 0 : index
    %163 = vector.load %arg15[%c236, %c0_124] : memref<536x128xf32, #tpu.memory_space<vmem>>, vector<8x16xf32>
    %c238 = arith.constant 238 : index
    %c0_125 = arith.constant 0 : index
    %164 = vector.load %arg15[%c238, %c0_125] : memref<536x128xf32, #tpu.memory_space<vmem>>, vector<8x16xf32>
    %165 = arith.maximumf %163, %164 : vector<8x16xf32>
    %c292 = arith.constant 292 : index
    %c0_126 = arith.constant 0 : index
    %166 = vector.load %arg15[%c292, %c0_126] : memref<536x128xf32, #tpu.memory_space<vmem>>, vector<8x16xf32>
    %c294 = arith.constant 294 : index
    %c0_127 = arith.constant 0 : index
    %167 = vector.load %arg15[%c294, %c0_127] : memref<536x128xf32, #tpu.memory_space<vmem>>, vector<8x16xf32>
    %168 = arith.maximumf %166, %167 : vector<8x16xf32>
    %169 = arith.maximumf %165, %168 : vector<8x16xf32>
    %c0_128 = arith.constant 0 : index
    %c208 = arith.constant 208 : index
    %170 = vector.load %arg16[%c0_128, %c208] : memref<8x400xf32, #tpu.memory_space<vmem>>, vector<8x16xf32>
    tpu.vector_store %arg16[%c0_128, %c208], %169 {strides = array<i32>} : memref<8x400xf32, #tpu.memory_space<vmem>>, vector<8x16xf32>,
    %c240 = arith.constant 240 : index
    %c0_129 = arith.constant 0 : index
    %171 = vector.load %arg15[%c240, %c0_129] : memref<536x128xf32, #tpu.memory_space<vmem>>, vector<8x16xf32>
    %c242 = arith.constant 242 : index
    %c0_130 = arith.constant 0 : index
    %172 = vector.load %arg15[%c242, %c0_130] : memref<536x128xf32, #tpu.memory_space<vmem>>, vector<8x16xf32>
    %173 = arith.maximumf %171, %172 : vector<8x16xf32>
    %c296 = arith.constant 296 : index
    %c0_131 = arith.constant 0 : index
    %174 = vector.load %arg15[%c296, %c0_131] : memref<536x128xf32, #tpu.memory_space<vmem>>, vector<8x16xf32>
    %c298 = arith.constant 298 : index
    %c0_132 = arith.constant 0 : index
    %175 = vector.load %arg15[%c298, %c0_132] : memref<536x128xf32, #tpu.memory_space<vmem>>, vector<8x16xf32>
    %176 = arith.maximumf %174, %175 : vector<8x16xf32>
    %177 = arith.maximumf %173, %176 : vector<8x16xf32>
    %c0_133 = arith.constant 0 : index
    %c224_134 = arith.constant 224 : index
    %178 = vector.load %arg16[%c0_133, %c224_134] : memref<8x400xf32, #tpu.memory_space<vmem>>, vector<8x16xf32>
    tpu.vector_store %arg16[%c0_133, %c224_134], %177 {strides = array<i32>} : memref<8x400xf32, #tpu.memory_space<vmem>>, vector<8x16xf32>,
    %c336 = arith.constant 336 : index
    %c0_135 = arith.constant 0 : index
    %179 = vector.load %arg15[%c336, %c0_135] : memref<536x128xf32, #tpu.memory_space<vmem>>, vector<8x16xf32>
    %c338 = arith.constant 338 : index
    %c0_136 = arith.constant 0 : index
    %180 = vector.load %arg15[%c338, %c0_136] : memref<536x128xf32, #tpu.memory_space<vmem>>, vector<8x16xf32>
    %181 = arith.maximumf %179, %180 : vector<8x16xf32>
    %c392 = arith.constant 392 : index
    %c0_137 = arith.constant 0 : index
    %182 = vector.load %arg15[%c392, %c0_137] : memref<536x128xf32, #tpu.memory_space<vmem>>, vector<8x16xf32>
    %c394 = arith.constant 394 : index
    %c0_138 = arith.constant 0 : index
    %183 = vector.load %arg15[%c394, %c0_138] : memref<536x128xf32, #tpu.memory_space<vmem>>, vector<8x16xf32>
    %184 = arith.maximumf %182, %183 : vector<8x16xf32>
    %185 = arith.maximumf %181, %184 : vector<8x16xf32>
    %c0_139 = arith.constant 0 : index
    %c240_140 = arith.constant 240 : index
    %186 = vector.load %arg16[%c0_139, %c240_140] : memref<8x400xf32, #tpu.memory_space<vmem>>, vector<8x16xf32>
    tpu.vector_store %arg16[%c0_139, %c240_140], %185 {strides = array<i32>} : memref<8x400xf32, #tpu.memory_space<vmem>>, vector<8x16xf32>,
    %c340 = arith.constant 340 : index
    %c0_141 = arith.constant 0 : index
    %187 = vector.load %arg15[%c340, %c0_141] : memref<536x128xf32, #tpu.memory_space<vmem>>, vector<8x16xf32>
    %c342 = arith.constant 342 : index
    %c0_142 = arith.constant 0 : index
    %188 = vector.load %arg15[%c342, %c0_142] : memref<536x128xf32, #tpu.memory_space<vmem>>, vector<8x16xf32>
    %189 = arith.maximumf %187, %188 : vector<8x16xf32>
    %c396 = arith.constant 396 : index
    %c0_143 = arith.constant 0 : index
    %190 = vector.load %arg15[%c396, %c0_143] : memref<536x128xf32, #tpu.memory_space<vmem>>, vector<8x16xf32>
    %c398 = arith.constant 398 : index
    %c0_144 = arith.constant 0 : index
    %191 = vector.load %arg15[%c398, %c0_144] : memref<536x128xf32, #tpu.memory_space<vmem>>, vector<8x16xf32>
    %192 = arith.maximumf %190, %191 : vector<8x16xf32>
    %193 = arith.maximumf %189, %192 : vector<8x16xf32>
    %c0_145 = arith.constant 0 : index
    %c256 = arith.constant 256 : index
    %194 = vector.load %arg16[%c0_145, %c256] : memref<8x400xf32, #tpu.memory_space<vmem>>, vector<8x16xf32>
    tpu.vector_store %arg16[%c0_145, %c256], %193 {strides = array<i32>} : memref<8x400xf32, #tpu.memory_space<vmem>>, vector<8x16xf32>,
    %c344 = arith.constant 344 : index
    %c0_146 = arith.constant 0 : index
    %195 = vector.load %arg15[%c344, %c0_146] : memref<536x128xf32, #tpu.memory_space<vmem>>, vector<8x16xf32>
    %c346 = arith.constant 346 : index
    %c0_147 = arith.constant 0 : index
    %196 = vector.load %arg15[%c346, %c0_147] : memref<536x128xf32, #tpu.memory_space<vmem>>, vector<8x16xf32>
    %197 = arith.maximumf %195, %196 : vector<8x16xf32>
    %c400 = arith.constant 400 : index
    %c0_148 = arith.constant 0 : index
    %198 = vector.load %arg15[%c400, %c0_148] : memref<536x128xf32, #tpu.memory_space<vmem>>, vector<8x16xf32>
    %c402 = arith.constant 402 : index
    %c0_149 = arith.constant 0 : index
    %199 = vector.load %arg15[%c402, %c0_149] : memref<536x128xf32, #tpu.memory_space<vmem>>, vector<8x16xf32>
    %200 = arith.maximumf %198, %199 : vector<8x16xf32>
    %201 = arith.maximumf %197, %200 : vector<8x16xf32>
    %c0_150 = arith.constant 0 : index
    %c272 = arith.constant 272 : index
    %202 = vector.load %arg16[%c0_150, %c272] : memref<8x400xf32, #tpu.memory_space<vmem>>, vector<8x16xf32>
    tpu.vector_store %arg16[%c0_150, %c272], %201 {strides = array<i32>} : memref<8x400xf32, #tpu.memory_space<vmem>>, vector<8x16xf32>,
    %c348 = arith.constant 348 : index
    %c0_151 = arith.constant 0 : index
    %203 = vector.load %arg15[%c348, %c0_151] : memref<536x128xf32, #tpu.memory_space<vmem>>, vector<8x16xf32>
    %c350 = arith.constant 350 : index
    %c0_152 = arith.constant 0 : index
    %204 = vector.load %arg15[%c350, %c0_152] : memref<536x128xf32, #tpu.memory_space<vmem>>, vector<8x16xf32>
    %205 = arith.maximumf %203, %204 : vector<8x16xf32>
    %c404 = arith.constant 404 : index
    %c0_153 = arith.constant 0 : index
    %206 = vector.load %arg15[%c404, %c0_153] : memref<536x128xf32, #tpu.memory_space<vmem>>, vector<8x16xf32>
    %c406 = arith.constant 406 : index
    %c0_154 = arith.constant 0 : index
    %207 = vector.load %arg15[%c406, %c0_154] : memref<536x128xf32, #tpu.memory_space<vmem>>, vector<8x16xf32>
    %208 = arith.maximumf %206, %207 : vector<8x16xf32>
    %209 = arith.maximumf %205, %208 : vector<8x16xf32>
    %c0_155 = arith.constant 0 : index
    %c288_156 = arith.constant 288 : index
    %210 = vector.load %arg16[%c0_155, %c288_156] : memref<8x400xf32, #tpu.memory_space<vmem>>, vector<8x16xf32>
    tpu.vector_store %arg16[%c0_155, %c288_156], %209 {strides = array<i32>} : memref<8x400xf32, #tpu.memory_space<vmem>>, vector<8x16xf32>,
    %c352 = arith.constant 352 : index
    %c0_157 = arith.constant 0 : index
    %211 = vector.load %arg15[%c352, %c0_157] : memref<536x128xf32, #tpu.memory_space<vmem>>, vector<8x16xf32>
    %c354 = arith.constant 354 : index
    %c0_158 = arith.constant 0 : index
    %212 = vector.load %arg15[%c354, %c0_158] : memref<536x128xf32, #tpu.memory_space<vmem>>, vector<8x16xf32>
    %213 = arith.maximumf %211, %212 : vector<8x16xf32>
    %c408 = arith.constant 408 : index
    %c0_159 = arith.constant 0 : index
    %214 = vector.load %arg15[%c408, %c0_159] : memref<536x128xf32, #tpu.memory_space<vmem>>, vector<8x16xf32>
    %c410 = arith.constant 410 : index
    %c0_160 = arith.constant 0 : index
    %215 = vector.load %arg15[%c410, %c0_160] : memref<536x128xf32, #tpu.memory_space<vmem>>, vector<8x16xf32>
    %216 = arith.maximumf %214, %215 : vector<8x16xf32>
    %217 = arith.maximumf %213, %216 : vector<8x16xf32>
    %c0_161 = arith.constant 0 : index
    %c304 = arith.constant 304 : index
    %218 = vector.load %arg16[%c0_161, %c304] : memref<8x400xf32, #tpu.memory_space<vmem>>, vector<8x16xf32>
    tpu.vector_store %arg16[%c0_161, %c304], %217 {strides = array<i32>} : memref<8x400xf32, #tpu.memory_space<vmem>>, vector<8x16xf32>,
    %c448 = arith.constant 448 : index
    %c0_162 = arith.constant 0 : index
    %219 = vector.load %arg15[%c448, %c0_162] : memref<536x128xf32, #tpu.memory_space<vmem>>, vector<8x16xf32>
    %c450 = arith.constant 450 : index
    %c0_163 = arith.constant 0 : index
    %220 = vector.load %arg15[%c450, %c0_163] : memref<536x128xf32, #tpu.memory_space<vmem>>, vector<8x16xf32>
    %221 = arith.maximumf %219, %220 : vector<8x16xf32>
    %c504 = arith.constant 504 : index
    %c0_164 = arith.constant 0 : index
    %222 = vector.load %arg15[%c504, %c0_164] : memref<536x128xf32, #tpu.memory_space<vmem>>, vector<8x16xf32>
    %c506 = arith.constant 506 : index
    %c0_165 = arith.constant 0 : index
    %223 = vector.load %arg15[%c506, %c0_165] : memref<536x128xf32, #tpu.memory_space<vmem>>, vector<8x16xf32>
    %224 = arith.maximumf %222, %223 : vector<8x16xf32>
    %225 = arith.maximumf %221, %224 : vector<8x16xf32>
    %c0_166 = arith.constant 0 : index
    %c320 = arith.constant 320 : index
    %226 = vector.load %arg16[%c0_166, %c320] : memref<8x400xf32, #tpu.memory_space<vmem>>, vector<8x16xf32>
    tpu.vector_store %arg16[%c0_166, %c320], %225 {strides = array<i32>} : memref<8x400xf32, #tpu.memory_space<vmem>>, vector<8x16xf32>,
    %c452 = arith.constant 452 : index
    %c0_167 = arith.constant 0 : index
    %227 = vector.load %arg15[%c452, %c0_167] : memref<536x128xf32, #tpu.memory_space<vmem>>, vector<8x16xf32>
    %c454 = arith.constant 454 : index
    %c0_168 = arith.constant 0 : index
    %228 = vector.load %arg15[%c454, %c0_168] : memref<536x128xf32, #tpu.memory_space<vmem>>, vector<8x16xf32>
    %229 = arith.maximumf %227, %228 : vector<8x16xf32>
    %c508 = arith.constant 508 : index
    %c0_169 = arith.constant 0 : index
    %230 = vector.load %arg15[%c508, %c0_169] : memref<536x128xf32, #tpu.memory_space<vmem>>, vector<8x16xf32>
    %c510 = arith.constant 510 : index
    %c0_170 = arith.constant 0 : index
    %231 = vector.load %arg15[%c510, %c0_170] : memref<536x128xf32, #tpu.memory_space<vmem>>, vector<8x16xf32>
    %232 = arith.maximumf %230, %231 : vector<8x16xf32>
    %233 = arith.maximumf %229, %232 : vector<8x16xf32>
    %c0_171 = arith.constant 0 : index
    %c336_172 = arith.constant 336 : index
    %234 = vector.load %arg16[%c0_171, %c336_172] : memref<8x400xf32, #tpu.memory_space<vmem>>, vector<8x16xf32>
    tpu.vector_store %arg16[%c0_171, %c336_172], %233 {strides = array<i32>} : memref<8x400xf32, #tpu.memory_space<vmem>>, vector<8x16xf32>,
    %c456 = arith.constant 456 : index
    %c0_173 = arith.constant 0 : index
    %235 = vector.load %arg15[%c456, %c0_173] : memref<536x128xf32, #tpu.memory_space<vmem>>, vector<8x16xf32>
    %c458 = arith.constant 458 : index
    %c0_174 = arith.constant 0 : index
    %236 = vector.load %arg15[%c458, %c0_174] : memref<536x128xf32, #tpu.memory_space<vmem>>, vector<8x16xf32>
    %237 = arith.maximumf %235, %236 : vector<8x16xf32>
    %c512 = arith.constant 512 : index
    %c0_175 = arith.constant 0 : index
    %238 = vector.load %arg15[%c512, %c0_175] : memref<536x128xf32, #tpu.memory_space<vmem>>, vector<8x16xf32>
    %c514 = arith.constant 514 : index
    %c0_176 = arith.constant 0 : index
    %239 = vector.load %arg15[%c514, %c0_176] : memref<536x128xf32, #tpu.memory_space<vmem>>, vector<8x16xf32>
    %240 = arith.maximumf %238, %239 : vector<8x16xf32>
    %241 = arith.maximumf %237, %240 : vector<8x16xf32>
    %c0_177 = arith.constant 0 : index
    %c352_178 = arith.constant 352 : index
    %242 = vector.load %arg16[%c0_177, %c352_178] : memref<8x400xf32, #tpu.memory_space<vmem>>, vector<8x16xf32>
    tpu.vector_store %arg16[%c0_177, %c352_178], %241 {strides = array<i32>} : memref<8x400xf32, #tpu.memory_space<vmem>>, vector<8x16xf32>,
    %c460 = arith.constant 460 : index
    %c0_179 = arith.constant 0 : index
    %243 = vector.load %arg15[%c460, %c0_179] : memref<536x128xf32, #tpu.memory_space<vmem>>, vector<8x16xf32>
    %c462 = arith.constant 462 : index
    %c0_180 = arith.constant 0 : index
    %244 = vector.load %arg15[%c462, %c0_180] : memref<536x128xf32, #tpu.memory_space<vmem>>, vector<8x16xf32>
    %245 = arith.maximumf %243, %244 : vector<8x16xf32>
    %c516 = arith.constant 516 : index
    %c0_181 = arith.constant 0 : index
    %246 = vector.load %arg15[%c516, %c0_181] : memref<536x128xf32, #tpu.memory_space<vmem>>, vector<8x16xf32>
    %c518 = arith.constant 518 : index
    %c0_182 = arith.constant 0 : index
    %247 = vector.load %arg15[%c518, %c0_182] : memref<536x128xf32, #tpu.memory_space<vmem>>, vector<8x16xf32>
    %248 = arith.maximumf %246, %247 : vector<8x16xf32>
    %249 = arith.maximumf %245, %248 : vector<8x16xf32>
    %c0_183 = arith.constant 0 : index
    %c368 = arith.constant 368 : index
    %250 = vector.load %arg16[%c0_183, %c368] : memref<8x400xf32, #tpu.memory_space<vmem>>, vector<8x16xf32>
    tpu.vector_store %arg16[%c0_183, %c368], %249 {strides = array<i32>} : memref<8x400xf32, #tpu.memory_space<vmem>>, vector<8x16xf32>,
    %c464 = arith.constant 464 : index
    %c0_184 = arith.constant 0 : index
    %251 = vector.load %arg15[%c464, %c0_184] : memref<536x128xf32, #tpu.memory_space<vmem>>, vector<8x16xf32>
    %c466 = arith.constant 466 : index
    %c0_185 = arith.constant 0 : index
    %252 = vector.load %arg15[%c466, %c0_185] : memref<536x128xf32, #tpu.memory_space<vmem>>, vector<8x16xf32>
    %253 = arith.maximumf %251, %252 : vector<8x16xf32>
    %c520 = arith.constant 520 : index
    %c0_186 = arith.constant 0 : index
    %254 = vector.load %arg15[%c520, %c0_186] : memref<536x128xf32, #tpu.memory_space<vmem>>, vector<8x16xf32>
    %c522 = arith.constant 522 : index
    %c0_187 = arith.constant 0 : index
    %255 = vector.load %arg15[%c522, %c0_187] : memref<536x128xf32, #tpu.memory_space<vmem>>, vector<8x16xf32>
    %256 = arith.maximumf %254, %255 : vector<8x16xf32>
    %257 = arith.maximumf %253, %256 : vector<8x16xf32>
    %c0_188 = arith.constant 0 : index
    %c384 = arith.constant 384 : index
    %258 = vector.load %arg16[%c0_188, %c384] : memref<8x400xf32, #tpu.memory_space<vmem>>, vector<8x16xf32>
    tpu.vector_store %arg16[%c0_188, %c384], %257 {strides = array<i32>} : memref<8x400xf32, #tpu.memory_space<vmem>>, vector<8x16xf32>,
    %c0_189 = arith.constant 0 : index
    %c0_190 = arith.constant 0 : index
    %259 = vector.load %arg16[%c0_189, %c0_190] : memref<8x400xf32, #tpu.memory_space<vmem>>, vector<8x400xf32>
    %260 = arith.truncf %259 : vector<8x400xf32> to vector<8x400xbf16>
    %c0_191 = arith.constant 0 : index
    %c0_192 = arith.constant 0 : index
    %261 = vector.load %arg6[%c0_191, %c0_192] : memref<400x128xbf16, #tpu.memory_space<vmem>>, vector<400x128xbf16>
    %cst_193 = arith.constant dense<0.000000e+00> : vector<8x128xf32>
    %262 = tpu.matmul %260, %261, %cst_193 {dimension_numbers = #tpu.dot_dimension_numbers<[1], [0], [0], [1], [0, 0, 1, 1], [], []>} : vector<8x400xbf16>, vector<400x128xbf16>, vector<8x128xf32> -> vector<8x128xf32>
    %c0_194 = arith.constant 0 : index
    %c0_195 = arith.constant 0 : index
    %263 = vector.load %arg7[%c0_194, %c0_195] : memref<1x128xf32, #tpu.memory_space<vmem>>, vector<1x128xf32>
    %264 = vector.broadcast %263 : vector<1x128xf32> to vector<8x128xf32>
    %265 = arith.addf %262, %264 : vector<8x128xf32>
    %cst_196 = arith.constant 0.000000e+00 : f32
    %266 = vector.broadcast %cst_196 : f32 to vector<8x128xf32>
    %267 = arith.cmpf ogt, %265, %266 : vector<8x128xf32>
    %cst_197 = arith.constant 1.000000e-01 : f32
    %268 = vector.broadcast %cst_197 : f32 to vector<8x128xf32>
    %269 = arith.mulf %268, %265 : vector<8x128xf32>
    %270 = arith.select %267, %265, %269 : vector<8x128xi1>, vector<8x128xf32>
    %271 = arith.truncf %270 : vector<8x128xf32> to vector<8x128xbf16>
    %c0_198 = arith.constant 0 : index
    %c0_199 = arith.constant 0 : index
    %272 = vector.load %arg8[%c0_198, %c0_199] : memref<128x128xbf16, #tpu.memory_space<vmem>>, vector<128x128xbf16>
    %cst_200 = arith.constant dense<0.000000e+00> : vector<8x128xf32>
    %273 = tpu.matmul %271, %272, %cst_200 {dimension_numbers = #tpu.dot_dimension_numbers<[1], [0], [0], [1], [0, 0, 1, 1], [], []>} : vector<8x128xbf16>, vector<128x128xbf16>, vector<8x128xf32> -> vector<8x128xf32>
    %c0_201 = arith.constant 0 : index
    %c0_202 = arith.constant 0 : index
    %274 = vector.load %arg9[%c0_201, %c0_202] : memref<1x128xf32, #tpu.memory_space<vmem>>, vector<1x128xf32>
    %275 = vector.broadcast %274 : vector<1x128xf32> to vector<8x128xf32>
    %276 = arith.addf %273, %275 : vector<8x128xf32>
    %cst_203 = arith.constant 0.000000e+00 : f32
    %277 = vector.broadcast %cst_203 : f32 to vector<8x128xf32>
    %278 = arith.cmpf ogt, %276, %277 : vector<8x128xf32>
    %cst_204 = arith.constant 1.000000e-01 : f32
    %279 = vector.broadcast %cst_204 : f32 to vector<8x128xf32>
    %280 = arith.mulf %279, %276 : vector<8x128xf32>
    %281 = arith.select %278, %276, %280 : vector<8x128xi1>, vector<8x128xf32>
    %282 = arith.truncf %281 : vector<8x128xf32> to vector<8x128xbf16>
    %c0_205 = arith.constant 0 : index
    %c0_206 = arith.constant 0 : index
    %283 = vector.load %arg10[%c0_205, %c0_206] : memref<128x128xbf16, #tpu.memory_space<vmem>>, vector<128x128xbf16>
    %cst_207 = arith.constant dense<0.000000e+00> : vector<8x128xf32>
    %284 = tpu.matmul %282, %283, %cst_207 {dimension_numbers = #tpu.dot_dimension_numbers<[1], [0], [0], [1], [0, 0, 1, 1], [], []>} : vector<8x128xbf16>, vector<128x128xbf16>, vector<8x128xf32> -> vector<8x128xf32>
    %c0_208 = arith.constant 0 : index
    %c0_209 = arith.constant 0 : index
    %285 = vector.load %arg11[%c0_208, %c0_209] : memref<1x128xf32, #tpu.memory_space<vmem>>, vector<1x128xf32>
    %286 = vector.broadcast %285 : vector<1x128xf32> to vector<8x128xf32>
    %287 = arith.addf %284, %286 : vector<8x128xf32>
    %c0_210 = arith.constant 0 : index
    %c0_211 = arith.constant 0 : index
    %c0_212 = arith.constant 0 : index
    %288 = vector.load %arg12[%c0_210, %c0_211, %c0_212] : memref<1x8x128xf32, #tpu.memory_space<vmem>>, vector<1x8x128xf32>
    %289 = vector.shape_cast %288 : vector<1x8x128xf32> to vector<8x128xf32>
    %290 = vector.shape_cast %287 : vector<8x128xf32> to vector<1x8x128xf32>
    tpu.vector_store %arg12[%c0_210, %c0_211, %c0_212], %290 {strides = array<i32>} : memref<1x8x128xf32, #tpu.memory_space<vmem>>, vector<1x8x128xf32>,
    return
  }
  func.func @transform_0(%arg0: i32) -> (i32, i32, i32) {
    %c0_i32 = arith.constant 0 : i32
    %c0_i32_0 = arith.constant 0 : i32
    %c0_i32_1 = arith.constant 0 : i32
    return %arg0, %c0_i32, %c0_i32_0 : i32, i32, i32
  }
  func.func @transform_1(%arg0: i32) -> (i32, i32) {
    %c0_i32 = arith.constant 0 : i32
    %c0_i32_0 = arith.constant 0 : i32
    %c0_i32_1 = arith.constant 0 : i32
    return %c0_i32, %c0_i32_0 : i32, i32
  }
  func.func @transform_2(%arg0: i32) -> (i32, i32) {
    %c0_i32 = arith.constant 0 : i32
    %c0_i32_0 = arith.constant 0 : i32
    %c0_i32_1 = arith.constant 0 : i32
    return %c0_i32, %c0_i32_0 : i32, i32
  }
  func.func @transform_3(%arg0: i32) -> (i32, i32, i32) {
    %c0_i32 = arith.constant 0 : i32
    %c0_i32_0 = arith.constant 0 : i32
    %c0_i32_1 = arith.constant 0 : i32
    %c0_i32_2 = arith.constant 0 : i32
    return %c0_i32, %c0_i32_0, %c0_i32_1 : i32, i32, i32
  }
  func.func @transform_4(%arg0: i32) -> (i32, i32) {
    %c0_i32 = arith.constant 0 : i32
    %c0_i32_0 = arith.constant 0 : i32
    %c0_i32_1 = arith.constant 0 : i32
    return %c0_i32, %c0_i32_0 : i32, i32
  }
  func.func @transform_5(%arg0: i32) -> (i32, i32) {
    %c0_i32 = arith.constant 0 : i32
    %c0_i32_0 = arith.constant 0 : i32
    %c0_i32_1 = arith.constant 0 : i32
    return %c0_i32, %c0_i32_0 : i32, i32
  }
  func.func @transform_6(%arg0: i32) -> (i32, i32) {
    %c0_i32 = arith.constant 0 : i32
    %c0_i32_0 = arith.constant 0 : i32
    %c0_i32_1 = arith.constant 0 : i32
    return %c0_i32, %c0_i32_0 : i32, i32
  }
  func.func @transform_7(%arg0: i32) -> (i32, i32) {
    %c0_i32 = arith.constant 0 : i32
    %c0_i32_0 = arith.constant 0 : i32
    %c0_i32_1 = arith.constant 0 : i32
    return %c0_i32, %c0_i32_0 : i32, i32
  }
  func.func @transform_8(%arg0: i32) -> (i32, i32) {
    %c0_i32 = arith.constant 0 : i32
    %c0_i32_0 = arith.constant 0 : i32
    %c0_i32_1 = arith.constant 0 : i32
    return %c0_i32, %c0_i32_0 : i32, i32
  }
  func.func @transform_9(%arg0: i32) -> (i32, i32) {
    %c0_i32 = arith.constant 0 : i32
    %c0_i32_0 = arith.constant 0 : i32
    %c0_i32_1 = arith.constant 0 : i32
    return %c0_i32, %c0_i32_0 : i32, i32
  }
  func.func @transform_10(%arg0: i32) -> (i32, i32) {
    %c0_i32 = arith.constant 0 : i32
    %c0_i32_0 = arith.constant 0 : i32
    %c0_i32_1 = arith.constant 0 : i32
    return %c0_i32, %c0_i32_0 : i32, i32
  }
  func.func @transform_11(%arg0: i32) -> (i32, i32, i32) {
    %c0_i32 = arith.constant 0 : i32
    %c0_i32_0 = arith.constant 0 : i32
    %c0_i32_1 = arith.constant 0 : i32
    return %arg0, %c0_i32, %c0_i32_0 : i32, i32, i32
  }
}

</mosaic_0001>

<bundles_post_ra>
// kernel: net_leaky_forward.1
= control target key start
LH: loop header
LB: loop body
LE: loop exit
PB: predicated region body
PF: predicated region fallthrough
CT: control target
= control target key end

     0   :  { %s7744_s17 = smov 0   ;;  %s9789_s0 = inlined_call_operand.vmem [shape: bf16[2,792,256], index: 0, kind: input, shape index: {}]   ;;  %s9790_s1 = inlined_call_operand.vmem [shape: bf16[256,128], index: 1, kind: input, shape index: {}]   ;;  %s9791_s2 = inlined_call_operand.vmem [shape: f32[1,128], index: 2, kind: input, shape index: {}]   ;;  %s9792_s3 = inlined_call_operand.vmem [shape: bf16[5,128,128], index: 3, kind: input, shape index: {}]   ;;  %s9793_s4 = inlined_call_operand.vmem [shape: f32[1,128], index: 4, kind: input, shape index: {}]   ;;  %s9794_s5 = inlined_call_operand.vmem [shape: bf16[400,128], index: 5, kind: input, shape index: {}]   ;;  %s9795_s6 = inlined_call_operand.vmem [shape: f32[1,128], index: 6, kind: input, shape index: {}]   ;;  %s9796_s7 = inlined_call_operand.vmem [shape: bf16[128,128], index: 7, kind: input, shape index: {}]   ;;  %s9797_s8 = inlined_call_operand.vmem [shape: f32[1,128], index: 8, kind: input, shape index: {}]   ;;  %s9798_s9 = inlined_call_operand.vmem [shape: bf16[128,128], index: 9, kind: input, shape index: {}]   ;;  %s9799_s10 = inlined_call_operand.vmem [shape: f32[1,128], index: 10, kind: input, shape index: {}]   ;;  %s9800_s11 = inlined_call_operand.vmem [shape: f32[2,8,128], index: 11, kind: output, shape index: {}]  }
   0x1 LB: > { %s6411_s18 = sadd.s32 4294967295, %s7672_s17   ;;  %p6415_p0 = scmp.ge.s32.totalorder %s7672_s17, 1  ;;  %s7672_s17 = sphi %s7744_s17, %s21_s17  }
   0x2   : > { %p337_p1 = scmp.lt.s32.totalorder %s7672_s17, 3 }
   0x4   : > { %p338_p2 = pnand %p6415_p0, %p337_p1 }
   0x6   : > { %341 = sbr.rel (%p338_p2) target bundleno = 1951 (0x79f), region = 64 }
   0xb   : > { %v7416_v0 = vld [vmem:[%s9790_s1 + $0x38] sm:$0xff]   ;;  %v9801_v1 = vmov 0   ;;  %v7417_v2 = vld [vmem:[%s9790_s1 + $0x30] sm:$0xff]   ;;  %p376_p3 = scmp.lt.s32.totalorder %s6411_s18, 1  ;;  %v7418_v3 = vld [vmem:[%s9790_s1 + $0x28] sm:$0xff]   ;;  %s7675_s30 = smov 16  }
   0xc   : > { %1117 = vmatprep.subr.bf16.mxu0 %v9801_v1  ;;  %v7419_v4 = vld [vmem:[%s9790_s1 + $0x20] sm:$0xff]   ;;  %v7420_v5 = vld [vmem:[%s9790_s1 + $0x18] sm:$0xff]   ;;  %v7421_v7 = vld [vmem:[%s9790_s1 + $0x10] sm:$0xff]   ;;  %s7676_s12 = smov 32   ;;  %s7677_s14 = smov 48  }
   0xd   : > { %1118 = vmatpush1.bf16.msra.mxu0 %v7416_v0  ;;  %s10103_s18 = smov (!%p376_p3, %s6411_s18), 1  ;;  %v7422_v8 = vld [vmem:[%s9790_s1 + $0x8] sm:$0xff]   ;;  %v7423_v9 = vld [vmem:[%s9790_s1] sm:$0xff]   ;;  %v7424_v10 = vld [vmem:[%s9790_s1 + $0x78] sm:$0xff]   ;;  %s7678_s15 = smov 64  }
   0xe   : > { %1119 = vmatprep.subr.bf16.mxu0 %v9801_v1  ;;  %s7397_s27 = smul.u32 792, %s10103_s18  ;;  %v7425_v11 = vld [vmem:[%s9790_s1 + $0x70] sm:$0xff]   ;;  %v7426_v12 = vld [vmem:[%s9790_s1 + $0x68] sm:$0xff]   ;;  %v7427_v13 = vld [vmem:[%s9790_s1 + $0x60] sm:$0xff]   ;;  %s7679_s29 = smov 112  }
   0xf   : > { %v7428_v14 = vld [vmem:[%s9790_s1 + $0x58] sm:$0xff]   ;;  %v7429_v15 = vld [vmem:[%s9790_s1 + $0x50] sm:$0xff]   ;;  %v7430_v16 = vld [vmem:[%s9790_s1 + $0x48] sm:$0xff]   ;;  %s7680_s16 = smov 80   ;;  %s7681_s19 = smov 96  }
  0x10   : > { %s7777_s13 = scalar_lea.vmem %s9789_s0, %s7397_s27  ;;  %v7431_v17 = vld [vmem:[%s9790_s1 + $0x40] sm:$0xff]   ;;  %v7522_v46 = vld [vmem:[%s9792_s3 + $0x78] sm:$0xff]   ;;  %v7526_v49 = vld [vmem:[%s9792_s3 + $0x70] sm:$0xff]  }
  0x11   : > { %1120 = vmatpush1.bf16.msra.mxu0 %v7417_v2  ;;  %v7434_v6 = vld [vmem:[%s7777_s13 + $0x4] ss:$8 sps:$4 sm:$0xff]   ;;  %v7432_v18 = vld [vmem:[%s7777_s13] ss:$8 sps:$4 sm:$0xff]   ;;  %v7435_v19 = vld [vmem:[%s7777_s13 + $0x14] ss:$8 sps:$4 sm:$0xff]   ;;  %6937 = vmatprep.subr.bf16.mxu1 %v7522_v46 }
  0x12   : > { %1121 = vmatprep.subr.bf16.mxu0 %v9801_v1  ;;  %1149 = vmatprep.mubr.bf16.mxu0 %v7434_v6  ;;  %v7437_v20 = vld [vmem:[%s7777_s13 + $0x10] ss:$8 sps:$4 sm:$0xff]   ;;  %v7438_v21 = vld [vmem:[%s7777_s13 + $0x24] ss:$8 sps:$4 sm:$0xff]   ;;  %v7440_v22 = vld [vmem:[%s7777_s13 + $0x20] ss:$8 sps:$4 sm:$0xff]  }
  0x13   : > { %v7441_v23 = vld [vmem:[%s7777_s13 + $0x34] ss:$8 sps:$4 sm:$0xff]   ;;  %v7443_v24 = vld [vmem:[%s7777_s13 + $0x30] ss:$8 sps:$4 sm:$0xff]   ;;  %v7444_v25 = vld [vmem:[%s7777_s13 + $0x44] ss:$8 sps:$4 sm:$0xff]   ;;  %6938 = vmatpush3.bf16.msra.mxu1 %v7522_v46 }
  0x14   : > { %v7446_v26 = vld [vmem:[%s7777_s13 + $0x40] ss:$8 sps:$4 sm:$0xff]   ;;  %v7447_v27 = vld [vmem:[%s7777_s13 + $0x54] ss:$8 sps:$4 sm:$0xff]   ;;  %v7449_v28 = vld [vmem:[%s7777_s13 + $0x50] ss:$8 sps:$4 sm:$0xff]   ;;  %6939 = vmatprep.subr.bf16.mxu1 %v7526_v49 }
  0x15   : > { %1122 = vmatpush1.bf16.msra.mxu0 %v7418_v3  ;;  %v7450_v29 = vld [vmem:[%s7777_s13 + $0x64] ss:$8 sps:$4 sm:$0xff]   ;;  %v7452_v30 = vld [vmem:[%s7777_s13 + $0x60] ss:$8 sps:$4 sm:$0xff]   ;;  %v7453_v31 = vld [vmem:[%s7777_s13 + $0x74] ss:$8 sps:$4 sm:$0xff]  }
  0x16   : > { %1123 = vmatprep.subr.bf16.mxu0 %v9801_v1  ;;  %v7455_v32 = vld [vmem:[%s7777_s13 + $0x70] ss:$8 sps:$4 sm:$0xff]   ;;  %v7456_v33 = vld [vmem:[%s7777_s13 + $0x84] ss:$8 sps:$4 sm:$0xff]   ;;  %v7458_v34 = vld [vmem:[%s7777_s13 + $0x80] ss:$8 sps:$4 sm:$0xff]  }
  0x17   : > { %v7459_v35 = vld [vmem:[%s7777_s13 + $0x94] ss:$8 sps:$4 sm:$0xff]   ;;  %v7461_v36 = vld [vmem:[%s7777_s13 + $0x90] ss:$8 sps:$4 sm:$0xff]   ;;  %v7462_v37 = vld [vmem:[%s7777_s13 + $0xa4] ss:$8 sps:$4 sm:$0xff]   ;;  %6940 = vmatpush3.bf16.msra.mxu1 %v7526_v49 }
  0x18   : > { %v7464_v38 = vld [vmem:[%s7777_s13 + $0xa0] ss:$8 sps:$4 sm:$0xff]   ;;  %v7465_v39 = vld [vmem:[%s7777_s13 + $0xb4] ss:$8 sps:$4 sm:$0xff]   ;;  %v7467_v40 = vld [vmem:[%s7777_s13 + $0xb0] ss:$8 sps:$4 sm:$0xff]  }
  0x19   : > { %1124 = vmatpush1.bf16.msra.mxu0 %v7419_v4  ;;  %v7468_v41 = vld [vmem:[%s7777_s13 + $0xc4] ss:$8 sps:$4 sm:$0xff]   ;;  %v7470_v42 = vld [vmem:[%s7777_s13 + $0xc0] ss:$8 sps:$4 sm:$0xff]   ;;  %v7471_v43 = vld [vmem:[%s7777_s13 + $0xd4] ss:$8 sps:$4 sm:$0xff]  }
  0x1a   : > { %1125 = vmatprep.subr.bf16.mxu0 %v9801_v1  ;;  %v7473_v44 = vld [vmem:[%s7777_s13 + $0xd0] ss:$8 sps:$4 sm:$0xff]   ;;  %v7474_v45 = vld [vmem:[%s7777_s13 + $0xe4] ss:$8 sps:$4 sm:$0xff]   ;;  %v7476_v47 = vld [vmem:[%s7777_s13 + $0xe0] ss:$8 sps:$4 sm:$0xff]  }
  0x1b   : > { %v7477_v48 = vld [vmem:[%s7777_s13 + $0xf4] ss:$8 sps:$4 sm:$0xff]   ;;  %v7527_v50 = vld [vmem:[%s9792_s3 + $0x68] sm:$0xff]   ;;  %v7479_v51 = vld [vmem:[%s7777_s13 + $0xf0] ss:$8 sps:$4 sm:$0xff]  }
  0x1c   : > { %6941 = vmatprep.subr.bf16.mxu1 %v7527_v50  ;;  %v7480_v52 = vld [vmem:[%s7777_s13 + $0x104] ss:$8 sps:$4 sm:$0xff]   ;;  %v7532_v54 = vld [vmem:[%s9792_s3 + $0x58] sm:$0xff]   ;;  %v7482_v55 = vld [vmem:[%s7777_s13 + $0x100] ss:$8 sps:$4 sm:$0xff]  }
  0x1d   : > { %1126 = vmatpush1.bf16.msra.mxu0 %v7420_v5  ;;  %6942 = vmatpush3.bf16.msra.mxu1 %v7527_v50  ;;  %v7531_v53 = vld [vmem:[%s9792_s3 + $0x60] sm:$0xff]   ;;  %v7483_v56 = vld [vmem:[%s7777_s13 + $0x114] ss:$8 sps:$4 sm:$0xff]   ;;  %v7537_v58 = vld [vmem:[%s9792_s3 + $0x48] sm:$0xff]  }
  0x1e   : > { %1127 = vmatprep.subr.bf16.mxu0 %v9801_v1  ;;  %6943 = vmatprep.subr.bf16.mxu1 %v7531_v53  ;;  %v7536_v57 = vld [vmem:[%s9792_s3 + $0x50] sm:$0xff]   ;;  %v7486_v60 = vld [vmem:[%s7777_s13 + $0x124] ss:$8 sps:$4 sm:$0xff]   ;;  %v7488_v62 = vld [vmem:[%s7777_s13 + $0x120] ss:$8 sps:$4 sm:$0xff]  }
  0x1f   : > { %v7485_v59 = vld [vmem:[%s7777_s13 + $0x110] ss:$8 sps:$4 sm:$0xff]   ;;  %v7541_v61 = vld [vmem:[%s9792_s3 + $0x40] sm:$0xff]   ;;  %v7489_v63 = vld [vmem:[%s7777_s13 + $0x134] ss:$8 sps:$4 sm:$0xff]  }
  0x20   : > { %v7491_v0 = vld [vmem:[%s7777_s13 + $0x130] ss:$8 sps:$4 sm:$0xff]   ;;  %v7492_v2 = vld [vmem:[%s7777_s13 + $0x144] ss:$8 sps:$4 sm:$0xff]   ;;  %v7494_v3 = vld [vmem:[%s7777_s13 + $0x140] ss:$8 sps:$4 sm:$0xff]  }
  0x21   : > { %1128 = vmatpush1.bf16.msra.mxu0 %v7421_v7  ;;  %6944 = vmatpush3.bf16.msra.mxu1 %v7531_v53  ;;  %v7495_v4 = vld [vmem:[%s7777_s13 + $0x154] ss:$8 sps:$4 sm:$0xff]   ;;  %v7497_v5 = vld [vmem:[%s7777_s13 + $0x150] ss:$8 sps:$4 sm:$0xff]   ;;  %v7498_v6 = vld [vmem:[%s7777_s13 + $0x164] ss:$8 sps:$4 sm:$0xff]  }
  0x22   : > { %1129 = vmatprep.subr.bf16.mxu0 %v9801_v1  ;;  %6945 = vmatprep.subr.bf16.mxu1 %v7532_v54  ;;  %v7500_v7 = vld [vmem:[%s7777_s13 + $0x160] ss:$8 sps:$4 sm:$0xff]   ;;  %v7518_v46 = vld [vmem:[%s7777_s13 + $0x1c4] ss:$8 sps:$4 sm:$0xff]  }
  0x25   : > { %1130 = vmatpush1.bf16.msra.mxu0 %v7422_v8  ;;  %6946 = vmatpush3.bf16.msra.mxu1 %v7532_v54  ;;  %v7501_v8 = vld [vmem:[%s7777_s13 + $0x174] ss:$8 sps:$4 sm:$0xff]  }
  0x26   : > { %1131 = vmatprep.subr.bf16.mxu0 %v9801_v1  ;;  %6947 = vmatprep.subr.bf16.mxu1 %v7536_v57 }
  0x29   : > { %1132 = vmatpush1.bf16.msra.mxu0 %v7423_v9  ;;  %6948 = vmatpush3.bf16.msra.mxu1 %v7536_v57  ;;  %v7503_v9 = vld [vmem:[%s7777_s13 + $0x170] ss:$8 sps:$4 sm:$0xff]  }
  0x2a   : > { %1133 = vmatprep.subr.bf16.mxu0 %v9801_v1  ;;  %6949 = vmatprep.subr.bf16.mxu1 %v7537_v58 }
  0x2d   : > { %1134 = vmatpush2.bf16.msra.mxu0 %v7424_v10  ;;  %6950 = vmatpush3.bf16.msra.mxu1 %v7537_v58  ;;  %v7504_v10 = vld [vmem:[%s7777_s13 + $0x184] ss:$8 sps:$4 sm:$0xff]   ;;  %v7521_v58 = vld [vmem:[%s7777_s13 + $0x1d4] ss:$8 sps:$4 sm:$0xff]  }
  0x2e   : > { %1135 = vmatprep.subr.bf16.mxu0 %v9801_v1  ;;  %6951 = vmatprep.subr.bf16.mxu1 %v7541_v61 }
  0x31   : > { %1136 = vmatpush2.bf16.msra.mxu0 %v7425_v11  ;;  %6952 = vmatpush3.bf16.msra.mxu1 %v7541_v61  ;;  %v7506_v11 = vld [vmem:[%s7777_s13 + $0x180] ss:$8 sps:$4 sm:$0xff]  }
  0x32   : > { %1137 = vmatprep.subr.bf16.mxu0 %v9801_v1 }
  0x35   : > { %1138 = vmatpush2.bf16.msra.mxu0 %v7426_v12  ;;  %v7507_v12 = vld [vmem:[%s7777_s13 + $0x194] ss:$8 sps:$4 sm:$0xff]  }
  0x36   : > { %1139 = vmatprep.subr.bf16.mxu0 %v9801_v1 }
  0x39   : > { %1140 = vmatpush2.bf16.msra.mxu0 %v7427_v13  ;;  %v7902_v13 = vld [vmem:[%s9791_s2] ss:$0 sm:$0xff] }
  0x3a   : > { %1141 = vmatprep.subr.bf16.mxu0 %v9801_v1 }
  0x3d   : > { %1142 = vmatpush2.bf16.msra.mxu0 %v7428_v14 }
  0x3e   : > { %1143 = vmatprep.subr.bf16.mxu0 %v9801_v1 }
  0x41   : > { %1144 = vmatpush2.bf16.msra.mxu0 %v7429_v15 }
  0x42   : > { %1145 = vmatprep.subr.bf16.mxu0 %v9801_v1 }
  0x45   : > { %1146 = vmatpush2.bf16.msra.mxu0 %v7430_v16 }
  0x46   : > { %1147 = vmatprep.subr.bf16.mxu0 %v9801_v1 }
  0x49   : > { %1148 = vmatpush2.bf16.msra.mxu0 %v7431_v17 }
  0x4c   : > { %1150 = vmatmul.mubr.bf16.vlgmr.msra.gmra.mxu0 %v7432_v18 }
  0x4d   : > { %1157 = vmatprep.mubr.bf16.mxu0 %v7435_v19  ;;  %v7509_v19 = vld [vmem:[%s7777_s13 + $0x190] ss:$8 sps:$4 sm:$0xff]  }
  0x54   : > { %1158 = vmatmul.mubr.bf16.gmra.mxu0 %v7437_v20 }
  0x55   : > { %1165 = vmatprep.mubr.bf16.mxu0 %v7438_v21 }
  0x5c   : > { %1166 = vmatmul.mubr.bf16.gmra.mxu0 %v7440_v22  ;;  %v7510_v22 = vld [vmem:[%s7777_s13 + $0x1a4] ss:$8 sps:$4 sm:$0xff]  }
  0x5d   : > { %1173 = vmatprep.mubr.bf16.mxu0 %v7441_v23 }
  0x64   : > { %1174 = vmatmul.mubr.bf16.gmra.mxu0 %v7443_v24 }
  0x65   : > { %1181 = vmatprep.mubr.bf16.mxu0 %v7444_v25 }
  0x6c   : > { %1182 = vmatmul.mubr.bf16.gmra.mxu0 %v7446_v26 }
  0x6d   : > { %1189 = vmatprep.mubr.bf16.mxu0 %v7447_v27 }
  0x74   : > { %1190 = vmatmul.mubr.bf16.gmra.mxu0 %v7449_v28 }
  0x75   : > { %1197 = vmatprep.mubr.bf16.mxu0 %v7450_v29 }
  0x7c   : > { %1198 = vmatmul.mubr.bf16.gmra.mxu0 %v7452_v30 }
  0x7d   : > { %1205 = vmatprep.mubr.bf16.mxu0 %v7453_v31  ;;  %v7512_v31 = vld [vmem:[%s7777_s13 + $0x1a0] ss:$8 sps:$4 sm:$0xff]  }
  0x84   : > { %1206 = vmatmul.mubr.bf16.gmra.mxu0 %v7455_v32 }
  0x85   : > { %1213 = vmatprep.mubr.bf16.mxu0 %v7456_v33 }
  0x8c   : > { %1214 = vmatmul.mubr.bf16.gmra.mxu0 %v7458_v34  ;;  %v7513_v34 = vld [vmem:[%s7777_s13 + $0x1b4] ss:$8 sps:$4 sm:$0xff]  }
  0x8d   : > { %1221 = vmatprep.mubr.bf16.mxu0 %v7459_v35 }
  0x94   : > { %1222 = vmatmul.mubr.bf16.gmra.mxu0 %v7461_v36 }
  0x95   : > { %1229 = vmatprep.mubr.bf16.mxu0 %v7462_v37 }
  0x9c   : > { %1230 = vmatmul.mubr.bf16.gmra.mxu0 %v7464_v38 }
  0x9d   : > { %1237 = vmatprep.mubr.bf16.mxu0 %v7465_v39 }
  0xa4   : > { %1238 = vmatmul.mubr.bf16.gmra.mxu0 %v7467_v40 }
  0xa5   : > { %1245 = vmatprep.mubr.bf16.mxu0 %v7468_v41 }
  0xac   : > { %1246 = vmatmul.mubr.bf16.gmra.mxu0 %v7470_v42 }
  0xad   : > { %1253 = vmatprep.mubr.bf16.mxu0 %v7471_v43  ;;  %v7515_v43 = vld [vmem:[%s7777_s13 + $0x1b0] ss:$8 sps:$4 sm:$0xff]  }
  0xb4   : > { %1254 = vmatmul.mubr.bf16.gmra.mxu0 %v7473_v44 }
  0xb5   : > { %1261 = vmatprep.mubr.bf16.mxu0 %v7474_v45 }
  0xbc   : > { %1262 = vmatmul.mubr.bf16.gmra.mxu0 %v7476_v47 }
  0xbd   : > { %1269 = vmatprep.mubr.bf16.mxu0 %v7477_v48 }
  0xc4   : > { %1270 = vmatmul.mubr.bf16.gmra.mxu0 %v7479_v51 }
  0xc5   : > { %1277 = vmatprep.mubr.bf16.mxu0 %v7480_v52 }
  0xcc   : > { %1278 = vmatmul.mubr.bf16.gmra.mxu0 %v7482_v55  ;;  %v7516_v55 = vld [vmem:[%s7777_s13 + $0x1c0] ss:$8 sps:$4 sm:$0xff]  }
  0xcd   : > { %1285 = vmatprep.mubr.bf16.mxu0 %v7483_v56 }
  0xd4   : > { %1286 = vmatmul.mubr.bf16.gmra.mxu0 %v7485_v59 }
  0xd5   : > { %1293 = vmatprep.mubr.bf16.mxu0 %v7486_v60 }
  0xdc   : > { %1294 = vmatmul.mubr.bf16.gmra.mxu0 %v7488_v62 }
  0xdd   : > { %1301 = vmatprep.mubr.bf16.mxu0 %v7489_v63 }
  0xe4   : > { %1302 = vmatmul.mubr.bf16.gmra.mxu0 %v7491_v0 }
  0xe5   : > { %1309 = vmatprep.mubr.bf16.mxu0 %v7492_v2 }
  0xec   : > { %1310 = vmatmul.mubr.bf16.gmra.mxu0 %v7494_v3 }
  0xed   : > { %1317 = vmatprep.mubr.bf16.mxu0 %v7495_v4  ;;  %v7519_v4 = vld [vmem:[%s7777_s13 + $0x1d0] ss:$8 sps:$4 sm:$0xff]  }
  0xf4   : > { %1318 = vmatmul.mubr.bf16.gmra.mxu0 %v7497_v5 }
  0xf5   : > { %1325 = vmatprep.mubr.bf16.mxu0 %v7498_v6 }
  0xfc   : > { %1326 = vmatmul.mubr.bf16.gmra.mxu0 %v7500_v7  ;;  %v7525_v7 = vld [vmem:[%s7777_s13 + $0x1e4] ss:$8 sps:$4 sm:$0xff]  }
  0xfd   : > { %1333 = vmatprep.mubr.bf16.mxu0 %v7501_v8 }
 0x104   : > { %1334 = vmatmul.mubr.bf16.gmra.mxu0 %v7503_v9 }
 0x105   : > { %1341 = vmatprep.mubr.bf16.mxu0 %v7504_v10 }
 0x10c   : > { %v1151_v14 = vpop.f32.mrf.mxu0  ;;  %1342 = vmatmul.mubr.bf16.gmra.mxu0 %v7506_v11 }
 0x10d   : > { %v1152_v15 = vadd.f32 %v7902_v13, %v1151_v14  ;;  %1349 = vmatprep.mubr.bf16.mxu0 %v7507_v12 }
 0x10e   : > { %v1153_v16 = vpop.f32.mrf.mxu0 }
 0x10f   : > { %vm1549_vm0 = vcmp.gt.f32.partialorder %v1152_v15, 0.0  ;;  %v1648_v17 = vmul.f32 0.1, %v1152_v15 }
 0x110   : > { %v1154_v18 = vpop.f32.mrf.mxu0 }
 0x111   : > { %v1747_v20 = vsel %vm1549_vm0, %v1152_v15, %v1648_v17  ;;  %v1155_v21 = vadd.f32 %v7902_v13, %v1154_v18  ;;  %v7523_v17 = vld [vmem:[%s7777_s13 + $0x1e0] ss:$8 sps:$4 sm:$0xff]  }
 0x112   : > { %1846 = vst [vmem:[#allocation2] sm:$0xff] %v1747_v20  ;;  %v1156_v23 = vpop.f32.mrf.mxu0  ;;  %v7530_v20 = vld [vmem:[%s7777_s13 + $0x1f4] ss:$8 sps:$4 sm:$0xff]  }
 0x113   : > { %vm1550_vm1 = vcmp.gt.f32.partialorder %v1155_v21, 0.0  ;;  %v1649_v24 = vmul.f32 0.1, %v1155_v21 }
 0x114   : > { %v1159_v25 = vpop.f32.mrf.mxu0  ;;  %1350 = vmatmul.mubr.bf16.gmra.mxu0 %v7509_v19 }
 0x115   : > { %v1748_v26 = vsel %vm1550_vm1, %v1155_v21, %v1649_v24  ;;  %v1160_v27 = vadd.f32 %v7902_v13, %v1159_v25  ;;  %1357 = vmatprep.mubr.bf16.mxu0 %v7510_v22  ;;  %v7581_v22 = vld [vmem:[%s9792_s3 + $0x138] sm:$0xff]  }
 0x116   : > { %1847 = vst [vmem:[#allocation2 + $0x8] sm:$0xff] %v1748_v26  ;;  %v1161_v28 = vpop.f32.mrf.mxu0  ;;  %7273 = vmatprep.subr.bf16.mxu0 %v7581_v22 }
 0x117   : > { %vm1551_vm2 = vcmp.gt.f32.partialorder %v1160_v27, 0.0  ;;  %v1650_v29 = vmul.f32 0.1, %v1160_v27  ;;  %7274 = vmatpush3.bf16.msra.mxu0 %v7581_v22  ;;  %v7582_v28 = vld [vmem:[%s9792_s3 + $0x130] sm:$0xff]  }
 0x118   : > { %v1162_v30 = vpop.f32.mrf.mxu0  ;;  %7275 = vmatprep.subr.bf16.mxu0 %v7582_v28 }
 0x119   : > { %v1749_v32 = vsel %vm1551_vm2, %v1160_v27, %v1650_v29  ;;  %v1163_v33 = vadd.f32 %v7902_v13, %v1162_v30 }
 0x11a   : > { %1848 = vst [vmem:[#allocation2 + $0x10] sm:$0xff] %v1749_v32  ;;  %v1164_v35 = vpop.f32.mrf.mxu0 }
 0x11b   : > { %vm1552_vm3 = vcmp.gt.f32.partialorder %v1163_v33, 0.0  ;;  %v1651_v36 = vmul.f32 0.1, %v1163_v33  ;;  %7276 = vmatpush3.bf16.msra.mxu0 %v7582_v28  ;;  %v7596_v28 = vld [vmem:[%s9792_s3 + $0x108] sm:$0xff]  }
 0x11c   : > { %v1167_v37 = vpop.f32.mrf.mxu0  ;;  %1358 = vmatmul.mubr.bf16.gmra.mxu0 %v7512_v31  ;;  %v7528_v31 = vld [vmem:[%s7777_s13 + $0x1f0] ss:$8 sps:$4 sm:$0xff]  }
 0x11d   : > { %v1750_v38 = vsel %vm1552_vm3, %v1163_v33, %v1651_v36  ;;  %v1168_v39 = vadd.f32 %v7902_v13, %v1167_v37  ;;  %1365 = vmatprep.mubr.bf16.mxu0 %v7513_v34  ;;  %v7535_v34 = vld [vmem:[%s7777_s13 + $0x204] ss:$8 sps:$4 sm:$0xff]  }
 0x11e   : > { %1849 = vst [vmem:[#allocation2 + $0x18] sm:$0xff] %v1750_v38  ;;  %v1169_v40 = vpop.f32.mrf.mxu0  ;;  %v7586_v36 = vld [vmem:[%s9792_s3 + $0x128] sm:$0xff]  }
 0x11f   : > { %vm1553_vm4 = vcmp.gt.f32.partialorder %v1168_v39, 0.0  ;;  %v1652_v41 = vmul.f32 0.1, %v1168_v39  ;;  %7277 = vmatprep.subr.bf16.mxu0 %v7586_v36 }
 0x120   : > { %v1170_v42 = vpop.f32.mrf.mxu0  ;;  %7278 = vmatpush3.bf16.msra.mxu0 %v7586_v36 }
 0x121   : > { %v1751_v44 = vsel %vm1553_vm4, %v1168_v39, %v1652_v41  ;;  %v1171_v45 = vadd.f32 %v7902_v13, %v1170_v42 }
 0x122   : > { %1850 = vst [vmem:[#allocation2 + $0x20] sm:$0xff] %v1751_v44  ;;  %v1172_v47 = vpop.f32.mrf.mxu0  ;;  %v7587_v44 = vld [vmem:[%s9792_s3 + $0x120] sm:$0xff]  }
 0x123   : > { %vm1554_vm5 = vcmp.gt.f32.partialorder %v1171_v45, 0.0  ;;  %v1653_v48 = vmul.f32 0.1, %v1171_v45  ;;  %7279 = vmatprep.subr.bf16.mxu0 %v7587_v44 }
 0x124   : > { %v1175_v49 = vpop.f32.mrf.mxu0  ;;  %1366 = vmatmul.mubr.bf16.gmra.mxu0 %v7515_v43 }
 0x125   : > { %v1752_v50 = vsel %vm1554_vm5, %v1171_v45, %v1653_v48  ;;  %v1176_v51 = vadd.f32 %v7902_v13, %v1175_v49  ;;  %1373 = vmatprep.mubr.bf16.mxu0 %v7518_v46  ;;  %v7533_v49 = vld [vmem:[%s7777_s13 + $0x200] ss:$8 sps:$4 sm:$0xff]   ;;  %7280 = vmatpush3.bf16.msra.mxu0 %v7587_v44 }
 0x126   : > { %1851 = vst [vmem:[#allocation2 + $0x28] sm:$0xff] %v1752_v50  ;;  %v1177_v52 = vpop.f32.mrf.mxu0  ;;  %v7597_v44 = vld [vmem:[%s9792_s3 + $0x100] sm:$0xff]  }
 0x127   : > { %vm1555_vm6 = vcmp.gt.f32.partialorder %v1176_v51, 0.0  ;;  %v1654_v53 = vmul.f32 0.1, %v1176_v51 }
 0x128   : > { %v1178_v54 = vpop.f32.mrf.mxu0 }
 0x129   : > { %v1753_v56 = vsel %vm1555_vm6, %v1176_v51, %v1654_v53  ;;  %v1179_v57 = vadd.f32 %v7902_v13, %v1178_v54 }
 0x12a   : > { %1852 = vst [vmem:[#allocation2 + $0x30] sm:$0xff] %v1753_v56  ;;  %v1180_v59 = vpop.f32.mrf.mxu0 }
 0x12b   : > { %vm1556_vm7 = vcmp.gt.f32.partialorder %v1179_v57, 0.0  ;;  %v1655_v60 = vmul.f32 0.1, %v1179_v57 }
 0x12c   : > { %v1183_v61 = vpop.f32.mrf.mxu0  ;;  %1374 = vmatmul.mubr.bf16.gmra.mxu0 %v7516_v55  ;;  %v7540_v55 = vld [vmem:[%s7777_s13 + $0x214] ss:$8 sps:$4 sm:$0xff]  }
 0x12d   : > { %v7920_v62 = vsel %vm1556_vm7, %v1179_v57, %v1655_v60  ;;  %v1184_v63 = vadd.f32 %v7902_v13, %v1183_v61  ;;  %1381 = vmatprep.mubr.bf16.mxu0 %v7521_v58  ;;  %v7591_v60 = vld [vmem:[%s9792_s3 + $0x118] sm:$0xff]  }
 0x12e   : > { %1853 = vst [vmem:[#allocation2 + $0x38] sm:$0xff] %v7920_v62  ;;  %v1185_v0 = vpop.f32.mrf.mxu0  ;;  %7281 = vmatprep.subr.bf16.mxu0 %v7591_v60 }
 0x12f   : > { %vm1557_vm8 = vcmp.gt.f32.partialorder %v1184_v63, 0.0  ;;  %v1656_v2 = vmul.f32 0.1, %v1184_v63  ;;  %7282 = vmatpush3.bf16.msra.mxu0 %v7591_v60 }
 0x130   : > { %v1186_v3 = vpop.f32.mrf.mxu0 }
 0x131   : > { %v7925_v5 = vsel %vm1557_vm8, %v1184_v63, %v1656_v2  ;;  %v1187_v6 = vadd.f32 %v7902_v13, %v1186_v3 }
 0x132   : > { %1854 = vst [vmem:[#allocation2 + $0x40] sm:$0xff] %v7925_v5  ;;  %v1188_v8 = vpop.f32.mrf.mxu0 }
 0x133   : > { %vm1558_vm9 = vcmp.gt.f32.partialorder %v1187_v6, 0.0  ;;  %v1657_v9 = vmul.f32 0.1, %v1187_v6 }
 0x134   : > { %v1191_v10 = vpop.f32.mrf.mxu0  ;;  %1382 = vmatmul.mubr.bf16.gmra.mxu0 %v7519_v4 }
 0x135   : > { %v7930_v11 = vsel %vm1558_vm9, %v1187_v6, %v1657_v9  ;;  %v1192_v12 = vadd.f32 %v7902_v13, %v1191_v10  ;;  %1389 = vmatprep.mubr.bf16.mxu0 %v7525_v7 }
 0x136   : > { %1855 = vst [vmem:[#allocation2 + $0x48] sm:$0xff] %v7930_v11  ;;  %v1193_v14 = vpop.f32.mrf.mxu0 }
 0x137   : > { %vm1559_vm10 = vcmp.gt.f32.partialorder %v1192_v12, 0.0  ;;  %v1658_v15 = vmul.f32 0.1, %v1192_v12 }
 0x138   : > { %v1194_v16 = vpop.f32.mrf.mxu0 }
 0x139   : > { %v7935_v18 = vsel %vm1559_vm10, %v1192_v12, %v1658_v15  ;;  %v1195_v19 = vadd.f32 %v7902_v13, %v1194_v16  ;;  %v2047_v46 = vld [vmem:[#allocation2 + $0x39] sm:$0xff]  ;;  %v7592_v12 = vld [vmem:[%s9792_s3 + $0x110] sm:$0xff]  }
 0x13a   : > { %1856 = vst [vmem:[#allocation2 + $0x50] sm:$0xff] %v7935_v18  ;;  %v1196_v21 = vpop.f32.mrf.mxu0  ;;  %v2142_v57 = vmax.f32 %v7920_v62, %v2047_v46  ;;  %7283 = vmatprep.subr.bf16.mxu0 %v7592_v12 }
 0x13b   : > { %vm1560_vm11 = vcmp.gt.f32.partialorder %v1195_v19, 0.0  ;;  %v1659_v23 = vmul.f32 0.1, %v1195_v19  ;;  %7284 = vmatpush3.bf16.msra.mxu0 %v7592_v12 }
 0x13c   : > { %v1199_v24 = vpop.f32.mrf.mxu0  ;;  %1390 = vmatmul.mubr.bf16.gmra.mxu0 %v7523_v17  ;;  %v7538_v17 = vld [vmem:[%s7777_s13 + $0x210] ss:$8 sps:$4 sm:$0xff]   ;;  %7285 = vmatprep.subr.bf16.mxu0 %v7596_v28 }
 0x13d   : > { %v7943_v25 = vsel %vm1560_vm11, %v1195_v19, %v1659_v23  ;;  %v1200_v26 = vadd.f32 %v7902_v13, %v1199_v24  ;;  %1397 = vmatprep.mubr.bf16.mxu0 %v7530_v20  ;;  %v2048_v47 = vld [vmem:[#allocation2 + $0x41] sm:$0xff] }
 0x13e   : > { %1857 = vst [vmem:[#allocation2 + $0x58] sm:$0xff] %v7943_v25  ;;  %v1201_v27 = vpop.f32.mrf.mxu0  ;;  %v2143_v58 = vmax.f32 %v7925_v5, %v2048_v47  ;;  %v7544_v23 = vld [vmem:[%s7777_s13 + $0x224] ss:$8 sps:$4 sm:$0xff]  }
 0x13f   : > { %vm1561_vm12 = vcmp.gt.f32.partialorder %v1200_v26, 0.0  ;;  %v1660_v29 = vmul.f32 0.1, %v1200_v26  ;;  %7286 = vmatpush3.bf16.msra.mxu0 %v7596_v28 }
 0x140   : > { %v1202_v30 = vpop.f32.mrf.mxu0  ;;  %7287 = vmatprep.subr.bf16.mxu0 %v7597_v44 }
 0x141   : > { %v7951_v32 = vsel %vm1561_vm12, %v1200_v26, %v1660_v29  ;;  %v1203_v33 = vadd.f32 %v7902_v13, %v1202_v30  ;;  %v2049_v63 = vld [vmem:[#allocation2 + $0x49] sm:$0xff] }
 0x142   : > { %1858 = vst [vmem:[#allocation2 + $0x60] sm:$0xff] %v7951_v32  ;;  %v1204_v35 = vpop.f32.mrf.mxu0  ;;  %v2144_v9 = vmax.f32 %v7930_v11, %v2049_v63 }
 0x143   : > { %vm1562_vm13 = vcmp.gt.f32.partialorder %v1203_v33, 0.0  ;;  %v1661_v37 = vmul.f32 0.1, %v1203_v33  ;;  %7288 = vmatpush3.bf16.msra.mxu0 %v7597_v44 }
 0x144   : > { %v1207_v38 = vpop.f32.mrf.mxu0  ;;  %1398 = vmatmul.mubr.bf16.gmra.mxu0 %v7528_v31  ;;  %6087 = vmatprep.subr.bf16.mxu0 %v9801_v1 }
 0x145   : > { %v7959_v39 = vsel %vm1562_vm13, %v1203_v33, %v1661_v37  ;;  %v1208_v40 = vadd.f32 %v7902_v13, %v1207_v38  ;;  %1405 = vmatprep.mubr.bf16.mxu0 %v7535_v34  ;;  %v2237_v41 = vld [vmem:[#allocation2 + $0x54] sm:$0xff] }
 0x146   : > { %v2332_v42 = vld [vmem:[#allocation2 + $0x55] sm:$0xff]  ;;  %1859 = vst [vmem:[#allocation2 + $0x68] sm:$0xff] %v7959_v39  ;;  %v1209_v43 = vpop.f32.mrf.mxu0 }
 0x147   : > { %vm1563_vm14 = vcmp.gt.f32.partialorder %v1208_v40, 0.0  ;;  %v1662_v45 = vmul.f32 0.1, %v1208_v40  ;;  %v2427_v50 = vmax.f32 %v2237_v41, %v2332_v42  ;;  %v2050_v15 = vld [vmem:[#allocation2 + $0x51] sm:$0xff] }
 0x148   : > { %v1210_v48 = vpop.f32.mrf.mxu0  ;;  %v2145_v26 = vmax.f32 %v7935_v18, %v2050_v15  ;;  %v7595_v43 = vld [vmem:[%s9792_s3 + $0x38] sm:$0xff]  }
 0x149   : > { %v7967_v51 = vsel %vm1563_vm14, %v1208_v40, %v1662_v45  ;;  %v1211_v52 = vadd.f32 %v7902_v13, %v1210_v48  ;;  %v2238_v53 = vld [vmem:[#allocation2 + $0x5c] sm:$0xff]  ;;  %v7977_v2 = vmax.f32 %v2142_v57, %v2427_v50  ;;  %7021 = vmatprep.subr.bf16.mxu1 %v7595_v43  ;;  %v7545_v15 = vld [vmem:[%s7777_s13 + $0x230] ss:$8 sps:$4 sm:$0xff]  }
 0x14a   : > { %v2333_v54 = vld [vmem:[#allocation2 + $0x5d] sm:$0xff]  ;;  %1860 = vst [vmem:[#allocation2 + $0x70] sm:$0xff] %v7967_v51  ;;  %v1212_v56 = vpop.f32.mrf.mxu0 }
 0x14b   : > { %v2428_v59 = vmax.f32 %v2238_v53, %v2333_v54  ;;  %vm1564_vm15 = vcmp.gt.f32.partialorder %v1211_v52, 0.0  ;;  %v1663_v61 = vmul.f32 0.1, %v1211_v52  ;;  %v2051_v31 = vld [vmem:[#allocation2 + $0x59] sm:$0xff] }
 0x14c   : > { %v1215_v0 = vpop.f32.mrf.mxu0  ;;  %1406 = vmatmul.mubr.bf16.gmra.mxu0 %v7533_v49  ;;  %v2146_v41 = vmax.f32 %v7943_v25, %v2051_v31  ;;  %v7542_v48 = vld [vmem:[%s7777_s13 + $0x220] ss:$8 sps:$4 sm:$0xff]   ;;  %v7547_v54 = vld [vmem:[%s7777_s13 + $0x234] ss:$8 sps:$4 sm:$0xff]  }
 0x14d   : > { %v7979_v3 = vmax.f32 %v2143_v58, %v2428_v59  ;;  %v7981_v4 = vsel %vm1564_vm15, %v1211_v52, %v1663_v61  ;;  %v1216_v62 = vadd.f32 %v7902_v13, %v1215_v0  ;;  %1413 = vmatprep.mubr.bf16.mxu0 %v7540_v55  ;;  %v2239_v5 = vld [vmem:[#allocation2 + $0x64] sm:$0xff] }
 0x14e   : > { %v2334_v6 = vld [vmem:[#allocation2 + $0x65] sm:$0xff]  ;;  %1861 = vst [vmem:[#allocation2 + $0x78] sm:$0xff] %v7981_v4  ;;  %v1217_v7 = vpop.f32.mrf.mxu0 }
 0x14f   : > { %v2829_v8 = vpack.c.bf16 %v7979_v3, %v7977_v2  ;;  %v2429_v10 = vmax.f32 %v2239_v5, %v2334_v6  ;;  %vm1565_vm0 = vcmp.gt.f32.partialorder %v1216_v62, 0.0  ;;  %v1664_v14 = vmul.f32 0.1, %v1216_v62  ;;  %v2052_v46 = vld [vmem:[#allocation2 + $0x61] sm:$0xff] }
 0x150   : > { %v1218_v16 = vpop.f32.mrf.mxu0  ;;  %v2147_v56 = vmax.f32 %v7951_v32, %v2052_v46  ;;  %v7548_v46 = vld [vmem:[%s7777_s13 + $0x240] ss:$8 sps:$4 sm:$0xff]  }
 0x151   : > { %6953 = vmatprep.mubr.bf16.mxu1 %v2829_v8  ;;  %v7992_v19 = vmax.f32 %v2144_v9, %v2429_v10  ;;  %v7994_v20 = vsel %vm1565_vm0, %v1216_v62, %v1664_v14  ;;  %v1219_v21 = vadd.f32 %v7902_v13, %v1218_v16  ;;  %v2240_v22 = vld [vmem:[#allocation2 + $0x6c] sm:$0xff] }
 0x152   : > { %v2335_v11 = vld [vmem:[#allocation2 + $0x6d] sm:$0xff]  ;;  %1862 = vst [vmem:[#allocation2 + $0x80] sm:$0xff] %v7994_v20  ;;  %v1220_v24 = vpop.f32.mrf.mxu0 }
 0x153   : > { %v2430_v27 = vmax.f32 %v2240_v22, %v2335_v11  ;;  %vm1566_vm1 = vcmp.gt.f32.partialorder %v1219_v21, 0.0  ;;  %v1665_v30 = vmul.f32 0.1, %v1219_v21  ;;  %v2053_v60 = vld [vmem:[#allocation2 + $0x69] sm:$0xff] }
 0x154   : > { %v1223_v33 = vpop.f32.mrf.mxu0  ;;  %1414 = vmatmul.mubr.bf16.gmra.mxu0 %v7538_v17  ;;  %v2148_v8 = vmax.f32 %v7959_v39, %v2053_v60 }
 0x155   : > { %v8005_v34 = vmax.f32 %v2145_v26, %v2430_v27  ;;  %v8007_v35 = vsel %vm1566_vm1, %v1219_v21, %v1665_v30  ;;  %v1224_v18 = vadd.f32 %v7902_v13, %v1223_v33  ;;  %1421 = vmatprep.mubr.bf16.mxu0 %v7544_v23  ;;  %v2241_v36 = vld [vmem:[#allocation2 + $0x74] sm:$0xff]  ;;  %v7550_v23 = vld [vmem:[%s7777_s13 + $0x244] ss:$8 sps:$4 sm:$0xff]  }
 0x156   : > { %v2336_v37 = vld [vmem:[#allocation2 + $0x75] sm:$0xff]  ;;  %1863 = vst [vmem:[#allocation2 + $0x88] sm:$0xff] %v8007_v35  ;;  %v1225_v38 = vpop.f32.mrf.mxu0 }
 0x157   : > { %v2830_v40 = vpack.c.bf16 %v8005_v34, %v7992_v19  ;;  %v2431_v42 = vmax.f32 %v2241_v36, %v2336_v37  ;;  %vm1567_vm2 = vcmp.gt.f32.partialorder %v1224_v18, 0.0  ;;  %v1666_v45 = vmul.f32 0.1, %v1224_v18  ;;  %v2054_v12 = vld [vmem:[#allocation2 + $0x71] sm:$0xff] }
 0x158   : > { %v1226_v47 = vpop.f32.mrf.mxu0  ;;  %v2149_v39 = vmax.f32 %v7967_v51, %v2054_v12 }
 0x159   : > { %6954 = vmatmul.mubr.bf16.vlgmr.msra.gmra.mxu1 %v2830_v40  ;;  %v8021_v49 = vmax.f32 %v2146_v41, %v2431_v42  ;;  %v8023_v25 = vsel %vm1567_vm2, %v1224_v18, %v1666_v45  ;;  %v1227_v50 = vadd.f32 %v7902_v13, %v1226_v47  ;;  %v2242_v52 = vld [vmem:[#allocation2 + $0x7c] sm:$0xff] }
 0x15a   : > { %v2337_v53 = vld [vmem:[#allocation2 + $0x7d] sm:$0xff]  ;;  %7022 = vmatpush3.bf16.msra.mxu1 %v7595_v43  ;;  %1864 = vst [vmem:[#allocation2 + $0x90] sm:$0xff] %v8023_v25  ;;  %v1228_v55 = vpop.f32.mrf.mxu0 }
 0x15b   : > { %v2432_v57 = vmax.f32 %v2242_v52, %v2337_v53  ;;  %vm1568_vm3 = vcmp.gt.f32.partialorder %v1227_v50, 0.0  ;;  %v1667_v59 = vmul.f32 0.1, %v1227_v50  ;;  %v2055_v30 = vld [vmem:[#allocation2 + $0x79] sm:$0xff] }
 0x15c   : > { %v1231_v61 = vpop.f32.mrf.mxu0  ;;  %1422 = vmatmul.mubr.bf16.gmra.mxu0 %v7542_v48  ;;  %v2150_v41 = vmax.f32 %v7981_v4, %v2055_v30 }
 0x15d   : > { %v8032_v63 = vmax.f32 %v2147_v56, %v2432_v57  ;;  %v8034_v0 = vsel %vm1568_vm3, %v1227_v50, %v1667_v59  ;;  %v1232_v62 = vadd.f32 %v7902_v13, %v1231_v61  ;;  %1429 = vmatprep.mubr.bf16.mxu0 %v7547_v54  ;;  %v2243_v32 = vld [vmem:[#allocation2 + $0x84] sm:$0xff]  ;;  %v7553_v54 = vld [vmem:[%s7777_s13 + $0x254] ss:$8 sps:$4 sm:$0xff]  }
 0x15e   : > { %v2338_v5 = vld [vmem:[#allocation2 + $0x85] sm:$0xff]  ;;  %1865 = vst [vmem:[#allocation2 + $0x98] sm:$0xff] %v8034_v0  ;;  %v1233_v6 = vpop.f32.mrf.mxu0  ;;  %v7598_v57 = vld [vmem:[%s9792_s3 + $0x30] sm:$0xff]  }
 0x15f   : > { %v2831_v7 = vpack.c.bf16 %v8032_v63, %v8021_v49  ;;  %v2433_v9 = vmax.f32 %v2243_v32, %v2338_v5  ;;  %vm1569_vm4 = vcmp.gt.f32.partialorder %v1232_v62, 0.0  ;;  %v1668_v10 = vmul.f32 0.1, %v1232_v62  ;;  %v2056_v44 = vld [vmem:[#allocation2 + $0x81] sm:$0xff]  ;;  %7023 = vmatprep.subr.bf16.mxu1 %v7598_v57 }
 0x160   : > { %v1234_v14 = vpop.f32.mrf.mxu0  ;;  %v2151_v4 = vmax.f32 %v7994_v20, %v2056_v44  ;;  %7024 = vmatpush3.bf16.msra.mxu1 %v7598_v57 }
 0x161   : > { %6957 = vmatprep.mubr.bf16.mxu1 %v2831_v7  ;;  %v8042_v16 = vmax.f32 %v2148_v8, %v2433_v9  ;;  %v8044_v17 = vsel %vm1569_vm4, %v1232_v62, %v1668_v10  ;;  %v1235_v21 = vadd.f32 %v7902_v13, %v1234_v14  ;;  %v2244_v22 = vld [vmem:[#allocation2 + $0x8c] sm:$0xff] }
 0x162   : > { %v2339_v11 = vld [vmem:[#allocation2 + $0x8d] sm:$0xff]  ;;  %1866 = vst [vmem:[#allocation2 + $0xa0] sm:$0xff] %v8044_v17  ;;  %v1236_v24 = vpop.f32.mrf.mxu0 }
 0x163   : > { %v2434_v26 = vmax.f32 %v2244_v22, %v2339_v11  ;;  %vm1570_vm5 = vcmp.gt.f32.partialorder %v1235_v21, 0.0  ;;  %v1669_v28 = vmul.f32 0.1, %v1235_v21  ;;  %v2057_v61 = vld [vmem:[#allocation2 + $0x89] sm:$0xff] }
 0x164   : > { %v1239_v31 = vpop.f32.mrf.mxu0  ;;  %1430 = vmatmul.mubr.bf16.gmra.mxu0 %v7545_v15  ;;  %v2152_v10 = vmax.f32 %v8007_v35, %v2057_v61  ;;  %v7551_v22 = vld [vmem:[%s7777_s13 + $0x250] ss:$8 sps:$4 sm:$0xff]  }
 0x165   : > { %v2529_v33 = vmax.f32 %v2149_v39, %v2434_v26  ;;  %v8052_v18 = vsel %vm1570_vm5, %v1235_v21, %v1669_v28  ;;  %v1240_v36 = vadd.f32 %v7902_v13, %v1239_v31  ;;  %1437 = vmatprep.mubr.bf16.mxu0 %v7550_v23  ;;  %v2245_v37 = vld [vmem:[#allocation2 + $0x94] sm:$0xff]  ;;  %v7556_v28 = vld [vmem:[%s7777_s13 + $0x264] ss:$8 sps:$4 sm:$0xff]  }
 0x166   : > { %v2340_v38 = vld [vmem:[#allocation2 + $0x95] sm:$0xff]  ;;  %1867 = vst [vmem:[#allocation2 + $0xa8] sm:$0xff] %v8052_v18  ;;  %v1241_v51 = vpop.f32.mrf.mxu0 }
 0x167   : > { %v2832_v40 = vpack.c.bf16 %v2529_v33, %v8042_v16  ;;  %v2435_v42 = vmax.f32 %v2245_v37, %v2340_v38  ;;  %vm1571_vm6 = vcmp.gt.f32.partialorder %v1240_v36, 0.0  ;;  %v1670_v43 = vmul.f32 0.1, %v1240_v36  ;;  %v2058_v15 = vld [vmem:[#allocation2 + $0x91] sm:$0xff] }
 0x168   : > { %v1242_v45 = vpop.f32.mrf.mxu0  ;;  %v2153_v35 = vmax.f32 %v8023_v25, %v2058_v15 }
 0x169   : > { %6958 = vmatmul.mubr.bf16.gmra.mxu1 %v2832_v40  ;;  %v2530_v47 = vmax.f32 %v2150_v41, %v2435_v42  ;;  %v8059_v48 = vsel %vm1571_vm6, %v1240_v36, %v1670_v43  ;;  %v1243_v50 = vadd.f32 %v7902_v13, %v1242_v45  ;;  %v2246_v52 = vld [vmem:[#allocation2 + $0x9c] sm:$0xff] }
 0x16a   : > { %v2341_v53 = vld [vmem:[#allocation2 + $0x9d] sm:$0xff]  ;;  %1868 = vst [vmem:[#allocation2 + $0xb0] sm:$0xff] %v8059_v48  ;;  %v1244_v55 = vpop.f32.mrf.mxu0 }
 0x16b   : > { %v2436_v56 = vmax.f32 %v2246_v52, %v2341_v53  ;;  %v8068_v59 = vpack.c.bf16 %v2530_v47, %v2529_v33  ;;  %vm1572_vm7 = vcmp.gt.f32.partialorder %v1243_v50, 0.0  ;;  %v1671_v60 = vmul.f32 0.1, %v1243_v50  ;;  %v2059_v37 = vld [vmem:[#allocation2 + $0x99] sm:$0xff] }
 0x16c   : > { %v1247_v62 = vpop.f32.mrf.mxu0  ;;  %1438 = vmatmul.mubr.bf16.gmra.mxu0 %v7548_v46  ;;  %v2154_v45 = vmax.f32 %v8034_v0, %v2059_v37  ;;  %v7554_v53 = vld [vmem:[%s7777_s13 + $0x260] ss:$8 sps:$4 sm:$0xff]  }
 0x16d   : > { %v2531_v32 = vmax.f32 %v2151_v4, %v2436_v56  ;;  %v8070_v5 = vsel %vm1572_vm7, %v1243_v50, %v1671_v60  ;;  %v1248_v6 = vadd.f32 %v7902_v13, %v1247_v62  ;;  %1445 = vmatprep.mubr.bf16.mxu0 %v7553_v54  ;;  %v2247_v20 = vld [vmem:[#allocation2 + $0xa4] sm:$0xff]  ;;  %v7559_v60 = vld [vmem:[%s7777_s13 + $0x274] ss:$8 sps:$4 sm:$0xff]  }
 0x16e   : > { %v2342_v7 = vld [vmem:[#allocation2 + $0xa5] sm:$0xff]  ;;  %1869 = vst [vmem:[#allocation2 + $0xb8] sm:$0xff] %v8070_v5  ;;  %v1249_v8 = vpop.f32.mrf.mxu0 }
 0x16f   : > { %v2833_v9 = vpack.c.bf16 %v2531_v32, %v2530_v47  ;;  %v2437_v12 = vmax.f32 %v2247_v20, %v2342_v7  ;;  %vm1573_vm8 = vcmp.gt.f32.partialorder %v1248_v6, 0.0  ;;  %v1672_v14 = vmul.f32 0.1, %v1248_v6  ;;  %v2060_v50 = vld [vmem:[#allocation2 + $0xa1] sm:$0xff] }
 0x170   : > { %v1250_v21 = vpop.f32.mrf.mxu0  ;;  %v2155_v0 = vmax.f32 %v8044_v17, %v2060_v50 }
 0x171   : > { %6961 = vmatprep.mubr.bf16.mxu1 %v2833_v9  ;;  %v2532_v11 = vmax.f32 %v2152_v10, %v2437_v12  ;;  %v8076_v23 = vsel %vm1573_vm8, %v1248_v6, %v1672_v14  ;;  %v1251_v24 = vadd.f32 %v7902_v13, %v1250_v21  ;;  %v2248_v39 = vld [vmem:[#allocation2 + $0xac] sm:$0xff] }
 0x172   : > { %v2343_v26 = vld [vmem:[#allocation2 + $0xad] sm:$0xff]  ;;  %1870 = vst [vmem:[#allocation2 + $0xc0] sm:$0xff] %v8076_v23  ;;  %v1252_v30 = vpop.f32.mrf.mxu0 }
 0x173   : > { %v2438_v31 = vmax.f32 %v2248_v39, %v2343_v26  ;;  %v8082_v33 = vpack.c.bf16 %v2532_v11, %v2531_v32  ;;  %vm1574_vm9 = vcmp.gt.f32.partialorder %v1251_v24, 0.0  ;;  %v1673_v36 = vmul.f32 0.1, %v1251_v24  ;;  %v7599_v32 = vld [vmem:[%s9792_s3 + $0x28] sm:$0xff]  }
 0x174   : > { %v1255_v38 = vpop.f32.mrf.mxu0  ;;  %1446 = vmatmul.mubr.bf16.gmra.mxu0 %v7551_v22  ;;  %v2061_v7 = vld [vmem:[#allocation2 + $0xa9] sm:$0xff]  ;;  %7025 = vmatprep.subr.bf16.mxu1 %v7599_v32 }
 0x175   : > { %v2533_v51 = vmax.f32 %v2153_v35, %v2438_v31  ;;  %v8084_v40 = vsel %vm1574_vm9, %v1251_v24, %v1673_v36  ;;  %v1256_v41 = vadd.f32 %v7902_v13, %v1255_v38  ;;  %1453 = vmatprep.mubr.bf16.mxu0 %v7556_v28  ;;  %v2249_v42 = vld [vmem:[#allocation2 + $0xb4] sm:$0xff]  ;;  %7026 = vmatpush3.bf16.msra.mxu1 %v7599_v32  ;;  %v7562_v38 = vld [vmem:[%s7777_s13 + $0x284] ss:$8 sps:$4 sm:$0xff]  }
 0x176   : > { %v2344_v43 = vld [vmem:[#allocation2 + $0xb5] sm:$0xff]  ;;  %1871 = vst [vmem:[#allocation2 + $0xc8] sm:$0xff] %v8084_v40  ;;  %v1257_v25 = vpop.f32.mrf.mxu0  ;;  %v2156_v22 = vmax.f32 %v8052_v18, %v2061_v7 }
 0x177   : > { %v2834_v44 = vpack.c.bf16 %v2533_v51, %v2532_v11  ;;  %v2439_v46 = vmax.f32 %v2249_v42, %v2344_v43  ;;  %vm1575_vm10 = vcmp.gt.f32.partialorder %v1256_v41, 0.0  ;;  %v1674_v47 = vmul.f32 0.1, %v1256_v41  ;;  %v2062_v39 = vld [vmem:[#allocation2 + $0xb1] sm:$0xff] }
 0x178   : > { %v1258_v52 = vpop.f32.mrf.mxu0  ;;  %v7557_v28 = vld [vmem:[%s7777_s13 + $0x270] ss:$8 sps:$4 sm:$0xff]   ;;  %v2157_v18 = vmax.f32 %v8059_v48, %v2062_v39 }
 0x179   : > { %6962 = vmatmul.mubr.bf16.gmra.mxu1 %v2834_v44  ;;  %v2534_v54 = vmax.f32 %v2154_v45, %v2439_v46  ;;  %v8090_v55 = vsel %vm1575_vm10, %v1256_v41, %v1674_v47  ;;  %v1259_v4 = vadd.f32 %v7902_v13, %v1258_v52  ;;  %v2250_v56 = vld [vmem:[#allocation2 + $0xbc] sm:$0xff] }
 0x17a   : > { %v2345_v57 = vld [vmem:[#allocation2 + $0xbd] sm:$0xff]  ;;  %1872 = vst [vmem:[#allocation2 + $0xd0] sm:$0xff] %v8090_v55  ;;  %v1260_v61 = vpop.f32.mrf.mxu0 }
 0x17b   : > { %v2440_v62 = vmax.f32 %v2250_v56, %v2345_v57  ;;  %v8099_v6 = vpack.c.bf16 %v2534_v54, %v2533_v51  ;;  %vm1576_vm11 = vcmp.gt.f32.partialorder %v1259_v4, 0.0  ;;  %v1675_v20 = vmul.f32 0.1, %v1259_v4  ;;  %v2063_v25 = vld [vmem:[#allocation2 + $0xb9] sm:$0xff] }
 0x17c   : > { %v1263_v8 = vpop.f32.mrf.mxu0  ;;  %1454 = vmatmul.mubr.bf16.gmra.mxu0 %v7554_v53  ;;  %v7560_v61 = vld [vmem:[%s7777_s13 + $0x280] ss:$8 sps:$4 sm:$0xff]  }
 0x17d   : > { %v2535_v9 = vmax.f32 %v2155_v0, %v2440_v62  ;;  %v8101_v10 = vsel %vm1576_vm11, %v1259_v4, %v1675_v20  ;;  %v1264_v12 = vadd.f32 %v7902_v13, %v1263_v8  ;;  %1461 = vmatprep.mubr.bf16.mxu0 %v7559_v60  ;;  %v2251_v17 = vld [vmem:[#allocation2 + $0xc4] sm:$0xff]  ;;  %v7565_v8 = vld [vmem:[%s7777_s13 + $0x294] ss:$8 sps:$4 sm:$0xff]  }
 0x17e   : > { %v2346_v14 = vld [vmem:[#allocation2 + $0xc5] sm:$0xff]  ;;  %1873 = vst [vmem:[#allocation2 + $0xd8] sm:$0xff] %v8101_v10  ;;  %v1265_v15 = vpop.f32.mrf.mxu0 }
 0x17f   : > { %v2835_v21 = vpack.c.bf16 %v2535_v9, %v2534_v54  ;;  %v2441_v11 = vmax.f32 %v2251_v17, %v2346_v14  ;;  %vm1577_vm12 = vcmp.gt.f32.partialorder %v1264_v12, 0.0  ;;  %v1676_v24 = vmul.f32 0.1, %v1264_v12  ;;  %v2064_v57 = vld [vmem:[#allocation2 + $0xc1] sm:$0xff] }
 0x180   : > { %v1266_v26 = vpop.f32.mrf.mxu0  ;;  %v2158_v54 = vmax.f32 %v8070_v5, %v2063_v25  ;;  %v2159_v5 = vmax.f32 %v8076_v23, %v2064_v57  ;;  %v7600_v17 = vld [vmem:[%s9792_s3 + $0x20] sm:$0xff]  }
 0x181   : > { %6965 = vmatprep.mubr.bf16.mxu1 %v2835_v21  ;;  %v2536_v30 = vmax.f32 %v2156_v22, %v2441_v11  ;;  %v8107_v35 = vsel %vm1577_vm12, %v1264_v12, %v1676_v24  ;;  %v1267_v31 = vadd.f32 %v7902_v13, %v1266_v26  ;;  %v2252_v36 = vld [vmem:[#allocation2 + $0xcc] sm:$0xff]  ;;  %7027 = vmatprep.subr.bf16.mxu1 %v7600_v17 }
 0x182   : > { %v2347_v37 = vld [vmem:[#allocation2 + $0xcd] sm:$0xff]  ;;  %1874 = vst [vmem:[#allocation2 + $0xe0] sm:$0xff] %v8107_v35  ;;  %v1268_v51 = vpop.f32.mrf.mxu0  ;;  %7028 = vmatpush3.bf16.msra.mxu1 %v7600_v17  ;;  %v7566_v17 = vld [vmem:[%s7777_s13 + $0x2a0] ss:$8 sps:$4 sm:$0xff]  }
 0x183   : > { %v2442_v41 = vmax.f32 %v2252_v36, %v2347_v37  ;;  %v8113_v42 = vpack.c.bf16 %v2536_v30, %v2535_v9  ;;  %vm1578_vm13 = vcmp.gt.f32.partialorder %v1267_v31, 0.0  ;;  %v1677_v43 = vmul.f32 0.1, %v1267_v31  ;;  %v2065_v21 = vld [vmem:[#allocation2 + $0xc9] sm:$0xff] }
 0x184   : > { %v1271_v44 = vpop.f32.mrf.mxu0  ;;  %1462 = vmatmul.mubr.bf16.gmra.mxu0 %v7557_v28 }
 0x185   : > { %v2537_v45 = vmax.f32 %v2157_v18, %v2442_v41  ;;  %v8115_v46 = vsel %vm1578_vm13, %v1267_v31, %v1677_v43  ;;  %v1272_v47 = vadd.f32 %v7902_v13, %v1271_v44  ;;  %1469 = vmatprep.mubr.bf16.mxu0 %v7562_v38  ;;  %v2253_v50 = vld [vmem:[#allocation2 + $0xd4] sm:$0xff]  ;;  %v2160_v31 = vmax.f32 %v8084_v40, %v2065_v21 }
 0x186   : > { %v2348_v52 = vld [vmem:[#allocation2 + $0xd5] sm:$0xff]  ;;  %1875 = vst [vmem:[#allocation2 + $0xe8] sm:$0xff] %v8115_v46  ;;  %v1273_v48 = vpop.f32.mrf.mxu0 }
 0x187   : > { %v8119_v53 = vpack.c.bf16 %v2537_v45, %v2536_v30  ;;  %v2443_v4 = vmax.f32 %v2253_v50, %v2348_v52  ;;  %vm1579_vm14 = vcmp.gt.f32.partialorder %v1272_v47, 0.0  ;;  %v1678_v56 = vmul.f32 0.1, %v1272_v47  ;;  %v2066_v38 = vld [vmem:[#allocation2 + $0xd1] sm:$0xff] }
 0x188   : > { %v1274_v60 = vpop.f32.mrf.mxu0  ;;  %v7563_v18 = vld [vmem:[%s7777_s13 + $0x290] ss:$8 sps:$4 sm:$0xff]   ;;  %v2161_v40 = vmax.f32 %v8090_v55, %v2066_v38 }
 0x189   : > { %9852 = vst [vmem:[#allocation6_spill] sm:$0xff] %v8119_v53  ;;  %6966 = vmatmul.mubr.bf16.gmra.mxu1 %v8119_v53  ;;  %v2538_v0 = vmax.f32 %v2158_v54, %v2443_v4  ;;  %v8124_v62 = vsel %vm1579_vm14, %v1272_v47, %v1678_v56  ;;  %v1275_v32 = vadd.f32 %v7902_v13, %v1274_v60  ;;  %v2254_v20 = vld [vmem:[#allocation2 + $0xdc] sm:$0xff]  ;;  %v7568_v47 = vld [vmem:[%s7777_s13 + $0x2a4] ss:$8 sps:$4 sm:$0xff]  }
 0x18a   : > { %v2349_v7 = vld [vmem:[#allocation2 + $0xdd] sm:$0xff]  ;;  %1876 = vst [vmem:[#allocation2 + $0xf0] sm:$0xff] %v8124_v62  ;;  %v1276_v9 = vpop.f32.mrf.mxu0 }
 0x18b   : > { %v2444_v12 = vmax.f32 %v2254_v20, %v2349_v7  ;;  %v8133_v14 = vpack.c.bf16 %v2538_v0, %v2537_v45  ;;  %vm1580_vm15 = vcmp.gt.f32.partialorder %v1275_v32, 0.0  ;;  %v1679_v15 = vmul.f32 0.1, %v1275_v32  ;;  %v2067_v4 = vld [vmem:[#allocation2 + $0xd9] sm:$0xff] }
 0x18c   : > { %v1279_v22 = vpop.f32.mrf.mxu0  ;;  %1470 = vmatmul.mubr.bf16.gmra.mxu0 %v7560_v61  ;;  %v2162_v7 = vmax.f32 %v8101_v10, %v2067_v4 }
 0x18d   : > { %v2539_v11 = vmax.f32 %v2159_v5, %v2444_v12  ;;  %v8135_v24 = vsel %vm1580_vm15, %v1275_v32, %v1679_v15  ;;  %v1280_v39 = vadd.f32 %v7902_v13, %v1279_v22  ;;  %1477 = vmatprep.mubr.bf16.mxu0 %v7565_v8  ;;  %v2255_v23 = vld [vmem:[#allocation2 + $0xe4] sm:$0xff] }
 0x18e   : > { %v2350_v26 = vld [vmem:[#allocation2 + $0xe5] sm:$0xff]  ;;  %1877 = vst [vmem:[#allocation2 + $0xf8] sm:$0xff] %v8135_v24  ;;  %v1281_v28 = vpop.f32.mrf.mxu0 }
 0x18f   : > { %v8139_v30 = vpack.c.bf16 %v2539_v11, %v2538_v0  ;;  %v2445_v36 = vmax.f32 %v2255_v23, %v2350_v26  ;;  %vm1581_vm0 = vcmp.gt.f32.partialorder %v1280_v39, 0.0  ;;  %v1680_v37 = vmul.f32 0.1, %v1280_v39  ;;  %v2068_v5 = vld [vmem:[#allocation2 + $0xe1] sm:$0xff]  ;;  %v7571_v23 = vld [vmem:[%s7777_s13 + $0x2b4] ss:$8 sps:$4 sm:$0xff]  }
 0x190   : > { %v1282_v51 = vpop.f32.mrf.mxu0  ;;  %v2163_v10 = vmax.f32 %v8107_v35, %v2068_v5  ;;  %v8179_v35 = vld [vmem:[%s9791_s2] ss:$0 sm:$0xff] }
 0x191   : > { %9853 = vst [vmem:[#allocation7_spill] sm:$0xff] %v8139_v30  ;;  %6969 = vmatprep.mubr.bf16.mxu1 %v8139_v30  ;;  %v2540_v41 = vmax.f32 %v2160_v31, %v2445_v36  ;;  %v8144_v43 = vsel %vm1581_vm0, %v1280_v39, %v1680_v37  ;;  %v1283_v25 = vadd.f32 %v7902_v13, %v1282_v51  ;;  %v2256_v44 = vld [vmem:[#allocation2 + $0xec] sm:$0xff]  ;;  %v7601_v31 = vld [vmem:[%s9792_s3 + $0x18] sm:$0xff]  }
 0x192   : > { %v2351_v45 = vld [vmem:[#allocation2 + $0xed] sm:$0xff]  ;;  %1878 = vst [vmem:[#allocation2 + $0x100] sm:$0xff] %v8144_v43  ;;  %v1284_v50 = vpop.f32.mrf.mxu0  ;;  %7029 = vmatprep.subr.bf16.mxu1 %v7601_v31 }
 0x193   : > { %v2446_v52 = vmax.f32 %v2256_v44, %v2351_v45  ;;  %v8150_v48 = vpack.c.bf16 %v2540_v41, %v2539_v11  ;;  %vm1582_vm1 = vcmp.gt.f32.partialorder %v1283_v25, 0.0  ;;  %v1681_v54 = vmul.f32 0.1, %v1283_v25  ;;  %7030 = vmatpush3.bf16.msra.mxu1 %v7601_v31  ;;  %v2069_v50 = vld [vmem:[#allocation2 + $0xe9] sm:$0xff] }
 0x194   : > { %v1287_v56 = vpop.f32.mrf.mxu0  ;;  %1478 = vmatmul.mubr.bf16.gmra.mxu0 %v7563_v18 }
 0x195   : > { %v2541_v57 = vmax.f32 %v2161_v40, %v2446_v52  ;;  %v8152_v60 = vsel %vm1582_vm1, %v1283_v25, %v1681_v54  ;;  %v1288_v61 = vadd.f32 %v7902_v13, %v1287_v56  ;;  %1485 = vmatprep.mubr.bf16.mxu0 %v7568_v47  ;;  %v2257_v0 = vld [vmem:[#allocation2 + $0xf4] sm:$0xff] }
 0x196   : > { %v2352_v32 = vld [vmem:[#allocation2 + $0xf5] sm:$0xff]  ;;  %1879 = vst [vmem:[#allocation2 + $0x108] sm:$0xff] %v8152_v60  ;;  %v1289_v55 = vpop.f32.mrf.mxu0 }
 0x197   : > { %v8156_v20 = vpack.c.bf16 %v2541_v57, %v2540_v41  ;;  %v2447_v8 = vmax.f32 %v2257_v0, %v2352_v32  ;;  %vm1583_vm2 = vcmp.gt.f32.partialorder %v1288_v61, 0.0  ;;  %v1682_v9 = vmul.f32 0.1, %v1288_v61  ;;  %v2070_v40 = vld [vmem:[#allocation2 + $0xf1] sm:$0xff]  ;;  %v7574_v32 = vld [vmem:[%s7777_s13 + $0x2c4] ss:$8 sps:$4 sm:$0xff]  }
 0x198   : > { %v1290_v12 = vpop.f32.mrf.mxu0  ;;  %v7569_v54 = vld [vmem:[%s7777_s13 + $0x2b0] ss:$8 sps:$4 sm:$0xff]  }
 0x199   : > { %9854 = vst [vmem:[#allocation8_spill] sm:$0xff] %v8156_v20  ;;  %6970 = vmatmul.mubr.bf16.gmra.mxu1 %v8156_v20  ;;  %v2542_v15 = vmax.f32 %v2162_v7, %v2447_v8  ;;  %v8161_v21 = vsel %vm1583_vm2, %v1288_v61, %v1682_v9  ;;  %v1291_v22 = vadd.f32 %v7902_v13, %v1290_v12  ;;  %v2258_v11 = vld [vmem:[#allocation2 + $0xfc] sm:$0xff] }
 0x19a   : > { %v2353_v39 = vld [vmem:[#allocation2 + $0xfd] sm:$0xff]  ;;  %1880 = vst [vmem:[#allocation2 + $0x110] sm:$0xff] %v8161_v21  ;;  %v1292_v26 = vpop.f32.mrf.mxu0  ;;  %v2164_v7 = vmax.f32 %v8115_v46, %v2069_v50  ;;  %v2165_v8 = vmax.f32 %v8124_v62, %v2070_v40 }
 0x19b   : > { %v2448_v28 = vmax.f32 %v2258_v11, %v2353_v39  ;;  %v8170_v36 = vpack.c.bf16 %v2542_v15, %v2541_v57  ;;  %vm1584_vm3 = vcmp.gt.f32.partialorder %v1291_v22, 0.0  ;;  %v1683_v37 = vmul.f32 0.1, %v1291_v22 }
 0x19c   : > { %v1295_v38 = vpop.f32.mrf.mxu0  ;;  %1486 = vmatmul.mubr.bf16.gmra.mxu0 %v7566_v17 }
 0x19d   : > { %v8172_v13 = vmax.f32 %v2163_v10, %v2448_v28  ;;  %v8174_v51 = vsel %vm1584_vm3, %v1291_v22, %v1683_v37  ;;  %v1296_v18 = vadd.f32 %v8179_v35, %v1295_v38  ;;  %1493 = vmatprep.mubr.bf16.mxu0 %v7571_v23  ;;  %v2259_v41 = vld [vmem:[#allocation2 + $0x104] sm:$0xff]  ;;  %v2071_v10 = vld [vmem:[#allocation2 + $0xf9] sm:$0xff] }
 0x19e   : > { %v2354_v25 = vld [vmem:[#allocation2 + $0x105] sm:$0xff]  ;;  %1881 = vst [vmem:[#allocation2 + $0x118] sm:$0xff] %v8174_v51  ;;  %v1297_v44 = vpop.f32.mrf.mxu0  ;;  %v2166_v40 = vmax.f32 %v8135_v24, %v2071_v10 }
 0x19f   : > { %v8184_v45 = vpack.c.bf16 %v8172_v13, %v2542_v15  ;;  %vm1585_vm4 = vcmp.gt.f32.partialorder %v1296_v18, 0.0  ;;  %v1684_v47 = vmul.f32 0.1, %v1296_v18  ;;  %v2449_v4 = vmax.f32 %v2259_v41, %v2354_v25  ;;  %v2072_v28 = vld [vmem:[#allocation2 + $0x101] sm:$0xff] }
 0x1a0   : > { %v1298_v52 = vpop.f32.mrf.mxu0  ;;  %v7572_v37 = vld [vmem:[%s7777_s13 + $0x2c0] ss:$8 sps:$4 sm:$0xff]  }
 0x1a1   : > { %9855 = vst [vmem:[#allocation9_spill] sm:$0xff] %v8184_v45  ;;  %6973 = vmatprep.mubr.bf16.mxu1 %v8184_v45  ;;  %v8188_v56 = vsel %vm1585_vm4, %v1296_v18, %v1684_v47  ;;  %v1299_v57 = vadd.f32 %v8179_v35, %v1298_v52  ;;  %v2260_v61 = vld [vmem:[#allocation2 + $0x10c] sm:$0xff]  ;;  %v8195_v17 = vmax.f32 %v2164_v7, %v2449_v4  ;;  %v7577_v47 = vld [vmem:[%s7777_s13 + $0x2d4] ss:$8 sps:$4 sm:$0xff]  }
 0x1a2   : > { %v2355_v0 = vld [vmem:[#allocation2 + $0x10d] sm:$0xff]  ;;  %1882 = vst [vmem:[#allocation2 + $0x120] sm:$0xff] %v8188_v56  ;;  %v1300_v55 = vpop.f32.mrf.mxu0  ;;  %v2167_v52 = vmax.f32 %v8144_v43, %v2072_v28 }
 0x1a3   : > { %v2450_v9 = vmax.f32 %v2260_v61, %v2355_v0  ;;  %vm1586_vm5 = vcmp.gt.f32.partialorder %v1299_v57, 0.0  ;;  %v1685_v5 = vmul.f32 0.1, %v1299_v57 }
 0x1a4   : > { %v1303_v12 = vpop.f32.mrf.mxu0  ;;  %1494 = vmatmul.mubr.bf16.gmra.mxu0 %v7569_v54 }
 0x1a5   : > { %v8197_v15 = vmax.f32 %v2165_v8, %v2450_v9  ;;  %v8199_v22 = vsel %vm1586_vm5, %v1299_v57, %v1685_v5  ;;  %v1304_v11 = vadd.f32 %v8179_v35, %v1303_v12  ;;  %1501 = vmatprep.mubr.bf16.mxu0 %v7574_v32  ;;  %v2261_v39 = vld [vmem:[#allocation2 + $0x114] sm:$0xff]  ;;  %v2073_v12 = vld [vmem:[#allocation2 + $0x109] sm:$0xff] }
 0x1a6   : > { %v2356_v23 = vld [vmem:[#allocation2 + $0x115] sm:$0xff]  ;;  %1883 = vst [vmem:[#allocation2 + $0x128] sm:$0xff] %v8199_v22  ;;  %v1305_v46 = vpop.f32.mrf.mxu0 }
 0x1a7   : > { %v8205_v62 = vpack.c.bf16 %v8197_v15, %v8195_v17  ;;  %vm1587_vm6 = vcmp.gt.f32.partialorder %v1304_v11, 0.0  ;;  %v1686_v26 = vmul.f32 0.1, %v1304_v11  ;;  %v2451_v38 = vmax.f32 %v2261_v39, %v2356_v23  ;;  %v7602_v9 = vld [vmem:[%s9792_s3 + $0x10] sm:$0xff]  }
 0x1a8   : > { %v1306_v31 = vpop.f32.mrf.mxu0  ;;  %v7575_v23 = vld [vmem:[%s7777_s13 + $0x2d0] ss:$8 sps:$4 sm:$0xff]   ;;  %7031 = vmatprep.subr.bf16.mxu1 %v7602_v9 }
 0x1a9   : > { %9856 = vst [vmem:[#allocation10_spill] sm:$0xff] %v8205_v62  ;;  %6974 = vmatmul.mubr.bf16.gmra.mxu1 %v8205_v62  ;;  %v8209_v18 = vsel %vm1587_vm6, %v1304_v11, %v1686_v26  ;;  %v1307_v41 = vadd.f32 %v8179_v35, %v1306_v31  ;;  %v2262_v25 = vld [vmem:[#allocation2 + $0x11c] sm:$0xff]  ;;  %v8216_v61 = vmax.f32 %v2166_v40, %v2451_v38  ;;  %v2074_v11 = vld [vmem:[#allocation2 + $0x111] sm:$0xff] }
 0x1aa   : > { %v2357_v44 = vld [vmem:[#allocation2 + $0x11d] sm:$0xff]  ;;  %1884 = vst [vmem:[#allocation2 + $0x130] sm:$0xff] %v8209_v18  ;;  %v1308_v50 = vpop.f32.mrf.mxu0  ;;  %7032 = vmatpush3.bf16.msra.mxu1 %v7602_v9 }
 0x1ab   : > { %v2452_v54 = vmax.f32 %v2262_v25, %v2357_v44  ;;  %vm1588_vm7 = vcmp.gt.f32.partialorder %v1307_v41, 0.0  ;;  %v1687_v4 = vmul.f32 0.1, %v1307_v41  ;;  %v2169_v25 = vmax.f32 %v8161_v21, %v2074_v11 }
 0x1ac   : > { %v1311_v57 = vpop.f32.mrf.mxu0  ;;  %1502 = vmatmul.mubr.bf16.gmra.mxu0 %v7572_v37  ;;  %v7580_v37 = vld [vmem:[%s7777_s13 + $0x2e4] ss:$8 sps:$4 sm:$0xff]  }
 0x1ad   : > { %v8218_v0 = vmax.f32 %v2167_v52, %v2452_v54  ;;  %v8220_v32 = vsel %vm1588_vm7, %v1307_v41, %v1687_v4  ;;  %v1312_v55 = vadd.f32 %v8179_v35, %v1311_v57  ;;  %1509 = vmatprep.mubr.bf16.mxu0 %v7577_v47  ;;  %v2263_v7 = vld [vmem:[#allocation2 + $0x124] sm:$0xff]  ;;  %v2168_v41 = vmax.f32 %v8152_v60, %v2073_v12 }
 0x1ae   : > { %v2358_v8 = vld [vmem:[#allocation2 + $0x125] sm:$0xff]  ;;  %1885 = vst [vmem:[#allocation2 + $0x138] sm:$0xff] %v8220_v32  ;;  %v1313_v24 = vpop.f32.mrf.mxu0 }
 0x1af   : > { %v8226_v43 = vpack.c.bf16 %v8218_v0, %v8216_v61  ;;  %vm1589_vm8 = vcmp.gt.f32.partialorder %v1312_v55, 0.0  ;;  %v1688_v5 = vmul.f32 0.1, %v1312_v55  ;;  %v2453_v46 = vmax.f32 %v2263_v7, %v2358_v8  ;;  %v2075_v8 = vld [vmem:[#allocation2 + $0x119] sm:$0xff]  ;;  %v2076_v24 = vld [vmem:[#allocation2 + $0x121] sm:$0xff] }
 0x1b0   : > { %v1314_v39 = vpop.f32.mrf.mxu0 }
 0x1b1   : > { %9857 = vst [vmem:[#allocation11_spill] sm:$0xff] %v8226_v43  ;;  %6977 = vmatprep.mubr.bf16.mxu1 %v8226_v43  ;;  %v8233_v26 = vsel %vm1589_vm8, %v1312_v55, %v1688_v5  ;;  %v1315_v10 = vadd.f32 %v8179_v35, %v1314_v39  ;;  %v2264_v28 = vld [vmem:[#allocation2 + $0x12c] sm:$0xff]  ;;  %v8240_v40 = vmax.f32 %v2168_v41, %v2453_v46  ;;  %v7578_v5 = vld [vmem:[%s7777_s13 + $0x2e0] ss:$8 sps:$4 sm:$0xff]  }
 0x1b2   : > { %v2359_v31 = vld [vmem:[#allocation2 + $0x12d] sm:$0xff]  ;;  %1886 = vst [vmem:[#allocation2 + $0x140] sm:$0xff] %v8233_v26  ;;  %v1316_v38 = vpop.f32.mrf.mxu0 }
 0x1b3   : > { %v2454_v44 = vmax.f32 %v2264_v28, %v2359_v31  ;;  %vm1590_vm9 = vcmp.gt.f32.partialorder %v1315_v10, 0.0  ;;  %v1689_v47 = vmul.f32 0.1, %v1315_v10  ;;  %v2170_v31 = vmax.f32 %v8174_v51, %v2075_v8  ;;  %v2077_v8 = vld [vmem:[#allocation2 + $0x129] sm:$0xff] }
 0x1b4   : > { %v1319_v50 = vpop.f32.mrf.mxu0  ;;  %1510 = vmatmul.mubr.bf16.gmra.mxu0 %v7575_v23 }
 0x1b5   : > { %v8242_v52 = vmax.f32 %v2169_v25, %v2454_v44  ;;  %v8244_v54 = vsel %vm1590_vm9, %v1315_v10, %v1689_v47  ;;  %v1320_v4 = vadd.f32 %v8179_v35, %v1319_v50  ;;  %1517 = vmatprep.mubr.bf16.mxu0 %v7580_v37  ;;  %v2265_v57 = vld [vmem:[#allocation2 + $0x134] sm:$0xff]  ;;  %v2171_v37 = vmax.f32 %v8188_v56, %v2076_v24 }
 0x1b6   : > { %v2360_v55 = vld [vmem:[#allocation2 + $0x135] sm:$0xff]  ;;  %1887 = vst [vmem:[#allocation2 + $0x148] sm:$0xff] %v8244_v54  ;;  %v1321_v60 = vpop.f32.mrf.mxu0 }
 0x1b7   : > { %v8250_v21 = vpack.c.bf16 %v8242_v52, %v8240_v40  ;;  %vm1591_vm10 = vcmp.gt.f32.partialorder %v1320_v4, 0.0  ;;  %v1690_v7 = vmul.f32 0.1, %v1320_v4  ;;  %v2455_v12 = vmax.f32 %v2265_v57, %v2360_v55  ;;  %v7585_v10 = vld [vmem:[%s7777_s13 + $0x2f4] ss:$8 sps:$4 sm:$0xff]   ;;  %v7603_v60 = vld [vmem:[%s9792_s3 + $0x8] sm:$0xff]  }
 0x1b8   : > { %v1322_v9 = vpop.f32.mrf.mxu0  ;;  %v2078_v24 = vld [vmem:[#allocation2 + $0x131] sm:$0xff]  ;;  %7033 = vmatprep.subr.bf16.mxu1 %v7603_v60 }
 0x1b9   : > { %9858 = vst [vmem:[#allocation12_spill] sm:$0xff] %v8250_v21  ;;  %6978 = vmatmul.mubr.bf16.gmra.mxu1 %v8250_v21  ;;  %v8254_v11 = vsel %vm1591_vm10, %v1320_v4, %v1690_v7  ;;  %v1323_v39 = vadd.f32 %v8179_v35, %v1322_v9  ;;  %v2266_v23 = vld [vmem:[#allocation2 + $0x13c] sm:$0xff]  ;;  %v8261_v44 = vmax.f32 %v2170_v31, %v2455_v12 }
 0x1ba   : > { %v2361_v46 = vld [vmem:[#allocation2 + $0x13d] sm:$0xff]  ;;  %1888 = vst [vmem:[#allocation2 + $0x150] sm:$0xff] %v8254_v11  ;;  %v1324_v28 = vpop.f32.mrf.mxu0  ;;  %7034 = vmatpush3.bf16.msra.mxu1 %v7603_v60 }
 0x1bb   : > { %v2456_v38 = vmax.f32 %v2266_v23, %v2361_v46  ;;  %vm1592_vm11 = vcmp.gt.f32.partialorder %v1323_v39, 0.0  ;;  %v1691_v41 = vmul.f32 0.1, %v1323_v39  ;;  %v7590_v28 = vld [vmem:[%s7777_s13 + $0x304] ss:$8 sps:$4 sm:$0xff]  }
 0x1bc   : > { %v1327_v25 = vpop.f32.mrf.mxu0  ;;  %1518 = vmatmul.mubr.bf16.gmra.mxu0 %v7578_v5  ;;  %v7583_v5 = vld [vmem:[%s7777_s13 + $0x2f0] ss:$8 sps:$4 sm:$0xff]  }
 0x1bd   : > { %v8263_v47 = vmax.f32 %v2171_v37, %v2456_v38  ;;  %v8265_v50 = vsel %vm1592_vm11, %v1323_v39, %v1691_v41  ;;  %v1328_v4 = vadd.f32 %v8179_v35, %v1327_v25  ;;  %1525 = vmatprep.mubr.bf16.mxu0 %v7585_v10  ;;  %v2267_v57 = vld [vmem:[#allocation2 + $0x144] sm:$0xff]  ;;  %v2172_v37 = vmax.f32 %v8199_v22, %v2077_v8 }
 0x1be   : > { %v2362_v55 = vld [vmem:[#allocation2 + $0x145] sm:$0xff]  ;;  %1889 = vst [vmem:[#allocation2 + $0x158] sm:$0xff] %v8265_v50  ;;  %v1329_v51 = vpop.f32.mrf.mxu0  ;;  %v2173_v38 = vmax.f32 %v8209_v18, %v2078_v24  ;;  %v484_v24 = vld [vmem:[%s7777_s13 + $0x310] sm:$0xff] }
 0x1bf   : > { %v8271_v56 = vpack.c.bf16 %v8263_v47, %v8261_v44  ;;  %vm1593_vm12 = vcmp.gt.f32.partialorder %v1328_v4, 0.0  ;;  %v1692_v7 = vmul.f32 0.1, %v1328_v4  ;;  %v2457_v12 = vmax.f32 %v2267_v57, %v2362_v55 }
 0x1c0   : > { %v1330_v9 = vpop.f32.mrf.mxu0 }
 0x1c1   : > { %9859 = vst [vmem:[#allocation13_spill] sm:$0xff] %v8271_v56  ;;  %6981 = vmatprep.mubr.bf16.mxu1 %v8271_v56  ;;  %v8278_v39 = vsel %vm1593_vm12, %v1328_v4, %v1692_v7  ;;  %v1331_v23 = vadd.f32 %v8179_v35, %v1330_v9  ;;  %v2268_v46 = vld [vmem:[#allocation2 + $0x14c] sm:$0xff]  ;;  %v8285_v4 = vmax.f32 %v2172_v37, %v2457_v12  ;;  %v2080_v12 = vld [vmem:[#allocation2 + $0x141] sm:$0xff] }
 0x1c2   : > { %v2363_v10 = vld [vmem:[#allocation2 + $0x14d] sm:$0xff]  ;;  %1890 = vst [vmem:[#allocation2 + $0x160] sm:$0xff] %v8278_v39  ;;  %v1332_v31 = vpop.f32.mrf.mxu0 }
 0x1c3   : > { %v2458_v41 = vmax.f32 %v2268_v46, %v2363_v10  ;;  %vm1594_vm13 = vcmp.gt.f32.partialorder %v1331_v23, 0.0  ;;  %v1693_v25 = vmul.f32 0.1, %v1331_v23 }
 0x1c4   : > { %v1335_v57 = vpop.f32.mrf.mxu0  ;;  %1526 = vmatmul.mubr.bf16.gmra.mxu0 %v7583_v5  ;;  %v2079_v5 = vld [vmem:[#allocation2 + $0x139] sm:$0xff] }
 0x1c5   : > { %v8287_v55 = vmax.f32 %v2173_v38, %v2458_v41  ;;  %v8289_v51 = vsel %vm1594_vm13, %v1331_v23, %v1693_v25  ;;  %v1336_v60 = vadd.f32 %v8179_v35, %v1335_v57  ;;  %1533 = vmatprep.mubr.bf16.mxu0 %v7590_v28  ;;  %v2269_v7 = vld [vmem:[#allocation2 + $0x154] sm:$0xff]  ;;  %v7588_v23 = vld [vmem:[%s7777_s13 + $0x300] ss:$8 sps:$4 sm:$0xff]   ;;  %v6518_v41 = vcombine.high %v484_v24, %v484_v24 }
 0x1c6   : > { %v2364_v22 = vld [vmem:[#allocation2 + $0x155] sm:$0xff]  ;;  %1891 = vst [vmem:[#allocation2 + $0x168] sm:$0xff] %v8289_v51  ;;  %v1337_v18 = vpop.f32.mrf.mxu0  ;;  %v2174_v57 = vmax.f32 %v8220_v32, %v2079_v5  ;;  %v7604_v5 = vld [vmem:[%s9792_s3] sm:$0xff]  }
 0x1c7   : > { %v8295_v8 = vpack.c.bf16 %v8287_v55, %v8285_v4  ;;  %vm1595_vm14 = vcmp.gt.f32.partialorder %v1336_v60, 0.0  ;;  %v1694_v9 = vmul.f32 0.1, %v1336_v60  ;;  %v2459_v10 = vmax.f32 %v2269_v7, %v2364_v22  ;;  %7035 = vmatprep.subr.bf16.mxu1 %v7604_v5 }
 0x1c8   : > { %v1338_v46 = vpop.f32.mrf.mxu0  ;;  %v2175_v18 = vmax.f32 %v8233_v26, %v2080_v12  ;;  %v2082_v12 = vld [vmem:[#allocation2 + $0x151] sm:$0xff]  ;;  %7036 = vmatpush3.bf16.msra.mxu1 %v7604_v5 }
 0x1c9   : > { %9860 = vst [vmem:[#allocation14_spill] sm:$0xff] %v8295_v8  ;;  %6982 = vmatmul.mubr.bf16.gmra.mxu1 %v8295_v8  ;;  %v8300_v28 = vsel %vm1595_vm14, %v1336_v60, %v1694_v9  ;;  %v1339_v31 = vadd.f32 %v8179_v35, %v1338_v46  ;;  %v2270_v37 = vld [vmem:[#allocation2 + $0x15c] sm:$0xff]  ;;  %v8306_v7 = vmax.f32 %v2174_v57, %v2459_v10 }
 0x1ca   : > { %v2365_v38 = vld [vmem:[#allocation2 + $0x15d] sm:$0xff]  ;;  %1892 = vst [vmem:[#allocation2 + $0x170] sm:$0xff] %v8300_v28  ;;  %v1340_v25 = vpop.f32.mrf.mxu0 }
 0x1cb   : > { %v2460_v1 = vmax.f32 %v2270_v37, %v2365_v38  ;;  %vm1596_vm15 = vcmp.gt.f32.partialorder %v1339_v31, 0.0  ;;  %v1695_v27 = vmul.f32 0.1, %v1339_v31 }
 0x1cc   : > { %v1343_v58 = vpop.f32.mrf.mxu0  ;;  %1534 = vmatmul.mubr.bf16.gmra.mxu0 %v7588_v23 }
 0x1cd   : > { %v8308_v60 = vmax.f32 %v2175_v18, %v2460_v1  ;;  %v8310_v22 = vsel %vm1596_vm15, %v1339_v31, %v1695_v27  ;;  %v1344_v9 = vadd.f32 %v8179_v35, %v1343_v58  ;;  %1541 = vmatprep.mubr.bf16.mxu0 %v6518_v41  ;;  %v2271_v46 = vld [vmem:[#allocation2 + $0x164] sm:$0xff]  ;;  %v6517_v58 = vcombine.low %v484_v24, %v484_v24 }
 0x1ce   : > { %v2366_v25 = vld [vmem:[#allocation2 + $0x165] sm:$0xff]  ;;  %1893 = vst [vmem:[#allocation2 + $0x178] sm:$0xff] %v8310_v22  ;;  %v1345_v32 = vpop.f32.mrf.mxu0  ;;  %v8330_v24 = vpack.c.bf16 %v8195_v17, %v8172_v13 }
 0x1cf   : > { %v8316_v26 = vpack.c.bf16 %v8308_v60, %v8306_v7  ;;  %vm1597_vm0 = vcmp.gt.f32.partialorder %v1344_v9, 0.0  ;;  %v1696_v1 = vmul.f32 0.1, %v1344_v9  ;;  %v2081_v27 = vld [vmem:[#allocation2 + $0x149] sm:$0xff]  ;;  %v2461_v10 = vmax.f32 %v2271_v46, %v2366_v25 }
 0x1d0   : > { %v1346_v23 = vpop.f32.mrf.mxu0  ;;  %v2176_v18 = vmax.f32 %v8244_v54, %v2081_v27  ;;  %v2177_v32 = vmax.f32 %v8254_v11, %v2082_v12  ;;  %v2083_v12 = vld [vmem:[#allocation2 + $0x159] sm:$0xff] }
 0x1d1   : > { %9861 = vst [vmem:[#allocation15_spill] sm:$0xff] %v8316_v26  ;;  %6985 = vmatprep.mubr.bf16.mxu1 %v8316_v26  ;;  %v8322_v31 = vsel %vm1597_vm0, %v1344_v9, %v1696_v1  ;;  %v1347_v37 = vadd.f32 %v8179_v35, %v1346_v23  ;;  %v2272_v38 = vld [vmem:[#allocation2 + $0x16c] sm:$0xff] }
 0x1d2   : > { %v2367_v41 = vld [vmem:[#allocation2 + $0x16d] sm:$0xff]  ;;  %1894 = vst [vmem:[#allocation2 + $0x180] sm:$0xff] %v8322_v31  ;;  %v1348_v57 = vpop.f32.mrf.mxu0  ;;  %v8332_v46 = vmax.f32 %v2176_v18, %v2461_v10  ;;  %v2178_v18 = vmax.f32 %v8265_v50, %v2083_v12 }
 0x1d3   : > { %v2462_v29 = vmax.f32 %v2272_v38, %v2367_v41  ;;  %vm1598_vm1 = vcmp.gt.f32.partialorder %v1347_v37, 0.0  ;;  %v1697_v26 = vmul.f32 0.1, %v1347_v37  ;;  %v8351_v41 = vpack.c.bf16 %v8216_v61, %v8197_v15 }
 0x1d4   : > { %v1351_v9 = vpop.f32.mrf.mxu0  ;;  %1542 = vmatmul.mubr.bf16.gmra.mxu0 %v6517_v58 }
 0x1d5   : > { %v8334_v25 = vmax.f32 %v2177_v32, %v2462_v29  ;;  %v8336_v5 = vsel %vm1598_vm1, %v1347_v37, %v1697_v26  ;;  %v1352_v1 = vadd.f32 %v8179_v35, %v1351_v9  ;;  %7289 = vmatprep.mubr.bf16.mxu0 %v8330_v24  ;;  %v2273_v54 = vld [vmem:[#allocation2 + $0x174] sm:$0xff]  ;;  %v2084_v29 = vld [vmem:[#allocation2 + $0x161] sm:$0xff] }
 0x1d6   : > { %v2368_v11 = vld [vmem:[#allocation2 + $0x175] sm:$0xff]  ;;  %1895 = vst [vmem:[#allocation2 + $0x188] sm:$0xff] %v8336_v5  ;;  %v1353_v27 = vpop.f32.mrf.mxu0  ;;  %v2179_v32 = vmax.f32 %v8278_v39, %v2084_v29 }
 0x1d7   : > { %v8343_v13 = vpack.c.bf16 %v8334_v25, %v8332_v46  ;;  %vm1599_vm2 = vcmp.gt.f32.partialorder %v1352_v1, 0.0  ;;  %v1698_v17 = vmul.f32 0.1, %v1352_v1  ;;  %v2463_v26 = vmax.f32 %v2273_v54, %v2368_v11 }
 0x1d8   : > { %v1354_v23 = vpop.f32.mrf.mxu0 }
 0x1d9   : > { %9862 = vst [vmem:[#allocation16_spill] sm:$0xff] %v8343_v13  ;;  %6986 = vmatmul.mubr.bf16.gmra.mxu1 %v8343_v13  ;;  %v8346_v58 = vsel %vm1599_vm2, %v1352_v1, %v1698_v17  ;;  %v1355_v10 = vadd.f32 %v8179_v35, %v1354_v23  ;;  %v2274_v37 = vld [vmem:[#allocation2 + $0x17c] sm:$0xff]  ;;  %v8358_v1 = vpack.c.bf16 %v8240_v40, %v8218_v0  ;;  %v2085_v23 = vld [vmem:[#allocation2 + $0x169] sm:$0xff] }
 0x1da   : > { %v2369_v38 = vld [vmem:[#allocation2 + $0x17d] sm:$0xff]  ;;  %1896 = vst [vmem:[#allocation2 + $0x190] sm:$0xff] %v8346_v58  ;;  %v1356_v57 = vpop.f32.mrf.mxu0  ;;  %v8361_v27 = vmax.f32 %v2178_v18, %v2463_v26  ;;  %v2086_v26 = vld [vmem:[#allocation2 + $0x171] sm:$0xff] }
 0x1db   : > { %v2464_v9 = vmax.f32 %v2274_v37, %v2369_v38  ;;  %vm1600_vm3 = vcmp.gt.f32.partialorder %v1355_v10, 0.0  ;;  %v1699_v54 = vmul.f32 0.1, %v1355_v10  ;;  %v7605_v40 = vld [vmem:[%s9792_s3 + $0xb8] sm:$0xff]  }
 0x1dc   : > { %v1359_v11 = vpop.f32.mrf.mxu0  ;;  %7290 = vmatmul.mubr.bf16.vlgmr.msra.gmra.mxu0 %v8351_v41  ;;  %7105 = vmatprep.subr.bf16.mxu1 %v7605_v40 }
 0x1dd   : > { %v8363_v15 = vmax.f32 %v2179_v32, %v2464_v9  ;;  %v8365_v61 = vsel %vm1600_vm3, %v1355_v10, %v1699_v54  ;;  %v1360_v50 = vadd.f32 %v8179_v35, %v1359_v11  ;;  %7293 = vmatprep.mubr.bf16.mxu0 %v8358_v1  ;;  %v2275_v39 = vld [vmem:[#allocation2 + $0x184] sm:$0xff]  ;;  %v8384_v54 = vpack.c.bf16 %v8261_v44, %v8242_v52 }
 0x1de   : > { %v2370_v17 = vld [vmem:[#allocation2 + $0x185] sm:$0xff]  ;;  %1897 = vst [vmem:[#allocation2 + $0x198] sm:$0xff] %v8365_v61  ;;  %v1361_v12 = vpop.f32.mrf.mxu0  ;;  %v2180_v11 = vmax.f32 %v8289_v51, %v2085_v23  ;;  %v2087_v23 = vld [vmem:[#allocation2 + $0x179] sm:$0xff] }
 0x1df   : > { %v8372_v0 = vpack.c.bf16 %v8363_v15, %v8361_v27  ;;  %vm1601_vm4 = vcmp.gt.f32.partialorder %v1360_v50, 0.0  ;;  %v1700_v29 = vmul.f32 0.1, %v1360_v50  ;;  %v2465_v37 = vmax.f32 %v2275_v39, %v2370_v17 }
 0x1e0   : > { %v1362_v10 = vpop.f32.mrf.mxu0  ;;  %v2181_v12 = vmax.f32 %v8300_v28, %v2086_v26  ;;  %v2088_v26 = vld [vmem:[#allocation2 + $0x181] sm:$0xff] }
 0x1e1   : > { %9863 = vst [vmem:[#allocation17_spill] sm:$0xff] %v8372_v0  ;;  %6989 = vmatprep.mubr.bf16.mxu1 %v8372_v0  ;;  %v8378_v38 = vsel %vm1601_vm4, %v1360_v50, %v1700_v29  ;;  %v1363_v57 = vadd.f32 %v8179_v35, %v1362_v10  ;;  %v2276_v18 = vld [vmem:[#allocation2 + $0x18c] sm:$0xff]  ;;  %v8390_v50 = vpack.c.bf16 %v8285_v4, %v8263_v47 }
 0x1e2   : > { %v2371_v32 = vld [vmem:[#allocation2 + $0x18d] sm:$0xff]  ;;  %1898 = vst [vmem:[#allocation2 + $0x1a0] sm:$0xff] %v8378_v38  ;;  %v1364_v9 = vpop.f32.mrf.mxu0  ;;  %v2560_v40 = vmax.f32 %v2180_v11, %v2465_v37 }
 0x1e3   : > { %v2466_v0 = vmax.f32 %v2276_v18, %v2371_v32  ;;  %vm1602_vm5 = vcmp.gt.f32.partialorder %v1363_v57, 0.0  ;;  %v1701_v39 = vmul.f32 0.1, %v1363_v57 }
 0x1e4   : > { %v1367_v17 = vpop.f32.mrf.mxu0  ;;  %7294 = vmatmul.mubr.bf16.gmra.mxu0 %v8384_v54 }
 0x1e5   : > { %v8393_v29 = vmax.f32 %v2181_v12, %v2466_v0  ;;  %v8395_v10 = vsel %vm1602_vm5, %v1363_v57, %v1701_v39  ;;  %v1368_v52 = vadd.f32 %v8179_v35, %v1367_v17  ;;  %7297 = vmatprep.mubr.bf16.mxu0 %v8390_v50  ;;  %v2277_v44 = vld [vmem:[#allocation2 + $0x194] sm:$0xff]  ;;  %v8410_v12 = vpack.c.bf16 %v8306_v7, %v8287_v55 }
 0x1e6   : > { %v2372_v51 = vld [vmem:[#allocation2 + $0x195] sm:$0xff]  ;;  %1899 = vst [vmem:[#allocation2 + $0x1a8] sm:$0xff] %v8395_v10  ;;  %v1369_v28 = vpop.f32.mrf.mxu0  ;;  %v2182_v39 = vmax.f32 %v8310_v22, %v2087_v23  ;;  %v2183_v17 = vmax.f32 %v8322_v31, %v2088_v26 }
 0x1e7   : > { %v8401_v47 = vpack.c.bf16 %v8393_v29, %v2560_v40  ;;  %vm1603_vm6 = vcmp.gt.f32.partialorder %v1368_v52, 0.0  ;;  %v1702_v4 = vmul.f32 0.1, %v1368_v52  ;;  %v2467_v37 = vmax.f32 %v2277_v44, %v2372_v51  ;;  %v2090_v26 = vld [vmem:[#allocation2 + $0x191] sm:$0xff] }
 0x1e8   : > { %v1370_v0 = vpop.f32.mrf.mxu0 }
 0x1e9   : > { %9864 = vst [vmem:[#allocation18_spill] sm:$0xff] %v8401_v47  ;;  %6990 = vmatmul.mubr.bf16.gmra.mxu1 %v8401_v47  ;;  %v8404_v57 = vsel %vm1603_vm6, %v1368_v52, %v1702_v4  ;;  %v1371_v18 = vadd.f32 %v8179_v35, %v1370_v0  ;;  %v2278_v32 = vld [vmem:[#allocation2 + $0x19c] sm:$0xff]  ;;  %v8416_v52 = vpack.c.bf16 %v8332_v46, %v8308_v60  ;;  %v2089_v46 = vld [vmem:[#allocation2 + $0x189] sm:$0xff] }
 0x1ea   : > { %v2373_v9 = vld [vmem:[#allocation2 + $0x19d] sm:$0xff]  ;;  %1900 = vst [vmem:[#allocation2 + $0x1b0] sm:$0xff] %v8404_v57  ;;  %v1372_v11 = vpop.f32.mrf.mxu0  ;;  %v2562_v4 = vmax.f32 %v2182_v39, %v2467_v37 }
 0x1eb   : > { %v2468_v28 = vmax.f32 %v2278_v32, %v2373_v9  ;;  %vm1604_vm7 = vcmp.gt.f32.partialorder %v1371_v18, 0.0  ;;  %v1703_v44 = vmul.f32 0.1, %v1371_v18 }
 0x1ec   : > { %v1375_v51 = vpop.f32.mrf.mxu0  ;;  %7298 = vmatmul.mubr.bf16.gmra.mxu0 %v8410_v12 }
 0x1ed   : > { %v2563_v0 = vmax.f32 %v2183_v17, %v2468_v28  ;;  %v8419_v11 = vsel %vm1604_vm7, %v1371_v18, %v1703_v44  ;;  %v1376_v55 = vadd.f32 %v8179_v35, %v1375_v51  ;;  %7301 = vmatprep.mubr.bf16.mxu0 %v8416_v52  ;;  %v2279_v7 = vld [vmem:[#allocation2 + $0x1a4] sm:$0xff]  ;;  %v8433_v44 = vpack.c.bf16 %v8361_v27, %v8334_v25 }
 0x1ee   : > { %v2374_v22 = vld [vmem:[#allocation2 + $0x1a5] sm:$0xff]  ;;  %1901 = vst [vmem:[#allocation2 + $0x1b8] sm:$0xff] %v8419_v11  ;;  %v1377_v31 = vpop.f32.mrf.mxu0  ;;  %v2184_v51 = vmax.f32 %v8336_v5, %v2089_v46 }
 0x1ef   : > { %v8424_v23 = vpack.c.bf16 %v2563_v0, %v2562_v4  ;;  %vm1605_vm8 = vcmp.gt.f32.partialorder %v1376_v55, 0.0  ;;  %v1704_v60 = vmul.f32 0.1, %v1376_v55  ;;  %v2469_v37 = vmax.f32 %v2279_v7, %v2374_v22 }
 0x1f0   : > { %v1378_v32 = vpop.f32.mrf.mxu0  ;;  %v2185_v31 = vmax.f32 %v8346_v58, %v2090_v26  ;;  %v2092_v26 = vld [vmem:[#allocation2 + $0x1a1] sm:$0xff] }
 0x1f1   : > { %9865 = vst [vmem:[#allocation19_spill] sm:$0xff] %v8424_v23  ;;  %6993 = vmatprep.mubr.bf16.mxu1 %v8424_v23  ;;  %v8427_v18 = vsel %vm1605_vm8, %v1376_v55, %v1704_v60  ;;  %v1379_v9 = vadd.f32 %v8179_v35, %v1378_v32  ;;  %v2280_v39 = vld [vmem:[#allocation2 + $0x1ac] sm:$0xff]  ;;  %v8438_v55 = vpack.c.bf16 %v2560_v40, %v8363_v15  ;;  %v2091_v40 = vld [vmem:[#allocation2 + $0x199] sm:$0xff] }
 0x1f2   : > { %v2375_v17 = vld [vmem:[#allocation2 + $0x1ad] sm:$0xff]  ;;  %1902 = vst [vmem:[#allocation2 + $0x1c0] sm:$0xff] %v8427_v18  ;;  %v1380_v28 = vpop.f32.mrf.mxu0  ;;  %v2564_v60 = vmax.f32 %v2184_v51, %v2469_v37 }
 0x1f3   : > { %v2470_v47 = vmax.f32 %v2280_v39, %v2375_v17  ;;  %vm1606_vm9 = vcmp.gt.f32.partialorder %v1379_v9, 0.0  ;;  %v1705_v7 = vmul.f32 0.1, %v1379_v9 }
 0x1f4   : > { %v1383_v22 = vpop.f32.mrf.mxu0  ;;  %7302 = vmatmul.mubr.bf16.gmra.mxu0 %v8433_v44 }
 0x1f5   : > { %v2565_v32 = vmax.f32 %v2185_v31, %v2470_v47  ;;  %v8441_v28 = vsel %vm1606_vm9, %v1379_v9, %v1705_v7  ;;  %v1384_v25 = vadd.f32 %v8179_v35, %v1383_v22  ;;  %7305 = vmatprep.mubr.bf16.mxu0 %v8438_v55  ;;  %v2281_v5 = vld [vmem:[#allocation2 + $0x1b4] sm:$0xff]  ;;  %v8454_v7 = vpack.c.bf16 %v2562_v4, %v8393_v29 }
 0x1f6   : > { %v2376_v27 = vld [vmem:[#allocation2 + $0x1b5] sm:$0xff]  ;;  %1903 = vst [vmem:[#allocation2 + $0x1c8] sm:$0xff] %v8441_v28  ;;  %v1385_v58 = vpop.f32.mrf.mxu0  ;;  %v2186_v22 = vmax.f32 %v8365_v61, %v2091_v40 }
 0x1f7   : > { %v8446_v46 = vpack.c.bf16 %v2565_v32, %v2564_v60  ;;  %vm1607_vm10 = vcmp.gt.f32.partialorder %v1384_v25, 0.0  ;;  %v1706_v15 = vmul.f32 0.1, %v1384_v25  ;;  %v2471_v47 = vmax.f32 %v2281_v5, %v2376_v27 }
 0x1f8   : > { %v1386_v39 = vpop.f32.mrf.mxu0  ;;  %v2187_v58 = vmax.f32 %v8378_v38, %v2092_v26  ;;  %v8458_v5 = vpack.c.bf16 %v2564_v60, %v2563_v0 }
 0x1f9   : > { %9866 = vst [vmem:[#allocation20_spill] sm:$0xff] %v8446_v46  ;;  %6994 = vmatmul.mubr.bf16.gmra.mxu1 %v8446_v46  ;;  %v8449_v37 = vsel %vm1607_vm10, %v1384_v25, %v1706_v15  ;;  %v1387_v9 = vadd.f32 %v8179_v35, %v1386_v39  ;;  %v2282_v17 = vld [vmem:[#allocation2 + $0x1bc] sm:$0xff]  ;;  %v2093_v25 = vld [vmem:[#allocation2 + $0x1a9] sm:$0xff]  ;;  %v2566_v15 = vmax.f32 %v2186_v22, %v2471_v47  ;;  %v2094_v47 = vld [vmem:[#allocation2 + $0x1b1] sm:$0xff] }
 0x1fa   : > { %v2377_v51 = vld [vmem:[#allocation2 + $0x1bd] sm:$0xff]  ;;  %1904 = vst [vmem:[#allocation2 + $0x1d0] sm:$0xff] %v8449_v37  ;;  %v1388_v31 = vpop.f32.mrf.mxu0  ;;  %v2188_v0 = vmax.f32 %v8395_v10, %v2093_v25  ;;  %v2189_v25 = vmax.f32 %v8404_v57, %v2094_v47 }
 0x1fb   : > { %v2472_v23 = vmax.f32 %v2282_v17, %v2377_v51  ;;  %vm1608_vm11 = vcmp.gt.f32.partialorder %v1387_v9, 0.0  ;;  %v1707_v46 = vmul.f32 0.1, %v1387_v9 }
 0x1fc   : > { %v1391_v27 = vpop.f32.mrf.mxu0  ;;  %7306 = vmatmul.mubr.bf16.gmra.mxu0 %v8454_v7 }
 0x1fd   : > { %v2567_v39 = vmax.f32 %v2187_v58, %v2472_v23  ;;  %v8461_v13 = vsel %vm1608_vm11, %v1387_v9, %v1707_v46  ;;  %v1392_v29 = vadd.f32 %v8179_v35, %v1391_v27  ;;  %7309 = vmatprep.mubr.bf16.mxu0 %v8458_v5  ;;  %v2283_v61 = vld [vmem:[#allocation2 + $0x1c4] sm:$0xff]  ;;  %v8474_v58 = vpack.c.bf16 %v2566_v15, %v2565_v32 }
 0x1fe   : > { %v2378_v4 = vld [vmem:[#allocation2 + $0x1c5] sm:$0xff]  ;;  %1905 = vst [vmem:[#allocation2 + $0x1d8] sm:$0xff] %v8461_v13  ;;  %v1393_v38 = vpop.f32.mrf.mxu0 }
 0x1ff   : > { %v8466_v40 = vpack.c.bf16 %v2567_v39, %v2566_v15  ;;  %v2473_v60 = vmax.f32 %v2283_v61, %v2378_v4  ;;  %vm1609_vm12 = vcmp.gt.f32.partialorder %v1392_v29, 0.0  ;;  %v1708_v26 = vmul.f32 0.1, %v1392_v29  ;;  %v2095_v4 = vld [vmem:[#allocation2 + $0x1b9] sm:$0xff] }
 0x200   : > { %v1394_v23 = vpop.f32.mrf.mxu0 }
 0x201   : > { %9867 = vst [vmem:[#allocation21_spill] sm:$0xff] %v8466_v40  ;;  %6997 = vmatprep.mubr.bf16.mxu1 %v8466_v40  ;;  %v2568_v46 = vmax.f32 %v2188_v0, %v2473_v60  ;;  %v8470_v9 = vsel %vm1609_vm12, %v1392_v29, %v1708_v26  ;;  %v1395_v17 = vadd.f32 %v8179_v35, %v1394_v23  ;;  %v2284_v51 = vld [vmem:[#allocation2 + $0x1cc] sm:$0xff] }
 0x202   : > { %v2379_v31 = vld [vmem:[#allocation2 + $0x1cd] sm:$0xff]  ;;  %1906 = vst [vmem:[#allocation2 + $0x1e0] sm:$0xff] %v8470_v9  ;;  %v1396_v22 = vpop.f32.mrf.mxu0  ;;  %v2190_v26 = vmax.f32 %v8419_v11, %v2095_v4 }
 0x203   : > { %v8476_v10 = vpack.c.bf16 %v2568_v46, %v2567_v39  ;;  %v2474_v27 = vmax.f32 %v2284_v51, %v2379_v31  ;;  %vm1610_vm13 = vcmp.gt.f32.partialorder %v1395_v17, 0.0  ;;  %v1709_v61 = vmul.f32 0.1, %v1395_v17  ;;  %v2096_v51 = vld [vmem:[#allocation2 + $0x1c1] sm:$0xff] }
 0x204   : > { %v1399_v38 = vpop.f32.mrf.mxu0  ;;  %7310 = vmatmul.mubr.bf16.gmra.mxu0 %v8474_v58  ;;  %v2191_v11 = vmax.f32 %v8427_v18, %v2096_v51 }
 0x205   : > { %9868 = vst [vmem:[#allocation22_spill] sm:$0xff] %v8476_v10  ;;  %v2569_v29 = vmax.f32 %v2189_v25, %v2474_v27  ;;  %v8480_v0 = vsel %vm1610_vm13, %v1395_v17, %v1709_v61  ;;  %v1400_v60 = vadd.f32 %v8179_v35, %v1399_v38  ;;  %7313 = vmatprep.mubr.bf16.mxu0 %v8476_v10  ;;  %v2285_v32 = vld [vmem:[#allocation2 + $0x1d4] sm:$0xff] }
 0x206   : > { %v2380_v15 = vld [vmem:[#allocation2 + $0x1d5] sm:$0xff]  ;;  %1907 = vst [vmem:[#allocation2 + $0x1e8] sm:$0xff] %v8480_v0  ;;  %v1401_v39 = vpop.f32.mrf.mxu0 }
 0x207   : > { %v8485_v57 = vpack.c.bf16 %v2569_v29, %v2568_v46  ;;  %v2475_v47 = vmax.f32 %v2285_v32, %v2380_v15  ;;  %vm1611_vm14 = vcmp.gt.f32.partialorder %v1400_v60, 0.0  ;;  %v1710_v23 = vmul.f32 0.1, %v1400_v60  ;;  %v2097_v15 = vld [vmem:[#allocation2 + $0x1c9] sm:$0xff] }
 0x208   : > { %v1402_v31 = vpop.f32.mrf.mxu0  ;;  %v2192_v18 = vmax.f32 %v8441_v28, %v2097_v15 }
 0x209   : > { %9869 = vst [vmem:[#allocation23_spill] sm:$0xff] %v8485_v57  ;;  %6998 = vmatmul.mubr.bf16.gmra.mxu1 %v8485_v57  ;;  %v2570_v17 = vmax.f32 %v2190_v26, %v2475_v47  ;;  %v8489_v22 = vsel %vm1611_vm14, %v1400_v60, %v1710_v23  ;;  %v1403_v25 = vadd.f32 %v8179_v35, %v1402_v31  ;;  %v2286_v27 = vld [vmem:[#allocation2 + $0x1dc] sm:$0xff] }
 0x20a   : > { %v2381_v61 = vld [vmem:[#allocation2 + $0x1dd] sm:$0xff]  ;;  %1908 = vst [vmem:[#allocation2 + $0x1f0] sm:$0xff] %v8489_v22  ;;  %v1404_v46 = vpop.f32.mrf.mxu0 }
 0x20b   : > { %v8493_v38 = vpack.c.bf16 %v2570_v17, %v2569_v29  ;;  %v2476_v4 = vmax.f32 %v2286_v27, %v2381_v61  ;;  %vm1612_vm15 = vcmp.gt.f32.partialorder %v1403_v25, 0.0  ;;  %v1711_v32 = vmul.f32 0.1, %v1403_v25  ;;  %v2098_v61 = vld [vmem:[#allocation2 + $0x1d1] sm:$0xff] }
 0x20c   : > { %v1407_v39 = vpop.f32.mrf.mxu0  ;;  %v2193_v28 = vmax.f32 %v8449_v37, %v2098_v61 }
 0x20d   : > { %9870 = vst [vmem:[#allocation24_spill] sm:$0xff] %v8493_v38  ;;  %7314 = vmatmul.mubr.bf16.gmra.mxu0 %v8493_v38  ;;  %v2571_v60 = vmax.f32 %v2191_v11, %v2476_v4  ;;  %v8497_v26 = vsel %vm1612_vm15, %v1403_v25, %v1711_v32  ;;  %v1408_v47 = vadd.f32 %v8179_v35, %v1407_v39  ;;  %v2287_v23 = vld [vmem:[#allocation2 + $0x1e4] sm:$0xff] }
 0x20e   : > { %v2382_v31 = vld [vmem:[#allocation2 + $0x1e5] sm:$0xff]  ;;  %1909 = vst [vmem:[#allocation2 + $0x1f8] sm:$0xff] %v8497_v26  ;;  %v1409_v29 = vpop.f32.mrf.mxu0 }
 0x20f   : > { %v8501_v46 = vpack.c.bf16 %v2571_v60, %v2570_v17  ;;  %v2477_v51 = vmax.f32 %v2287_v23, %v2382_v31  ;;  %vm1613_vm0 = vcmp.gt.f32.partialorder %v1408_v47, 0.0  ;;  %v1712_v27 = vmul.f32 0.1, %v1408_v47  ;;  %v2099_v31 = vld [vmem:[#allocation2 + $0x1d9] sm:$0xff] }
 0x210   : > { %v1410_v57 = vpop.f32.mrf.mxu0  ;;  %v2194_v37 = vmax.f32 %v8461_v13, %v2099_v31 }
 0x211   : > { %9871 = vst [vmem:[#allocation25_spill] sm:$0xff] %v8501_v46  ;;  %7001 = vmatprep.mubr.bf16.mxu1 %v8501_v46  ;;  %v2572_v25 = vmax.f32 %v2192_v18, %v2477_v51  ;;  %v8505_v11 = vsel %vm1613_vm0, %v1408_v47, %v1712_v27  ;;  %v1411_v4 = vadd.f32 %v8179_v35, %v1410_v57  ;;  %v2288_v32 = vld [vmem:[#allocation2 + $0x1ec] sm:$0xff] }
 0x212   : > { %v2383_v39 = vld [vmem:[#allocation2 + $0x1ed] sm:$0xff]  ;;  %1910 = vst [vmem:[#allocation2 + $0x200] sm:$0xff] %v8505_v11  ;;  %v1412_v17 = vpop.f32.mrf.mxu0 }
 0x213   : > { %v8509_v29 = vpack.c.bf16 %v2572_v25, %v2571_v60  ;;  %v2478_v15 = vmax.f32 %v2288_v32, %v2383_v39  ;;  %vm1614_vm1 = vcmp.gt.f32.partialorder %v1411_v4, 0.0  ;;  %v1713_v23 = vmul.f32 0.1, %v1411_v4  ;;  %v2100_v39 = vld [vmem:[#allocation2 + $0x1e1] sm:$0xff] }
 0x214   : > { %v1415_v40 = vpop.f32.mrf.mxu0  ;;  %v2195_v13 = vmax.f32 %v8470_v9, %v2100_v39 }
 0x215   : > { %9872 = vst [vmem:[#allocation26_spill] sm:$0xff] %v8509_v29  ;;  %7317 = vmatprep.mubr.bf16.mxu0 %v8509_v29  ;;  %v2573_v47 = vmax.f32 %v2193_v28, %v2478_v15  ;;  %v8513_v18 = vsel %vm1614_vm1, %v1411_v4, %v1713_v23  ;;  %v1416_v57 = vadd.f32 %v8179_v35, %v1415_v40  ;;  %v2289_v51 = vld [vmem:[#allocation2 + $0x1f4] sm:$0xff]  ;;  %v1950_v29 = vld [vmem:[#allocation2 + $0x28] sm:$0xff] }
 0x216   : > { %v2384_v27 = vld [vmem:[#allocation2 + $0x1f5] sm:$0xff]  ;;  %1911 = vst [vmem:[#allocation2 + $0x208] sm:$0xff] %v8513_v18  ;;  %v1417_v60 = vpop.f32.mrf.mxu0 }
 0x217   : > { %v8517_v17 = vpack.c.bf16 %v2573_v47, %v2572_v25  ;;  %v2479_v61 = vmax.f32 %v2289_v51, %v2384_v27  ;;  %vm1615_vm2 = vcmp.gt.f32.partialorder %v1416_v57, 0.0  ;;  %v1714_v32 = vmul.f32 0.1, %v1416_v57  ;;  %v2101_v27 = vld [vmem:[#allocation2 + $0x1e9] sm:$0xff] }
 0x218   : > { %v1418_v46 = vpop.f32.mrf.mxu0  ;;  %v2196_v39 = vmax.f32 %v8480_v0, %v2101_v27 }
 0x219   : > { %9873 = vst [vmem:[#allocation27_spill] sm:$0xff] %v8517_v17  ;;  %7002 = vmatmul.mubr.bf16.gmra.mxu1 %v8517_v17  ;;  %v2574_v4 = vmax.f32 %v2194_v37, %v2479_v61  ;;  %v8521_v28 = vsel %vm1615_vm2, %v1416_v57, %v1714_v32  ;;  %v1419_v40 = vadd.f32 %v8179_v35, %v1418_v46  ;;  %v2290_v15 = vld [vmem:[#allocation2 + $0x1fc] sm:$0xff] }
 0x21a   : > { %v2385_v23 = vld [vmem:[#allocation2 + $0x1fd] sm:$0xff]  ;;  %1912 = vst [vmem:[#allocation2 + $0x210] sm:$0xff] %v8521_v28  ;;  %v1420_v25 = vpop.f32.mrf.mxu0 }
 0x21b   : > { %v8525_v60 = vpack.c.bf16 %v2574_v4, %v2573_v47  ;;  %v2480_v31 = vmax.f32 %v2290_v15, %v2385_v23  ;;  %vm1616_vm3 = vcmp.gt.f32.partialorder %v1419_v40, 0.0  ;;  %v1715_v51 = vmul.f32 0.1, %v1419_v40  ;;  %v8534_v35 = vld [vmem:[%s9791_s2] ss:$0 sm:$0xff]  ;;  %v2102_v23 = vld [vmem:[#allocation2 + $0x1f1] sm:$0xff] }
 0x21c   : > { %v1423_v8 = vpop.f32.mrf.mxu0  ;;  %v2197_v0 = vmax.f32 %v8489_v22, %v2102_v23 }
 0x21d   : > { %9874 = vst [vmem:[#allocation28_spill] sm:$0xff] %v8525_v60  ;;  %7318 = vmatmul.mubr.bf16.gmra.mxu0 %v8525_v60  ;;  %v2575_v57 = vmax.f32 %v2195_v13, %v2480_v31  ;;  %v8529_v37 = vsel %vm1616_vm3, %v1419_v40, %v1715_v51  ;;  %v1424_v46 = vadd.f32 %v8534_v35, %v1423_v8  ;;  %v2291_v47 = vld [vmem:[#allocation2 + $0x204] sm:$0xff] }
 0x21e   : > { %v2386_v61 = vld [vmem:[#allocation2 + $0x205] sm:$0xff]  ;;  %1913 = vst [vmem:[#allocation2 + $0x218] sm:$0xff] %v8529_v37  ;;  %v1425_v9 = vpop.f32.mrf.mxu0 }
 0x21f   : > { %v8538_v32 = vpack.c.bf16 %v2575_v57, %v2574_v4  ;;  %v2481_v15 = vmax.f32 %v2291_v47, %v2386_v61  ;;  %vm1617_vm4 = vcmp.gt.f32.partialorder %v1424_v46, 0.0  ;;  %v1716_v40 = vmul.f32 0.1, %v1424_v46  ;;  %v2103_v61 = vld [vmem:[#allocation2 + $0x1f9] sm:$0xff] }
 0x220   : > { %v1426_v25 = vpop.f32.mrf.mxu0  ;;  %v2198_v22 = vmax.f32 %v8497_v26, %v2103_v61 }
 0x221   : > { %9875 = vst [vmem:[#allocation29_spill] sm:$0xff] %v8538_v32  ;;  %7005 = vmatprep.mubr.bf16.mxu1 %v8538_v32  ;;  %v2576_v13 = vmax.f32 %v2196_v39, %v2481_v15  ;;  %v8542_v31 = vsel %vm1617_vm4, %v1424_v46, %v1716_v40  ;;  %v1427_v8 = vadd.f32 %v8534_v35, %v1426_v25  ;;  %v2292_v51 = vld [vmem:[#allocation2 + $0x20c] sm:$0xff] }
 0x222   : > { %v2387_v17 = vld [vmem:[#allocation2 + $0x20d] sm:$0xff]  ;;  %1914 = vst [vmem:[#allocation2 + $0x220] sm:$0xff] %v8542_v31  ;;  %v1428_v4 = vpop.f32.mrf.mxu0 }
 0x223   : > { %v8546_v9 = vpack.c.bf16 %v2576_v13, %v2575_v57  ;;  %v2482_v27 = vmax.f32 %v2292_v51, %v2387_v17  ;;  %vm1618_vm5 = vcmp.gt.f32.partialorder %v1427_v8, 0.0  ;;  %v1717_v47 = vmul.f32 0.1, %v1427_v8  ;;  %v2104_v51 = vld [vmem:[#allocation2 + $0x201] sm:$0xff] }
 0x224   : > { %v1431_v56 = vpop.f32.mrf.mxu0  ;;  %v2199_v26 = vmax.f32 %v8505_v11, %v2104_v51 }
 0x225   : > { %9876 = vst [vmem:[#allocation30_spill] sm:$0xff] %v8546_v9  ;;  %7321 = vmatprep.mubr.bf16.mxu0 %v8546_v9  ;;  %v2577_v46 = vmax.f32 %v2197_v0, %v2482_v27  ;;  %v8550_v39 = vsel %vm1618_vm5, %v1427_v8, %v1717_v47  ;;  %v1432_v15 = vadd.f32 %v8534_v35, %v1431_v56  ;;  %v2293_v40 = vld [vmem:[#allocation2 + $0x214] sm:$0xff] }
 0x226   : > { %v2388_v25 = vld [vmem:[#allocation2 + $0x215] sm:$0xff]  ;;  %1915 = vst [vmem:[#allocation2 + $0x228] sm:$0xff] %v8550_v39  ;;  %v1433_v57 = vpop.f32.mrf.mxu0 }
 0x227   : > { %v8554_v4 = vpack.c.bf16 %v2577_v46, %v2576_v13  ;;  %v2483_v17 = vmax.f32 %v2293_v40, %v2388_v25  ;;  %vm1619_vm6 = vcmp.gt.f32.partialorder %v1432_v15, 0.0  ;;  %v1718_v23 = vmul.f32 0.1, %v1432_v15  ;;  %v2105_v25 = vld [vmem:[#allocation2 + $0x209] sm:$0xff] }
 0x228   : > { %v1434_v32 = vpop.f32.mrf.mxu0  ;;  %v2200_v11 = vmax.f32 %v8513_v18, %v2105_v25 }
 0x229   : > { %9877 = vst [vmem:[#allocation31_spill] sm:$0xff] %v8554_v4  ;;  %7006 = vmatmul.mubr.bf16.gmra.mxu1 %v8554_v4  ;;  %v2578_v8 = vmax.f32 %v2198_v22, %v2483_v17  ;;  %v8558_v0 = vsel %vm1619_vm6, %v1432_v15, %v1718_v23  ;;  %v1435_v56 = vadd.f32 %v8534_v35, %v1434_v32  ;;  %v2294_v27 = vld [vmem:[#allocation2 + $0x21c] sm:$0xff] }
 0x22a   : > { %v2389_v47 = vld [vmem:[#allocation2 + $0x21d] sm:$0xff]  ;;  %1916 = vst [vmem:[#allocation2 + $0x230] sm:$0xff] %v8558_v0  ;;  %v1436_v13 = vpop.f32.mrf.mxu0 }
 0x22b   : > { %v8562_v57 = vpack.c.bf16 %v2578_v8, %v2577_v46  ;;  %v2484_v61 = vmax.f32 %v2294_v27, %v2389_v47  ;;  %vm1620_vm7 = vcmp.gt.f32.partialorder %v1435_v56, 0.0  ;;  %v1719_v40 = vmul.f32 0.1, %v1435_v56  ;;  %v2106_v47 = vld [vmem:[#allocation2 + $0x211] sm:$0xff] }
 0x22c   : > { %v1439_v21 = vpop.f32.mrf.mxu0  ;;  %v2201_v18 = vmax.f32 %v8521_v28, %v2106_v47 }
 0x22d   : > { %9878 = vst [vmem:[#allocation32_spill] sm:$0xff] %v8562_v57  ;;  %7322 = vmatmul.mubr.bf16.gmra.mxu0 %v8562_v57  ;;  %v2579_v15 = vmax.f32 %v2199_v26, %v2484_v61  ;;  %v8566_v22 = vsel %vm1620_vm7, %v1435_v56, %v1719_v40  ;;  %v1440_v32 = vadd.f32 %v8534_v35, %v1439_v21  ;;  %v2295_v17 = vld [vmem:[#allocation2 + $0x224] sm:$0xff]  ;;  %v8647_v57 = vld [vmem:[#allocation2 + $0x10] sm:$0xff] }
 0x22e   : > { %v2390_v23 = vld [vmem:[#allocation2 + $0x225] sm:$0xff]  ;;  %1917 = vst [vmem:[#allocation2 + $0x238] sm:$0xff] %v8566_v22  ;;  %v1441_v46 = vpop.f32.mrf.mxu0 }
 0x22f   : > { %v8570_v13 = vpack.c.bf16 %v2579_v15, %v2578_v8  ;;  %v2485_v51 = vmax.f32 %v2295_v17, %v2390_v23  ;;  %vm1621_vm8 = vcmp.gt.f32.partialorder %v1440_v32, 0.0  ;;  %v1720_v27 = vmul.f32 0.1, %v1440_v32  ;;  %v2107_v23 = vld [vmem:[#allocation2 + $0x219] sm:$0xff] }
 0x230   : > { %v1442_v4 = vpop.f32.mrf.mxu0  ;;  %v2202_v47 = vmax.f32 %v8529_v37, %v2107_v23 }
 0x231   : > { %9879 = vst [vmem:[#allocation33_spill] sm:$0xff] %v8570_v13  ;;  %7009 = vmatprep.mubr.bf16.mxu1 %v8570_v13  ;;  %v2580_v56 = vmax.f32 %v2200_v11, %v2485_v51  ;;  %v8574_v26 = vsel %vm1621_vm8, %v1440_v32, %v1720_v27  ;;  %v1443_v21 = vadd.f32 %v8534_v35, %v1442_v4  ;;  %v2296_v61 = vld [vmem:[#allocation2 + $0x22c] sm:$0xff] }
 0x232   : > { %v2391_v40 = vld [vmem:[#allocation2 + $0x22d] sm:$0xff]  ;;  %1918 = vst [vmem:[#allocation2 + $0x240] sm:$0xff] %v8574_v26  ;;  %v1444_v8 = vpop.f32.mrf.mxu0 }
 0x233   : > { %v8578_v46 = vpack.c.bf16 %v2580_v56, %v2579_v15  ;;  %v2486_v25 = vmax.f32 %v2296_v61, %v2391_v40  ;;  %vm1622_vm9 = vcmp.gt.f32.partialorder %v1443_v21, 0.0  ;;  %v1721_v17 = vmul.f32 0.1, %v1443_v21  ;;  %v8587_v8 = vpop.f32.mrf.mxu1 }
 0x234   : > { %v1447_v43 = vpop.f32.mrf.mxu0  ;;  %9882 = vst [vmem:[#allocation36_spill] sm:$0xff] %v8587_v8 }
 0x235   : > { %9880 = vst [vmem:[#allocation34_spill] sm:$0xff] %v8578_v46  ;;  %7325 = vmatprep.mubr.bf16.mxu0 %v8578_v46  ;;  %v8582_v32 = vmax.f32 %v2201_v18, %v2486_v25  ;;  %v8584_v11 = vsel %vm1622_vm9, %v1443_v21, %v1721_v17  ;;  %v1448_v4 = vadd.f32 %v8534_v35, %v1447_v43  ;;  %v2297_v51 = vld [vmem:[#allocation2 + $0x234] sm:$0xff]  ;;  %v2108_v18 = vld [vmem:[#allocation2 + $0x221] sm:$0xff] }
 0x236   : > { %v2392_v27 = vld [vmem:[#allocation2 + $0x235] sm:$0xff]  ;;  %1919 = vst [vmem:[#allocation2 + $0x248] sm:$0xff] %v8584_v11  ;;  %v1449_v28 = vpop.f32.mrf.mxu0  ;;  %v2203_v23 = vmax.f32 %v8542_v31, %v2108_v18 }
 0x237   : > { %9881 = vst [vmem:[#allocation35_spill] sm:$0xff] %v8582_v32  ;;  %v8591_v15 = vpack.c.bf16 %v8582_v32, %v2580_v56  ;;  %v2487_v61 = vmax.f32 %v2297_v51, %v2392_v27  ;;  %vm1623_vm10 = vcmp.gt.f32.partialorder %v1448_v4, 0.0  ;;  %v1722_v40 = vmul.f32 0.1, %v1448_v4  ;;  %v8598_v28 = vpop.f32.mrf.mxu1  ;;  %v2110_v45 = vld [vmem:[#allocation2 + $0x231] sm:$0xff] }
 0x238   : > { %v1450_v21 = vpop.f32.mrf.mxu0  ;;  %9884 = vst [vmem:[#allocation38_spill] sm:$0xff] %v8598_v28 }
 0x239   : > { %9883 = vst [vmem:[#allocation37_spill] sm:$0xff] %v8591_v15  ;;  %7010 = vmatmul.mubr.bf16.gmra.mxu1 %v8591_v15  ;;  %v2582_v43 = vmax.f32 %v2202_v47, %v2487_v61  ;;  %v8595_v25 = vsel %vm1623_vm10, %v1448_v4, %v1722_v40  ;;  %v1451_v17 = vadd.f32 %v8534_v35, %v1450_v21  ;;  %v2298_v13 = vld [vmem:[#allocation2 + $0x23c] sm:$0xff]  ;;  %v2109_v47 = vld [vmem:[#allocation2 + $0x229] sm:$0xff] }
 0x23a   : > { %v2393_v8 = vld [vmem:[#allocation2 + $0x23d] sm:$0xff]  ;;  %1920 = vst [vmem:[#allocation2 + $0x250] sm:$0xff] %v8595_v25  ;;  %v1452_v56 = vpop.f32.mrf.mxu0 }
 0x23b   : > { %v8602_v37 = vpack.c.bf16 %v2582_v43, %v8582_v32  ;;  %v2488_v51 = vmax.f32 %v2298_v13, %v2393_v8  ;;  %vm1624_vm11 = vcmp.gt.f32.partialorder %v1451_v17, 0.0  ;;  %v1723_v27 = vmul.f32 0.1, %v1451_v17  ;;  %v8609_v56 = vpop.f32.mrf.mxu1  ;;  %v8642_v32 = vld [vmem:[#allocation2 + $0x11] sm:$0xff] }
 0x23c   : > { %v1455_v4 = vpop.f32.mrf.mxu0  ;;  %9886 = vst [vmem:[#allocation40_spill] sm:$0xff] %v8609_v56  ;;  %v2204_v13 = vmax.f32 %v8550_v39, %v2109_v47  ;;  %v2111_v47 = vld [vmem:[#allocation2 + $0x239] sm:$0xff] }
 0x23d   : > { %9885 = vst [vmem:[#allocation39_spill] sm:$0xff] %v8602_v37  ;;  %7326 = vmatmul.mubr.bf16.gmra.mxu0 %v8602_v37  ;;  %v2583_v61 = vmax.f32 %v2203_v23, %v2488_v51  ;;  %v8606_v40 = vsel %vm1624_vm11, %v1451_v17, %v1723_v27  ;;  %v1456_v21 = vadd.f32 %v8534_v35, %v1455_v4  ;;  %v2299_v15 = vld [vmem:[#allocation2 + $0x244] sm:$0xff]  ;;  %v8619_v20 = vpop.f32.mrf.mxu1 }
 0x23e   : > { %v2394_v28 = vld [vmem:[#allocation2 + $0x245] sm:$0xff]  ;;  %1921 = vst [vmem:[#allocation2 + $0x258] sm:$0xff] %v8606_v40  ;;  %v1457_v62 = vpop.f32.mrf.mxu0  ;;  %9888 = vst [vmem:[#allocation42_spill] sm:$0xff] %v8619_v20 }
 0x23f   : > { %v8612_v31 = vpack.c.bf16 %v2583_v61, %v2582_v43  ;;  %v2489_v8 = vmax.f32 %v2299_v15, %v2394_v28  ;;  %vm1625_vm12 = vcmp.gt.f32.partialorder %v1456_v21, 0.0  ;;  %v1724_v18 = vmul.f32 0.1, %v1456_v21 }
 0x240   : > { %v1458_v23 = vpop.f32.mrf.mxu0  ;;  %v2205_v15 = vmax.f32 %v8558_v0, %v2110_v45  ;;  %v2206_v45 = vmax.f32 %v8566_v22, %v2111_v47  ;;  %v2230_v47 = vld [vmem:[#allocation2 + $0x1c] sm:$0xff] }
 0x241   : > { %9887 = vst [vmem:[#allocation41_spill] sm:$0xff] %v8612_v31  ;;  %7013 = vmatprep.mubr.bf16.mxu1 %v8612_v31  ;;  %v2584_v17 = vmax.f32 %v2204_v13, %v2489_v8  ;;  %v8616_v51 = vsel %vm1625_vm12, %v1456_v21, %v1724_v18  ;;  %v1459_v27 = vadd.f32 %v8534_v35, %v1458_v23  ;;  %v2300_v4 = vld [vmem:[#allocation2 + $0x24c] sm:$0xff]  ;;  %v6959_v13 = vpop.f32.mrf.mxu1 }
 0x242   : > { %v2395_v56 = vld [vmem:[#allocation2 + $0x24d] sm:$0xff]  ;;  %1922 = vst [vmem:[#allocation2 + $0x260] sm:$0xff] %v8616_v51  ;;  %v1460_v62 = vpop.f32.mrf.mxu0 }
 0x243   : > { %v8622_v39 = vpack.c.bf16 %v2584_v17, %v2583_v61  ;;  %v2490_v43 = vmax.f32 %v2300_v4, %v2395_v56  ;;  %vm1626_vm13 = vcmp.gt.f32.partialorder %v1459_v27, 0.0  ;;  %v1725_v28 = vmul.f32 0.1, %v1459_v27  ;;  %v2112_v4 = vld [vmem:[#allocation2 + $0x241] sm:$0xff]  ;;  %v2978_v13 = vpop.f32.mrf.mxu1 }
 0x244   : > { %v1463_v21 = vpop.f32.mrf.mxu0  ;;  %v2325_v13 = vld [vmem:[#allocation2 + $0x1d] sm:$0xff] }
 0x245   : > { %9889 = vst [vmem:[#allocation43_spill] sm:$0xff] %v8622_v39  ;;  %7329 = vmatprep.mubr.bf16.mxu0 %v8622_v39  ;;  %v2585_v8 = vmax.f32 %v2205_v15, %v2490_v43  ;;  %v8626_v18 = vsel %vm1626_vm13, %v1459_v27, %v1725_v28  ;;  %v1464_v23 = vadd.f32 %v8534_v35, %v1463_v21  ;;  %v2301_v31 = vld [vmem:[#allocation2 + $0x254] sm:$0xff]  ;;  %v2231_v15 = vld [vmem:[#allocation2 + $0x24] sm:$0xff]  ;;  %v8638_v37 = vpop.f32.mrf.mxu1 }
 0x246   : > { %v2396_v20 = vld [vmem:[#allocation2 + $0x255] sm:$0xff]  ;;  %1923 = vst [vmem:[#allocation2 + $0x268] sm:$0xff] %v8626_v18  ;;  %v1465_v61 = vpop.f32.mrf.mxu0  ;;  %v2326_v43 = vld [vmem:[#allocation2 + $0x25] sm:$0xff]  ;;  %9892 = vst [vmem:[#allocation46_spill] sm:$0xff] %v8638_v37 }
 0x247   : > { %v8630_v62 = vpack.c.bf16 %v2585_v8, %v2584_v17  ;;  %v2491_v0 = vmax.f32 %v2301_v31, %v2396_v20  ;;  %vm1627_vm14 = vcmp.gt.f32.partialorder %v1464_v23, 0.0  ;;  %v1726_v56 = vmul.f32 0.1, %v1464_v23  ;;  %v2041_v31 = vld [vmem:[#allocation2 + $0x9] sm:$0xff] }
 0x248   : > { %v1466_v30 = vpop.f32.mrf.mxu0  ;;  %v2207_v20 = vmax.f32 %v8574_v26, %v2112_v4 }
 0x249   : > { %9890 = vst [vmem:[#allocation44_spill] sm:$0xff] %v8630_v62  ;;  %7014 = vmatmul.mubr.bf16.gmra.mxu1 %v8630_v62  ;;  %v2586_v27 = vmax.f32 %v2206_v45, %v2491_v0  ;;  %v1825_v28 = vsel %vm1627_vm14, %v1464_v23, %v1726_v56  ;;  %v1467_v21 = vadd.f32 %v8534_v35, %v1466_v30  ;;  %v2302_v53 = vld [vmem:[#allocation2 + $0x25c] sm:$0xff]  ;;  %v2113_v45 = vld [vmem:[#allocation2 + $0x249] sm:$0xff] }
 0x24a   : > { %v2397_v61 = vld [vmem:[#allocation2 + $0x25d] sm:$0xff]  ;;  %1924 = vst [vmem:[#allocation2 + $0x270] sm:$0xff] %v1825_v28  ;;  %v1468_v17 = vpop.f32.mrf.mxu0  ;;  %v2421_v0 = vmax.f32 %v2231_v15, %v2326_v43  ;;  %v1946_v56 = vld [vmem:[#allocation2 + $0x8] sm:$0xff]  ;;  %v2208_v43 = vmax.f32 %v8584_v11, %v2113_v45  ;;  %v2137_v11 = vmax.f32 %v8647_v57, %v8642_v32 }
 0x24b   : > { %v8635_v39 = vpack.c.bf16 %v2586_v27, %v2585_v8  ;;  %v2492_v22 = vmax.f32 %v2302_v53, %v2397_v61  ;;  %vm1628_vm15 = vcmp.gt.f32.partialorder %v1467_v21, 0.0  ;;  %v1727_v62 = vmul.f32 0.1, %v1467_v21  ;;  %v2040_v28 = vld [vmem:[#allocation2 + $0x1] sm:$0xff] }
 0x24c   : > { %v1471_v23 = vpop.f32.mrf.mxu0  ;;  %v2136_v4 = vmax.f32 %v1946_v56, %v2041_v31  ;;  %v2420_v61 = vmax.f32 %v2230_v47, %v2325_v13  ;;  %v2043_v31 = vld [vmem:[#allocation2 + $0x19] sm:$0xff]  ;;  %v2114_v47 = vld [vmem:[#allocation2 + $0x251] sm:$0xff]  ;;  %v2981_v13 = vpop.f32.mrf.mxu1  ;;  %v2235_v45 = vld [vmem:[#allocation2 + $0x44] sm:$0xff] }
 0x24d   : > { %9891 = vst [vmem:[#allocation45_spill] sm:$0xff] %v8635_v39  ;;  %7330 = vmatmul.mubr.bf16.gmra.mxu0 %v8635_v39  ;;  %v2587_v30 = vmax.f32 %v2207_v20, %v2492_v22  ;;  %v1826_v8 = vsel %vm1628_vm15, %v1467_v21, %v1727_v62  ;;  %v1472_v17 = vadd.f32 %v8534_v35, %v1471_v23  ;;  %v2303_v26 = vld [vmem:[#allocation2 + $0x264] sm:$0xff]  ;;  %v2233_v20 = vld [vmem:[#allocation2 + $0x34] sm:$0xff] }
 0x24e   : > { %v2398_v53 = vld [vmem:[#allocation2 + $0x265] sm:$0xff]  ;;  %1925 = vst [vmem:[#allocation2 + $0x278] sm:$0xff] %v1826_v8  ;;  %v1473_v46 = vpop.f32.mrf.mxu0  ;;  %v2328_v22 = vld [vmem:[#allocation2 + $0x35] sm:$0xff]  ;;  %v2516_v23 = vmax.f32 %v2136_v4, %v2421_v0  ;;  %v8655_v13 = vpop.f32.mrf.mxu1  ;;  %v2209_v32 = vmax.f32 %v8595_v25, %v2114_v47 }
 0x24f   : > { %v8644_v15 = vpack.c.bf16 %v2587_v30, %v2586_v27  ;;  %v2493_v37 = vmax.f32 %v2303_v26, %v2398_v53  ;;  %v1945_v39 = vld [vmem:[#allocation2] sm:$0xff]  ;;  %vm1629_vm0 = vcmp.gt.f32.partialorder %v1472_v17, 0.0  ;;  %v1728_v62 = vmul.f32 0.1, %v1472_v17  ;;  %v2232_v27 = vld [vmem:[#allocation2 + $0x2c] sm:$0xff]  ;;  %9894 = vst [vmem:[#allocation48_spill] sm:$0xff] %v8655_v13 }
 0x250   : > { %v2135_v21 = vmax.f32 %v1945_v39, %v2040_v28  ;;  %v1474_v56 = vpop.f32.mrf.mxu0  ;;  %v2330_v8 = vld [vmem:[#allocation2 + $0x45] sm:$0xff]  ;;  %v2327_v28 = vld [vmem:[#allocation2 + $0x2d] sm:$0xff]  ;;  %v2423_v53 = vmax.f32 %v2233_v20, %v2328_v22  ;;  %v8667_v10 = vpop.f32.mrf.mxu1 }
 0x251   : > { %9893 = vst [vmem:[#allocation47_spill] sm:$0xff] %v8644_v15  ;;  %7017 = vmatprep.mubr.bf16.mxu1 %v8644_v15  ;;  %v8650_v46 = vmax.f32 %v2208_v43, %v2493_v37  ;;  %v1827_v26 = vsel %vm1629_vm0, %v1472_v17, %v1728_v62  ;;  %v1475_v39 = vadd.f32 %v8534_v35, %v1474_v56  ;;  %v2304_v4 = vld [vmem:[#allocation2 + $0x26c] sm:$0xff]  ;;  %v2234_v62 = vld [vmem:[#allocation2 + $0x3c] sm:$0xff] }
 0x252   : > { %v2515_v0 = vmax.f32 %v2135_v21, %v2420_v61  ;;  %v2399_v9 = vld [vmem:[#allocation2 + $0x26d] sm:$0xff]  ;;  %1926 = vst [vmem:[#allocation2 + $0x280] sm:$0xff] %v1827_v26  ;;  %v1476_v15 = vpop.f32.mrf.mxu0  ;;  %v2329_v61 = vld [vmem:[#allocation2 + $0x3d] sm:$0xff]  ;;  %v2425_v13 = vmax.f32 %v2235_v45, %v2330_v8  ;;  %v2422_v60 = vmax.f32 %v2232_v27, %v2327_v28 }
 0x253   : > { %v2862_v37 = vpack.c.bf16 %v8650_v46, %v8650_v46  ;;  %v8660_v57 = vpack.c.bf16 %v8650_v46, %v2587_v30  ;;  %v2494_v17 = vmax.f32 %v2304_v4, %v2399_v9  ;;  %v2045_v43 = vld [vmem:[#allocation2 + $0x29] sm:$0xff]  ;;  %vm1630_vm1 = vcmp.gt.f32.partialorder %v1475_v39, 0.0  ;;  %v1948_v21 = vld [vmem:[#allocation2 + $0x18] sm:$0xff]  ;;  %v2044_v25 = vld [vmem:[#allocation2 + $0x21] sm:$0xff] }
 0x254   : > { %v1729_v20 = vmul.f32 0.1, %v1475_v39  ;;  %v2772_v22 = vpack.c.bf16 %v2516_v23, %v2515_v0  ;;  %v2115_v56 = vld [vmem:[#allocation2 + $0x259] sm:$0xff]  ;;  %v1479_v26 = vpop.f32.mrf.mxu0  ;;  %v2138_v15 = vmax.f32 %v1948_v21, %v2043_v31  ;;  %v2140_v23 = vmax.f32 %v1950_v29, %v2045_v43 }
 0x255   : > { %7018 = vmatmul.mubr.bf16.gmra.mxu1 %v2862_v37  ;;  %7333 = vmatprep.mubr.bf16.mxu0 %v8660_v57  ;;  %v8664_v30 = vmax.f32 %v2209_v32, %v2494_v17  ;;  %v1480_v47 = vadd.f32 %v8534_v35, %v1479_v26  ;;  %v2305_v4 = vld [vmem:[#allocation2 + $0x274] sm:$0xff]  ;;  %v2424_v0 = vmax.f32 %v2234_v62, %v2329_v61  ;;  %v1949_v28 = vld [vmem:[#allocation2 + $0x20] sm:$0xff]  ;;  %v2236_v62 = vld [vmem:[#allocation2 + $0x4c] sm:$0xff]  ;;  %v6964_v26 = vpop.f32.mrf.mxu1 }
 0x256   : > { %v1828_v9 = vsel %vm1630_vm1, %v1475_v39, %v1729_v20  ;;  %7037 = vmatprep.mubr.bf16.mxu1 %v2772_v22  ;;  %v2400_v38 = vld [vmem:[#allocation2 + $0x275] sm:$0xff]  ;;  %v1481_v45 = vpop.f32.mrf.mxu0  ;;  %v2518_v8 = vmax.f32 %v2138_v15, %v2423_v53  ;;  %v2210_v31 = vmax.f32 %v8606_v40, %v2115_v56  ;;  %v2139_v32 = vmax.f32 %v1949_v28, %v2044_v25  ;;  %v2116_v20 = vld [vmem:[#allocation2 + $0x261] sm:$0xff]  ;;  %v2331_v40 = vld [vmem:[#allocation2 + $0x4d] sm:$0xff] }
 0x257   : > { %1927 = vst [vmem:[#allocation2 + $0x288] sm:$0xff] %v1828_v9  ;;  %v2495_v27 = vmax.f32 %v2305_v4, %v2400_v38  ;;  %vm1631_vm2 = vcmp.gt.f32.partialorder %v1480_v47, 0.0  ;;  %v1730_v39 = vmul.f32 0.1, %v1480_v47  ;;  %v2520_v17 = vmax.f32 %v2140_v23, %v2425_v13  ;;  %v7606_v25 = vld [vmem:[%s9792_s3 + $0xb0] sm:$0xff]   ;;  %v7664_v28 = vld [vmem:[%s9792_s3 + $0xb8] sm:$0xff]  }
 0x258   : > { %v1482_v22 = vpop.f32.mrf.mxu0  ;;  %v2517_v29 = vmax.f32 %v2137_v11, %v2422_v60  ;;  %v2519_v21 = vmax.f32 %v2139_v32, %v2424_v0  ;;  %v2211_v60 = vmax.f32 %v8616_v51, %v2116_v20  ;;  %v2046_v23 = vld [vmem:[#allocation2 + $0x31] sm:$0xff]  ;;  %v2117_v0 = vld [vmem:[#allocation2 + $0x269] sm:$0xff]  ;;  %v8690_v20 = vpop.f32.mrf.mxu1 }
 0x259   : > { %v8672_v43 = vmax.f32 %v2210_v31, %v2495_v27  ;;  %v1829_v61 = vsel %vm1631_vm2, %v1480_v47, %v1730_v39  ;;  %v1483_v53 = vadd.f32 %v8534_v35, %v1482_v22  ;;  %v2306_v38 = vld [vmem:[#allocation2 + $0x27c] sm:$0xff]  ;;  %v1951_v39 = vld [vmem:[#allocation2 + $0x30] sm:$0xff] }
 0x25a   : > { %v2401_v56 = vld [vmem:[#allocation2 + $0x27d] sm:$0xff]  ;;  %1928 = vst [vmem:[#allocation2 + $0x290] sm:$0xff] %v1829_v61  ;;  %v1484_v15 = vpop.f32.mrf.mxu0  ;;  %v2773_v9 = vpack.c.bf16 %v2518_v8, %v2517_v29  ;;  %v2774_v4 = vpack.c.bf16 %v2520_v17, %v2519_v21  ;;  %v2426_v8 = vmax.f32 %v2236_v62, %v2331_v40  ;;  %v2141_v29 = vmax.f32 %v1951_v39, %v2046_v23 }
 0x25b   : > { %9895 = vst [vmem:[#allocation49_spill] sm:$0xff] %v8672_v43  ;;  %v8677_v13 = vpack.c.bf16 %v8672_v43, %v8664_v30  ;;  %v2496_v11 = vmax.f32 %v2306_v38, %v2401_v56  ;;  %vm1632_vm3 = vcmp.gt.f32.partialorder %v1483_v53, 0.0  ;;  %v1731_v47 = vmul.f32 0.1, %v1483_v53  ;;  %v8698_v38 = vpop.f32.mrf.mxu1 }
 0x25c   : > { %v1487_v45 = vpop.f32.mrf.mxu0  ;;  %v2212_v62 = vmax.f32 %v8626_v18, %v2117_v0  ;;  %v2521_v26 = vmax.f32 %v2141_v29, %v2426_v8  ;;  %v9898_v8 = vpack.c.bf16 %v7992_v19, %v7979_v3  ;;  %v7610_v19 = vld [vmem:[%s9792_s3 + $0x90] sm:$0xff]  }
 0x25d   : > { %7038 = vmatmul.mubr.bf16.vlgmr.msra.gmra.mxu1 %v2773_v9  ;;  %7334 = vmatmul.mubr.bf16.gmra.mxu0 %v8677_v13  ;;  %v8684_v31 = vmax.f32 %v2211_v60, %v2496_v11  ;;  %v1830_v27 = vsel %vm1632_vm3, %v1483_v53, %v1731_v47  ;;  %v1488_v51 = vadd.f32 %v8534_v35, %v1487_v45  ;;  %v7607_v53 = vld [vmem:[%s9792_s3 + $0xa8] sm:$0xff]   ;;  %v3010_v0 = vpop.f32.mrf.mxu1 }
 0x25e   : > { %7106 = vmatpush3.bf16.msra.mxu1 %v7664_v28  ;;  %7041 = vmatprep.mubr.bf16.mxu1 %v2774_v4  ;;  %v2307_v32 = vld [vmem:[#allocation2 + $0x284] sm:$0xff]  ;;  %1929 = vst [vmem:[#allocation2 + $0x298] sm:$0xff] %v1830_v27  ;;  %v1489_v22 = vpop.f32.mrf.mxu0  ;;  %v2775_v11 = vpack.c.bf16 %v7977_v2, %v2521_v26  ;;  %v9900_v26 = vpack.c.bf16 %v8042_v16, %v8032_v63 }
 0x25f   : > { %9896 = vst [vmem:[#allocation50_spill] sm:$0xff] %v8684_v31  ;;  %v2402_v17 = vld [vmem:[#allocation2 + $0x285] sm:$0xff]  ;;  %7107 = vmatprep.subr.bf16.mxu1 %v7606_v25  ;;  %vm1633_vm4 = vcmp.gt.f32.partialorder %v1488_v51, 0.0  ;;  %v1732_v40 = vmul.f32 0.1, %v1488_v51  ;;  %v8722_v39 = vpop.f32.mrf.mxu1 }
 0x260   : > { %v2497_v61 = vmax.f32 %v2307_v32, %v2402_v17  ;;  %v1490_v56 = vpop.f32.mrf.mxu0  ;;  %v7608_v4 = vld [vmem:[%s9792_s3 + $0xa0] sm:$0xff]  }
 0x261   : > { %v1831_v9 = vsel %vm1633_vm4, %v1488_v51, %v1732_v40  ;;  %v1491_v18 = vadd.f32 %v8534_v35, %v1490_v56  ;;  %v7609_v51 = vld [vmem:[%s9792_s3 + $0x98] sm:$0xff]   ;;  %v7612_v16 = vld [vmem:[%s9792_s3 + $0x80] sm:$0xff]  }
 0x262   : > { %v8700_v15 = vmax.f32 %v2212_v62, %v2497_v61  ;;  %7108 = vmatpush3.bf16.msra.mxu1 %v7606_v25  ;;  %1930 = vst [vmem:[#allocation2 + $0x2a0] sm:$0xff] %v1831_v9  ;;  %v1492_v60 = vpop.f32.mrf.mxu0  ;;  %v3013_v62 = vpop.f32.mrf.mxu1 }
 0x263   : > { %7109 = vmatprep.subr.bf16.mxu1 %v7607_v53  ;;  %vm1634_vm5 = vcmp.gt.f32.partialorder %v1491_v18, 0.0  ;;  %v1733_v23 = vmul.f32 0.1, %v1491_v18  ;;  %v7611_v60 = vld [vmem:[%s9792_s3 + $0x88] sm:$0xff]  }
 0x264   : > { %9897 = vst [vmem:[#allocation51_spill] sm:$0xff] %v8700_v15  ;;  %v8706_v47 = vpack.c.bf16 %v8700_v15, %v8684_v31  ;;  %v1495_v45 = vpop.f32.mrf.mxu0  ;;  %v6971_v9 = vpop.f32.mrf.mxu1  ;;  %v9922_v15 = vld [vmem:[#allocation35_spill] sm:$0xff] }
 0x265   : > { %7042 = vmatmul.mubr.bf16.gmra.mxu1 %v2775_v11  ;;  %v8712_v25 = vsel %vm1634_vm5, %v1491_v18, %v1733_v23  ;;  %v1496_v2 = vadd.f32 %v8534_v35, %v1495_v45 }
 0x266   : > { %7337 = vmatprep.mubr.bf16.mxu0 %v8706_v47  ;;  %7045 = vmatprep.mubr.bf16.mxu1 %v9898_v8  ;;  %1931 = vst [vmem:[#allocation2 + $0x2a8] sm:$0xff] %v8712_v25  ;;  %v1497_v27 = vpop.f32.mrf.mxu0  ;;  %v8739_v23 = vpop.f32.mrf.mxu1 }
 0x267   : > { %7110 = vmatpush3.bf16.msra.mxu1 %v7607_v53  ;;  %vm1635_vm6 = vcmp.gt.f32.partialorder %v1496_v2, 0.0  ;;  %v1734_v28 = vmul.f32 0.1, %v1496_v2  ;;  %v9899_v53 = vpack.c.bf16 %v8021_v49, %v8005_v34 }
 0x268   : > { %7111 = vmatprep.subr.bf16.mxu1 %v7608_v4  ;;  %v1498_v32 = vpop.f32.mrf.mxu0  ;;  %v6972_v27 = vpop.f32.mrf.mxu1 }
 0x269   : > { %v1833_v17 = vsel %vm1635_vm6, %v1496_v2, %v1734_v28  ;;  %v1499_v22 = vadd.f32 %v8534_v35, %v1498_v32  ;;  %v8750_v28 = vld [vmem:[%s9792_s3 + $0xf8] sm:$0xff]  }
 0x26a   : > { %1932 = vst [vmem:[#allocation2 + $0x2b0] sm:$0xff] %v1833_v17  ;;  %v1500_v3 = vpop.f32.mrf.mxu0 }
 0x26b   : > { %7112 = vmatpush3.bf16.msra.mxu1 %v7608_v4  ;;  %vm1636_vm7 = vcmp.gt.f32.partialorder %v1499_v22, 0.0  ;;  %v1735_v29 = vmul.f32 0.1, %v1499_v22 }
 0x26c   : > { %7113 = vmatprep.subr.bf16.mxu1 %v7609_v51  ;;  %v1503_v61 = vpop.f32.mrf.mxu0 }
 0x26d   : > { %7046 = vmatmul.mubr.bf16.gmra.mxu1 %v9899_v53  ;;  %v1834_v40 = vsel %vm1636_vm7, %v1499_v22, %v1735_v29  ;;  %v1504_v56 = vadd.f32 %v8534_v35, %v1503_v61 }
 0x26e   : > { %7049 = vmatprep.mubr.bf16.mxu1 %v9900_v26  ;;  %1933 = vst [vmem:[#allocation2 + $0x2b8] sm:$0xff] %v1834_v40  ;;  %v1505_v18 = vpop.f32.mrf.mxu0 }
 0x26f   : > { %7114 = vmatpush3.bf16.msra.mxu1 %v7609_v51  ;;  %vm1637_vm8 = vcmp.gt.f32.partialorder %v1504_v56, 0.0  ;;  %v1736_v11 = vmul.f32 0.1, %v1504_v56 }
 0x270   : > { %7115 = vmatprep.subr.bf16.mxu1 %v7610_v19  ;;  %v1506_v34 = vpop.f32.mrf.mxu0 }
 0x271   : > { %v1835_v49 = vsel %vm1637_vm8, %v1504_v56, %v1736_v11  ;;  %v1507_v4 = vadd.f32 %v8534_v35, %v1506_v34 }
 0x272   : > { %1934 = vst [vmem:[#allocation2 + $0x2c0] sm:$0xff] %v1835_v49  ;;  %v1508_v63 = vpop.f32.mrf.mxu0 }
 0x273   : > { %7116 = vmatpush3.bf16.msra.mxu1 %v7610_v19  ;;  %vm1638_vm9 = vcmp.gt.f32.partialorder %v1507_v4, 0.0  ;;  %v1737_v0 = vmul.f32 0.1, %v1507_v4  ;;  %v8753_v19 = vpop.f32.mrf.mxu1 }
 0x274   : > { %7117 = vmatprep.subr.bf16.mxu1 %v7611_v60  ;;  %v1511_v45 = vpop.f32.mrf.mxu0 }
 0x275   : > { %7050 = vmatmul.mubr.bf16.gmra.mxu1 %v8068_v59  ;;  %v1836_v2 = vsel %vm1638_vm9, %v1507_v4, %v1737_v0  ;;  %v1512_v8 = vadd.f32 %v8534_v35, %v1511_v45  ;;  %v8756_v61 = vpop.f32.mrf.mxu1 }
 0x276   : > { %7053 = vmatprep.mubr.bf16.mxu1 %v8082_v33  ;;  %1935 = vst [vmem:[#allocation2 + $0x2c8] sm:$0xff] %v1836_v2  ;;  %v1513_v51 = vpop.f32.mrf.mxu0 }
 0x277   : > { %7118 = vmatpush3.bf16.msra.mxu1 %v7611_v60  ;;  %vm1639_vm10 = vcmp.gt.f32.partialorder %v1512_v8, 0.0  ;;  %v1738_v32 = vmul.f32 0.1, %v1512_v8  ;;  %v3042_v18 = vpop.f32.mrf.mxu1 }
 0x278   : > { %7119 = vmatprep.subr.bf16.mxu1 %v7612_v16  ;;  %v1514_v17 = vpop.f32.mrf.mxu0 }
 0x279   : > { %v1837_v22 = vsel %vm1639_vm10, %v1512_v8, %v1738_v32  ;;  %v1515_v3 = vadd.f32 %v8534_v35, %v1514_v17  ;;  %v8762_v63 = vpop.f32.mrf.mxu1 }
 0x27a   : > { %1936 = vst [vmem:[#allocation2 + $0x2d0] sm:$0xff] %v1837_v22  ;;  %v1516_v29 = vpop.f32.mrf.mxu0 }
 0x27b   : > { %7120 = vmatpush3.bf16.msra.mxu1 %v7612_v16  ;;  %vm1640_vm11 = vcmp.gt.f32.partialorder %v1515_v3, 0.0  ;;  %v1739_v62 = vmul.f32 0.1, %v1515_v3  ;;  %v8767_v27 = vpop.f32.mrf.mxu1 }
 0x27c   : > { %7189 = vmatprep.subr.bf16.mxu1 %v8750_v28  ;;  %v1519_v53 = vpop.f32.mrf.mxu0 }
 0x27d   : > { %7054 = vmatmul.mubr.bf16.gmra.mxu1 %v8099_v6  ;;  %v1838_v40 = vsel %vm1640_vm11, %v1515_v3, %v1739_v62  ;;  %v1520_v56 = vadd.f32 %v8534_v35, %v1519_v53  ;;  %v6979_v22 = vpop.f32.mrf.mxu1 }
 0x27e   : > { %7057 = vmatprep.mubr.bf16.mxu1 %v8113_v42  ;;  %1937 = vst [vmem:[#allocation2 + $0x2d8] sm:$0xff] %v1838_v40  ;;  %v1521_v26 = vpop.f32.mrf.mxu0 }
 0x27f   : > { %vm1641_vm12 = vcmp.gt.f32.partialorder %v1520_v56, 0.0  ;;  %v1740_v9 = vmul.f32 0.1, %v1520_v56 }
 0x280   : > { %v1522_v60 = vpop.f32.mrf.mxu0 }
 0x281   : > { %v1839_v11 = vsel %vm1641_vm12, %v1520_v56, %v1740_v9  ;;  %v1523_v34 = vadd.f32 %v8534_v35, %v1522_v60  ;;  %v8773_v56 = vpop.f32.mrf.mxu1 }
 0x282   : > { %1938 = vst [vmem:[#allocation2 + $0x2e0] sm:$0xff] %v1839_v11  ;;  %v1524_v49 = vpop.f32.mrf.mxu0  ;;  %9901 = vst [vmem:[#allocation52_spill] sm:$0xff] %v8773_v56 }
 0x283   : > { %vm1642_vm13 = vcmp.gt.f32.partialorder %v1523_v34, 0.0  ;;  %v1741_v4 = vmul.f32 0.1, %v1523_v34 }
 0x284   : > { %v1527_v16 = vpop.f32.mrf.mxu0 }
 0x285   : > { %7058 = vmatmul.mubr.bf16.gmra.mxu1 %v8133_v14  ;;  %v1840_v0 = vsel %vm1642_vm13, %v1523_v34, %v1741_v4  ;;  %v1528_v45 = vadd.f32 %v8534_v35, %v1527_v16  ;;  %v6980_v34 = vpop.f32.mrf.mxu1  ;;  %vm5544_vm13 = vcmask 130048  }
 0x286   : > { %7061 = vmatprep.mubr.bf16.mxu1 %v8150_v48  ;;  %1939 = vst [vmem:[#allocation2 + $0x2e8] sm:$0xff] %v1840_v0  ;;  %v1529_v2 = vpop.f32.mrf.mxu0  ;;  %v2118_v34 = vld [vmem:[#allocation2 + $0x271] sm:$0xff] }
 0x287   : > { %vm1643_vm14 = vcmp.gt.f32.partialorder %v1528_v45, 0.0  ;;  %v1742_v8 = vmul.f32 0.1, %v1528_v45  ;;  %v3061_v2 = vpop.f32.mrf.mxu1 }
 0x288   : > { %v1530_v51 = vpop.f32.mrf.mxu0  ;;  %v2119_v2 = vld [vmem:[#allocation2 + $0x279] sm:$0xff] }
 0x289   : > { %v1841_v32 = vsel %vm1643_vm14, %v1528_v45, %v1742_v8  ;;  %v1531_v17 = vadd.f32 %v8534_v35, %v1530_v51 }
 0x28a   : > { %1940 = vst [vmem:[#allocation2 + $0x2f0] sm:$0xff] %v1841_v32  ;;  %v1532_v3 = vpop.f32.mrf.mxu0  ;;  %v8779_v32 = vpop.f32.mrf.mxu1 }
 0x28b   : > { %vm1644_vm15 = vcmp.gt.f32.partialorder %v1531_v17, 0.0  ;;  %v1743_v29 = vmul.f32 0.1, %v1531_v17  ;;  %9902 = vst [vmem:[#allocation53_spill] sm:$0xff] %v8779_v32  ;;  %v2313_v32 = vld [vmem:[#allocation2 + $0x2b4] sm:$0xff] }
 0x28c   : > { %v1535_v62 = vpop.f32.mrf.mxu0 }
 0x28d   : > { %7062 = vmatmul.mubr.bf16.gmra.mxu1 %v8170_v36  ;;  %v1842_v53 = vsel %vm1644_vm15, %v1531_v17, %v1743_v29  ;;  %v1536_v40 = vadd.f32 %v8534_v35, %v1535_v62  ;;  %v8781_v29 = vpop.f32.mrf.mxu1 }
 0x28e   : > { %7065 = vmatprep.mubr.bf16.mxu1 %v8330_v24  ;;  %1941 = vst [vmem:[#allocation2 + $0x2f8] sm:$0xff] %v1842_v53  ;;  %v1537_v26 = vpop.f32.mrf.mxu0  ;;  %9903 = vst [vmem:[#allocation54_spill] sm:$0xff] %v8781_v29 }
 0x28f   : > { %vm1645_vm0 = vcmp.gt.f32.partialorder %v1536_v40, 0.0  ;;  %v1744_v9 = vmul.f32 0.1, %v1536_v40 }
 0x290   : > { %v1538_v18 = vpop.f32.mrf.mxu0 }
 0x291   : > { %v1843_v60 = vsel %vm1645_vm0, %v1536_v40, %v1744_v9  ;;  %v1539_v11 = vadd.f32 %v8534_v35, %v1538_v18 }
 0x292   : > { %1942 = vst [vmem:[#allocation2 + $0x300] sm:$0xff] %v1843_v60  ;;  %v1540_v49 = vpop.f32.mrf.mxu0 }
 0x293   : > { %vm1646_vm1 = vcmp.gt.f32.partialorder %v1539_v11, 0.0  ;;  %v1745_v4 = vmul.f32 0.1, %v1539_v11  ;;  %v2308_v49 = vld [vmem:[#allocation2 + $0x28c] sm:$0xff] }
 0x294   : > { %v1543_v16 = vpop.f32.mrf.mxu0 }
 0x295   : > { %7066 = vmatmul.mubr.bf16.gmra.mxu1 %v8351_v41  ;;  %v1844_v0 = vsel %vm1646_vm1, %v1539_v11, %v1745_v4  ;;  %v1544_v45 = vadd.f32 %v8534_v35, %v1543_v16  ;;  %v8785_v35 = vpop.f32.mrf.mxu1  ;;  %v2023_v11 = vld [vmem:[#allocation2 + $0x270] sm:$0xff] }
 0x296   : > { %7069 = vmatprep.mubr.bf16.mxu1 %v8358_v1  ;;  %1943 = vst [vmem:[#allocation2 + $0x308] sm:$0xff] %v1844_v0  ;;  %v1545_v8 = vpop.f32.mrf.mxu0  ;;  %9904 = vst [vmem:[#allocation55_spill] sm:$0xff] %v8785_v35  ;;  %v2403_v4 = vld [vmem:[#allocation2 + $0x28d] sm:$0xff] }
 0x297   : > { %vm1647_vm2 = vcmp.gt.f32.partialorder %v1544_v45, 0.0  ;;  %v1746_v51 = vmul.f32 0.1, %v1544_v45  ;;  %v8787_v62 = vpop.f32.mrf.mxu1  ;;  %v9909_v0 = vld [vmem:[#allocation22_spill] sm:$0xff]  ;;  %v2213_v8 = vmax.f32 %v2023_v11, %v2118_v34  ;;  %v2025_v11 = vld [vmem:[#allocation2 + $0x280] sm:$0xff] }
 0x298   : > { %v1546_v17 = vpop.f32.mrf.mxu0  ;;  %9905 = vst [vmem:[#allocation56_spill] sm:$0xff] %v8787_v62  ;;  %v2120_v34 = vld [vmem:[#allocation2 + $0x281] sm:$0xff] }
 0x299   : > { %v1845_v22 = vsel %vm1647_vm2, %v1544_v45, %v1746_v51  ;;  %v6987_v53 = vpop.f32.mrf.mxu1  ;;  %v2024_v45 = vld [vmem:[#allocation2 + $0x278] sm:$0xff]  ;;  %v2498_v17 = vmax.f32 %v2308_v49, %v2403_v4  ;;  %v9915_v4 = vld [vmem:[#allocation26_spill] sm:$0xff] }
 0x29a   : > { %1944 = vst [vmem:[#allocation2 + $0x310] sm:$0xff] %v1845_v22  ;;  %v1547_v3 = vpop.f32.mrf.mxu0  ;;  %v2309_v51 = vld [vmem:[#allocation2 + $0x294] sm:$0xff]  ;;  %v2214_v22 = vmax.f32 %v2024_v45, %v2119_v2  ;;  %v2310_v49 = vld [vmem:[#allocation2 + $0x29c] sm:$0xff]  ;;  %v2215_v45 = vmax.f32 %v2025_v11, %v2120_v34  ;;  %v2406_v34 = vld [vmem:[#allocation2 + $0x2a5] sm:$0xff] }
 0x29b   : > { %v3090_v40 = vpop.f32.mrf.mxu1  ;;  %v2404_v3 = vld [vmem:[#allocation2 + $0x295] sm:$0xff]  ;;  %v8807_v21 = vmax.f32 %v2213_v8, %v2498_v17  ;;  %v2405_v2 = vld [vmem:[#allocation2 + $0x29d] sm:$0xff] }
 0x29c   : > { %v2499_v40 = vmax.f32 %v2309_v51, %v2404_v3  ;;  %v2500_v8 = vmax.f32 %v2310_v49, %v2405_v2  ;;  %v2123_v2 = vld [vmem:[#allocation2 + $0x299] sm:$0xff]  ;;  %v2407_v3 = vld [vmem:[#allocation2 + $0x2ad] sm:$0xff] }
 0x29d   : > { %7070 = vmatmul.mubr.bf16.gmra.mxu1 %v8384_v54  ;;  %v8793_v26 = vpop.f32.mrf.mxu1  ;;  %9912 = vst [vmem:[#allocation61_spill] sm:$0xff] %v8807_v21 }
 0x29e   : > { %7073 = vmatprep.mubr.bf16.mxu1 %v8390_v50  ;;  %9906 = vst [vmem:[#allocation57_spill] sm:$0xff] %v8793_v26  ;;  %v8809_v37 = vmax.f32 %v2214_v22, %v2499_v40  ;;  %v8818_v17 = vmax.f32 %v2215_v45, %v2500_v8  ;;  %v9917_v40 = vld [vmem:[#allocation28_spill] sm:$0xff]  ;;  %v2122_v26 = vld [vmem:[#allocation2 + $0x291] sm:$0xff] }
 0x29f   : > { %v3093_v9 = vpop.f32.mrf.mxu1  ;;  %v2028_v45 = vld [vmem:[#allocation2 + $0x298] sm:$0xff] }
 0x2a0   : > { %9913 = vst [vmem:[#allocation62_spill] sm:$0xff] %v8809_v37  ;;  %v8814_v62 = vpack.c.bf16 %v8809_v37, %v8807_v21  ;;  %v2218_v29 = vmax.f32 %v2028_v45, %v2123_v2  ;;  %v2408_v37 = vld [vmem:[#allocation2 + $0x2b5] sm:$0xff] }
 0x2a1   : > { %v2503_v21 = vmax.f32 %v2313_v32, %v2408_v37  ;;  %v9921_v32 = vld [vmem:[#allocation34_spill] sm:$0xff]  ;;  %v2805_v37 = vpack.c.bf16 %v9922_v15, %v9922_v15 }
 0x2a2   : > { %7338 = vmatmul.mubr.bf16.gmra.mxu0 %v8814_v62 }
 0x2a5   : > { %7074 = vmatmul.mubr.bf16.gmra.mxu1 %v8410_v12 }
 0x2a6   : > { %7077 = vmatprep.mubr.bf16.mxu1 %v8416_v52 }
 0x2a9   : > { %v8795_v18 = vpop.f32.mrf.mxu1 }
 0x2aa   : > { %9907 = vst [vmem:[#allocation58_spill] sm:$0xff] %v8795_v18  ;;  %v9918_v18 = vld [vmem:[#allocation30_spill] sm:$0xff] }
 0x2ab   : > { %v8799_v60 = vpop.f32.mrf.mxu1 }
 0x2ac   : > { %9908 = vst [vmem:[#allocation59_spill] sm:$0xff] %v8799_v60  ;;  %v2311_v60 = vld [vmem:[#allocation2 + $0x2a4] sm:$0xff] }
 0x2ad   : > { %7078 = vmatmul.mubr.bf16.gmra.mxu1 %v8433_v44  ;;  %v6992_v16 = vpop.f32.mrf.mxu1  ;;  %v2501_v49 = vmax.f32 %v2311_v60, %v2406_v34 }
 0x2ae   : > { %7081 = vmatprep.mubr.bf16.mxu1 %v8438_v55  ;;  %v9914_v16 = vld [vmem:[#allocation24_spill] sm:$0xff] }
 0x2af   : > { %v8803_v53 = vpop.f32.mrf.mxu1 }
 0x2b0   : > { %9910 = vst [vmem:[#allocation22_spill] sm:$0xff] %v8803_v53  ;;  %v2121_v53 = vld [vmem:[#allocation2 + $0x289] sm:$0xff] }
 0x2b5   : > { %7082 = vmatmul.mubr.bf16.gmra.mxu1 %v8454_v7 }
 0x2b6   : > { %7085 = vmatprep.mubr.bf16.mxu1 %v8458_v5 }
 0x2b9   : > { %v8805_v9 = vpop.f32.mrf.mxu1 }
 0x2ba   : > { %9911 = vst [vmem:[#allocation60_spill] sm:$0xff] %v8805_v9  ;;  %v2026_v9 = vld [vmem:[#allocation2 + $0x288] sm:$0xff] }
 0x2bb   : > { %v3122_v51 = vpop.f32.mrf.mxu1  ;;  %v2216_v11 = vmax.f32 %v2026_v9, %v2121_v53 }
 0x2bc   : > { %v2027_v51 = vld [vmem:[#allocation2 + $0x290] sm:$0xff] }
 0x2bd   : > { %7086 = vmatmul.mubr.bf16.gmra.mxu1 %v8474_v58  ;;  %v8820_v22 = vpop.f32.mrf.mxu1  ;;  %v2217_v8 = vmax.f32 %v2027_v51, %v2122_v26  ;;  %v8826_v43 = vmax.f32 %v2216_v11, %v2501_v49  ;;  %v9920_v26 = vld [vmem:[#allocation32_spill] sm:$0xff]  ;;  %v2125_v51 = vld [vmem:[#allocation2 + $0x2a9] sm:$0xff] }
 0x2be   : > { %7089 = vmatprep.mubr.bf16.mxu1 %v9909_v0  ;;  %9916 = vst [vmem:[#allocation24_spill] sm:$0xff] %v8820_v22  ;;  %v2312_v22 = vld [vmem:[#allocation2 + $0x2ac] sm:$0xff]  ;;  %v2124_v11 = vld [vmem:[#allocation2 + $0x2a1] sm:$0xff] }
 0x2bf   : > { %v3125_v35 = vpop.f32.mrf.mxu1  ;;  %v2502_v31 = vmax.f32 %v2312_v22, %v2407_v3  ;;  %v4751_v53 = vpack.c.bf16 %v8826_v43, %v8818_v17  ;;  %v2315_v22 = vld [vmem:[#allocation2 + $0x2c4] sm:$0xff] }
 0x2c0   : > { %v8832_v35 = vmax.f32 %v2218_v29, %v2503_v21  ;;  %v2220_v21 = vmax.f32 %v8712_v25, %v2125_v51  ;;  %v2314_v29 = vld [vmem:[#allocation2 + $0x2bc] sm:$0xff]  ;;  %v2410_v49 = vld [vmem:[#allocation2 + $0x2c5] sm:$0xff] }
 0x2c1   : > { %v8830_v9 = vmax.f32 %v2217_v8, %v2502_v31  ;;  %7341 = vmatprep.mubr.bf16.mxu0 %v4751_v53  ;;  %v2409_v3 = vld [vmem:[#allocation2 + $0x2bd] sm:$0xff]  ;;  %v2505_v2 = vmax.f32 %v2315_v22, %v2410_v49 }
 0x2c2   : > { %v2504_v45 = vmax.f32 %v2314_v29, %v2409_v3  ;;  %v7618_v29 = vld [vmem:[%s9792_s3 + $0xd0] sm:$0xff]   ;;  %v7620_v49 = vld [vmem:[%s9792_s3 + $0xc0] sm:$0xff]  }
 0x2c3   : > { %v4752_v34 = vpack.c.bf16 %v8832_v35, %v8830_v9 }
 0x2c5   : > { %7090 = vmatmul.mubr.bf16.gmra.mxu1 %v9914_v16  ;;  %7342 = vmatmul.mubr.bf16.gmra.mxu0 %v4752_v34 }
 0x2c6   : > { %7093 = vmatprep.mubr.bf16.mxu1 %v9915_v4 }
 0x2c9   : > { %v6999_v56 = vpop.f32.mrf.mxu1 }
 0x2ca   : > { %v2029_v56 = vld [vmem:[#allocation2 + $0x2a0] sm:$0xff] }
 0x2cb   : > { %v8834_v60 = vpop.f32.mrf.mxu1  ;;  %v2219_v31 = vmax.f32 %v2029_v56, %v2124_v11 }
 0x2cc   : > { %9919 = vst [vmem:[#allocation26_spill] sm:$0xff] %v8834_v60  ;;  %v8845_v60 = vmax.f32 %v2220_v21, %v2505_v2  ;;  %v7616_v21 = vld [vmem:[%s9792_s3 + $0xe0] sm:$0xff]  }
 0x2cd   : > { %7094 = vmatmul.mubr.bf16.gmra.mxu1 %v9917_v40  ;;  %v7000_v8 = vpop.f32.mrf.mxu1  ;;  %v8843_v53 = vmax.f32 %v2219_v31, %v2504_v45  ;;  %v7614_v31 = vld [vmem:[%s9792_s3 + $0xf0] sm:$0xff]  }
 0x2ce   : > { %7097 = vmatprep.mubr.bf16.mxu1 %v9918_v18 }
 0x2cf   : > { %v4753_v25 = vpack.c.bf16 %v8845_v60, %v8843_v53  ;;  %v8853_v11 = vpop.f32.mrf.mxu1 }
 0x2d1   : > { %7345 = vmatprep.mubr.bf16.mxu0 %v4753_v25 }
 0x2d5   : > { %7098 = vmatmul.mubr.bf16.gmra.mxu1 %v9920_v26 }
 0x2d6   : > { %7101 = vmatprep.mubr.bf16.mxu1 %v9921_v32 }
 0x2d9   : > { %v8856_v34 = vpop.f32.mrf.mxu1 }
 0x2db   : > { %v3154_v51 = vpop.f32.mrf.mxu1 }
 0x2dd   : > { %7102 = vmatmul.mubr.bf16.gmra.mxu1 %v2805_v37  ;;  %v8864_v15 = vpop.f32.mrf.mxu1 }
 0x2de   : > { %7121 = vmatprep.mubr.bf16.mxu1 %v8068_v59  ;;  %9923 = vst [vmem:[#allocation28_spill] sm:$0xff] %v8864_v15  ;;  %v7615_v59 = vld [vmem:[%s9792_s3 + $0xe8] sm:$0xff]  }
 0x2df   : > { %v8869_v37 = vpop.f32.mrf.mxu1 }
 0x2e0   : > { %9924 = vst [vmem:[#allocation30_spill] sm:$0xff] %v8869_v37 }
 0x2e5   : > { %7122 = vmatmul.mubr.bf16.vlgmr.msra.gmra.mxu1 %v8082_v33 }
 0x2e6   : > { %7190 = vmatpush3.bf16.msra.mxu1 %v8750_v28  ;;  %7125 = vmatprep.mubr.bf16.mxu1 %v8099_v6  ;;  %v7617_v6 = vld [vmem:[%s9792_s3 + $0xd8] sm:$0xff]  }
 0x2e7   : > { %7191 = vmatprep.subr.bf16.mxu1 %v7614_v31 }
 0x2e9   : > { %v7007_v33 = vpop.f32.mrf.mxu1 }
 0x2ea   : > { %7192 = vmatpush3.bf16.msra.mxu1 %v7614_v31 }
 0x2eb   : > { %7193 = vmatprep.subr.bf16.mxu1 %v7615_v59  ;;  %v8879_v28 = vpop.f32.mrf.mxu1 }
 0x2ec   : > { %9925 = vst [vmem:[#allocation32_spill] sm:$0xff] %v8879_v28 }
 0x2ed   : > { %7126 = vmatmul.mubr.bf16.gmra.mxu1 %v8113_v42  ;;  %v7008_v22 = vpop.f32.mrf.mxu1  ;;  %v7619_v42 = vld [vmem:[%s9792_s3 + $0xc8] sm:$0xff]  }
 0x2ee   : > { %7129 = vmatprep.mubr.bf16.mxu1 %v8133_v14  ;;  %7194 = vmatpush3.bf16.msra.mxu1 %v7615_v59  ;;  %v2411_v22 = vld [vmem:[#allocation2 + $0x2cd] sm:$0xff] }
 0x2ef   : > { %7195 = vmatprep.subr.bf16.mxu1 %v7616_v21  ;;  %v3173_v14 = vpop.f32.mrf.mxu1 }
 0x2f2   : > { %7196 = vmatpush3.bf16.msra.mxu1 %v7616_v21 }
 0x2f3   : > { %7197 = vmatprep.subr.bf16.mxu1 %v7617_v6 }
 0x2f5   : > { %7130 = vmatmul.mubr.bf16.gmra.mxu1 %v8150_v48 }
 0x2f6   : > { %7133 = vmatprep.mubr.bf16.mxu1 %v8170_v36  ;;  %7198 = vmatpush3.bf16.msra.mxu1 %v7617_v6 }
 0x2f7   : > { %7199 = vmatprep.subr.bf16.mxu1 %v7618_v29 }
 0x2f9   : > { %v8889_v3 = vpop.f32.mrf.mxu1 }
 0x2fa   : > { %7200 = vmatpush3.bf16.msra.mxu1 %v7618_v29  ;;  %9926 = vst [vmem:[#allocation34_spill] sm:$0xff] %v8889_v3  ;;  %v2316_v29 = vld [vmem:[#allocation2 + $0x2cc] sm:$0xff] }
 0x2fb   : > { %7201 = vmatprep.subr.bf16.mxu1 %v7619_v42  ;;  %v8896_v48 = vpop.f32.mrf.mxu1 }
 0x2fc   : > { %9927 = vst [vmem:[#allocation35_spill] sm:$0xff] %v8896_v48  ;;  %v2321_v48 = vld [vmem:[#allocation2 + $0x2f4] sm:$0xff] }
 0x2fd   : > { %7134 = vmatmul.mubr.bf16.gmra.mxu1 %v8330_v24  ;;  %v8898_v36 = vpop.f32.mrf.mxu1 }
 0x2fe   : > { %7137 = vmatprep.mubr.bf16.mxu1 %v8351_v41  ;;  %7202 = vmatpush3.bf16.msra.mxu1 %v7619_v42  ;;  %9928 = vst [vmem:[#allocation63_spill] sm:$0xff] %v8898_v36  ;;  %v8934_v42 = vpop.f32.mrf.mxu0  ;;  %v2320_v36 = vld [vmem:[#allocation2 + $0x2ec] sm:$0xff] }
 0x2ff   : > { %7203 = vmatprep.subr.bf16.mxu1 %v7620_v49  ;;  %v8902_v45 = vpop.f32.mrf.mxu1  ;;  %9934 = vst [vmem:[#allocation69_spill] sm:$0xff] %v8934_v42 }
 0x300   : > { %9929 = vst [vmem:[#allocation64_spill] sm:$0xff] %v8902_v45 }
 0x302   : > { %7204 = vmatpush3.bf16.msra.mxu1 %v7620_v49  ;;  %v2127_v49 = vld [vmem:[#allocation2 + $0x2b9] sm:$0xff] }
 0x305   : > { %7138 = vmatmul.mubr.bf16.gmra.mxu1 %v8358_v1 }
 0x306   : > { %7141 = vmatprep.mubr.bf16.mxu1 %v8384_v54 }
 0x309   : > { %v7015_v2 = vpop.f32.mrf.mxu1 }
 0x30b   : > { %v3202_v8 = vpop.f32.mrf.mxu1 }
 0x30c   : > { %v2317_v8 = vld [vmem:[#allocation2 + $0x2d4] sm:$0xff] }
 0x30d   : > { %7142 = vmatmul.mubr.bf16.gmra.mxu1 %v8390_v50  ;;  %v8906_v24 = vpop.f32.mrf.mxu1 }
 0x30e   : > { %7145 = vmatprep.mubr.bf16.mxu1 %v8410_v12  ;;  %9930 = vst [vmem:[#allocation65_spill] sm:$0xff] %v8906_v24 }
 0x30f   : > { %v3205_v41 = vpop.f32.mrf.mxu1 }
 0x310   : > { %v2506_v41 = vmax.f32 %v2316_v29, %v2411_v22 }
 0x315   : > { %v8908_v25 = vpop.f32.mrf.mxu1  ;;  %7146 = vmatmul.mubr.bf16.gmra.mxu1 %v8416_v52 }
 0x316   : > { %9931 = vst [vmem:[#allocation66_spill] sm:$0xff] %v8908_v25  ;;  %7149 = vmatprep.mubr.bf16.mxu1 %v8433_v44 }
 0x317   : > { %v8912_v1 = vpop.f32.mrf.mxu1 }
 0x318   : > { %9932 = vst [vmem:[#allocation67_spill] sm:$0xff] %v8912_v1  ;;  %v2130_v1 = vld [vmem:[#allocation2 + $0x2d1] sm:$0xff] }
 0x319   : > { %v7020_v54 = vpop.f32.mrf.mxu1 }
 0x31b   : > { %v8914_v51 = vpop.f32.mrf.mxu1 }
 0x31c   : > { %9933 = vst [vmem:[#allocation68_spill] sm:$0xff] %v8914_v51 }
 0x31d   : > { %v8916_v31 = vpop.f32.mrf.mxu1  ;;  %7150 = vmatmul.mubr.bf16.gmra.mxu1 %v8438_v55  ;;  %v2031_v55 = vld [vmem:[#allocation2 + $0x2b0] sm:$0xff] }
 0x31e   : > { %7153 = vmatprep.mubr.bf16.mxu1 %v8454_v7  ;;  %v2126_v7 = vld [vmem:[#allocation2 + $0x2b1] sm:$0xff] }
 0x31f   : > { %v8920_v50 = vpop.f32.mrf.mxu1  ;;  %v2221_v2 = vmax.f32 %v2031_v55, %v2126_v7 }
 0x321   : > { %v8922_v12 = vpop.f32.mrf.mxu1  ;;  %v8945_v56 = vmax.f32 %v2221_v2, %v2506_v41  ;;  %v2128_v41 = vld [vmem:[#allocation2 + $0x2c1] sm:$0xff] }
 0x323   : > { %v8924_v59 = vpop.f32.mrf.mxu1 }
 0x325   : > { %v7043_v52 = vpop.f32.mrf.mxu1  ;;  %7154 = vmatmul.mubr.bf16.gmra.mxu1 %v8458_v5 }
 0x326   : > { %7157 = vmatprep.mubr.bf16.mxu1 %v8474_v58  ;;  %v2032_v58 = vld [vmem:[#allocation2 + $0x2b8] sm:$0xff] }
 0x327   : > { %v3330_v44 = vpop.f32.mrf.mxu1  ;;  %v2222_v54 = vmax.f32 %v2032_v58, %v2127_v49  ;;  %v2412_v52 = vld [vmem:[#allocation2 + $0x2d5] sm:$0xff] }
 0x328   : > { %v8938_v44 = vpop.f32.mrf.mxu0 }
 0x329   : > { %v8928_v21 = vpop.f32.mrf.mxu1  ;;  %9935 = vst [vmem:[#allocation70_spill] sm:$0xff] %v8938_v44  ;;  %v2413_v44 = vld [vmem:[#allocation2 + $0x2dd] sm:$0xff] }
 0x32a   : > { %v8950_v55 = vpop.f32.mrf.mxu0 }
 0x32b   : > { %v3333_v33 = vpop.f32.mrf.mxu1  ;;  %9936 = vst [vmem:[#allocation71_spill] sm:$0xff] %v8950_v55 }
 0x32d   : > { %v8930_v6 = vpop.f32.mrf.mxu1  ;;  %7158 = vmatmul.mubr.bf16.gmra.mxu1 %v9909_v0 }
 0x32e   : > { %7161 = vmatprep.mubr.bf16.mxu1 %v9914_v16  ;;  %v2507_v16 = vmax.f32 %v2317_v8, %v2412_v52  ;;  %v2034_v8 = vld [vmem:[#allocation2 + $0x2c8] sm:$0xff] }
 0x32f   : > { %v8936_v14 = vpop.f32.mrf.mxu1 }
 0x330   : > { %v8947_v42 = vmax.f32 %v2222_v54, %v2507_v16  ;;  %v2129_v54 = vld [vmem:[#allocation2 + $0x2c9] sm:$0xff]  ;;  %v2318_v16 = vld [vmem:[#allocation2 + $0x2dc] sm:$0xff] }
 0x331   : > { %v7048_v5 = vpop.f32.mrf.mxu1 }
 0x332   : > { %v4754_v29 = vpack.c.bf16 %v8947_v42, %v8945_v56  ;;  %v8956_v5 = vpop.f32.mrf.mxu0 }
 0x333   : > { %v8940_v0 = vpop.f32.mrf.mxu1  ;;  %9937 = vst [vmem:[#allocation72_spill] sm:$0xff] %v8956_v5  ;;  %v2414_v5 = vld [vmem:[#allocation2 + $0x2e5] sm:$0xff] }
 0x334   : > { %7346 = vmatmul.mubr.bf16.gmra.mxu0 %v4754_v29  ;;  %v2224_v29 = vmax.f32 %v2034_v8, %v2129_v54 }
 0x335   : > { %v8942_v33 = vpop.f32.mrf.mxu1  ;;  %7162 = vmatmul.mubr.bf16.gmra.mxu1 %v9915_v4  ;;  %v7295_v4 = vpop.f32.mrf.mxu0 }
 0x336   : > { %7165 = vmatprep.mubr.bf16.mxu1 %v9917_v40  ;;  %v2033_v40 = vld [vmem:[#allocation2 + $0x2c0] sm:$0xff] }
 0x337   : > { %v3362_v7 = vpop.f32.mrf.mxu1  ;;  %v2223_v52 = vmax.f32 %v2033_v40, %v2128_v41  ;;  %v4874_v4 = vpop.f32.mrf.mxu0  ;;  %v2415_v40 = vld [vmem:[#allocation2 + $0x2ed] sm:$0xff] }
 0x338   : > { %v2319_v7 = vld [vmem:[#allocation2 + $0x2e4] sm:$0xff]  ;;  %v2510_v8 = vmax.f32 %v2320_v36, %v2415_v40 }
 0x339   : > { %v8954_v22 = vpop.f32.mrf.mxu1  ;;  %v2509_v51 = vmax.f32 %v2319_v7, %v2414_v5  ;;  %v9938_v5 = vld [vmem:[#allocation39_spill] sm:$0xff]  ;;  %v8968_v4 = vpop.f32.mrf.mxu0  ;;  %v2133_v40 = vld [vmem:[#allocation2 + $0x2e9] sm:$0xff] }
 0x33a   : > { %9939 = vst [vmem:[#allocation39_spill] sm:$0xff] %v8968_v4 }
 0x33b   : > { %v3365_v58 = vpop.f32.mrf.mxu1  ;;  %v2604_v3 = vmax.f32 %v2224_v29, %v2509_v51  ;;  %v4877_v51 = vpop.f32.mrf.mxu0 }
 0x33c   : > { %v2035_v58 = vld [vmem:[#allocation2 + $0x2d0] sm:$0xff] }
 0x33d   : > { %v7055_v49 = vpop.f32.mrf.mxu1  ;;  %7166 = vmatmul.mubr.bf16.gmra.mxu1 %v9918_v18  ;;  %v2036_v18 = vld [vmem:[#allocation2 + $0x2d8] sm:$0xff]  ;;  %v2225_v24 = vmax.f32 %v2035_v58, %v2130_v1 }
 0x33e   : > { %7169 = vmatprep.mubr.bf16.mxu1 %v9920_v26  ;;  %v2508_v49 = vmax.f32 %v2318_v16, %v2413_v44  ;;  %v2131_v26 = vld [vmem:[#allocation2 + $0x2d9] sm:$0xff]  ;;  %v2134_v51 = vld [vmem:[#allocation2 + $0x2f1] sm:$0xff] }
 0x33f   : > { %v8960_v2 = vpop.f32.mrf.mxu1  ;;  %v2226_v45 = vmax.f32 %v2036_v18, %v2131_v26  ;;  %v2605_v7 = vmax.f32 %v2225_v24, %v2510_v8  ;;  %v2037_v24 = vld [vmem:[#allocation2 + $0x2e0] sm:$0xff]  ;;  %v2038_v26 = vld [vmem:[#allocation2 + $0x2e8] sm:$0xff] }
 0x340   : > { %v2603_v41 = vmax.f32 %v2223_v52, %v2508_v49  ;;  %v9940_v49 = vld [vmem:[#allocation43_spill] sm:$0xff]  ;;  %v2323_v8 = vld [vmem:[#allocation2 + $0x304] sm:$0xff] }
 0x341   : > { %v7056_v55 = vpop.f32.mrf.mxu1 }
 0x342   : > { %v2416_v55 = vld [vmem:[#allocation2 + $0x2f5] sm:$0xff]  ;;  %v4755_v16 = vpack.c.bf16 %v2604_v3, %v2603_v41 }
 0x343   : > { %v8962_v25 = vpop.f32.mrf.mxu1  ;;  %v2511_v44 = vmax.f32 %v2321_v48, %v2416_v55  ;;  %v8976_v48 = vpop.f32.mrf.mxu0  ;;  %v2322_v55 = vld [vmem:[#allocation2 + $0x2fc] sm:$0xff] }
 0x344   : > { %7349 = vmatprep.mubr.bf16.mxu0 %v4755_v16  ;;  %9942 = vst [vmem:[#allocation43_spill] sm:$0xff] %v8976_v48  ;;  %v2417_v16 = vld [vmem:[#allocation2 + $0x2fd] sm:$0xff] }
 0x345   : > { %v8964_v54 = vpop.f32.mrf.mxu1  ;;  %7170 = vmatmul.mubr.bf16.gmra.mxu1 %v9921_v32  ;;  %v2606_v58 = vmax.f32 %v2226_v45, %v2511_v44  ;;  %v9941_v32 = vld [vmem:[#allocation45_spill] sm:$0xff] }
 0x346   : > { %7173 = vmatprep.mubr.bf16.mxu1 %v9938_v5  ;;  %v2132_v45 = vld [vmem:[#allocation2 + $0x2e1] sm:$0xff]  ;;  %v2228_v5 = vmax.f32 %v2038_v26, %v2133_v40 }
 0x347   : > { %v3394_v1 = vpop.f32.mrf.mxu1  ;;  %v4756_v52 = vpack.c.bf16 %v2606_v58, %v2605_v7  ;;  %v2227_v41 = vmax.f32 %v2037_v24, %v2132_v45  ;;  %v2418_v7 = vld [vmem:[#allocation2 + $0x305] sm:$0xff]  ;;  %v2512_v58 = vmax.f32 %v2322_v55, %v2417_v16 }
 0x348   : > { %v2039_v1 = vld [vmem:[#allocation2 + $0x2f0] sm:$0xff] }
 0x349   : > { %v8970_v18 = vpop.f32.mrf.mxu1  ;;  %7350 = vmatmul.mubr.bf16.gmra.mxu0 %v4756_v52  ;;  %v2513_v52 = vmax.f32 %v2323_v8, %v2418_v7  ;;  %v2229_v4 = vmax.f32 %v2039_v1, %v2134_v51  ;;  %v2607_v37 = vmax.f32 %v2227_v41, %v2512_v58  ;;  %v9947_v7 = vld [vmem:[#allocation6_spill] sm:$0xff] }
 0x34b   : > { %v8972_v29 = vpop.f32.mrf.mxu1  ;;  %v2608_v15 = vmax.f32 %v2228_v5, %v2513_v52 }
 0x34d   : > { %v7063_v36 = vpop.f32.mrf.mxu1  ;;  %7174 = vmatmul.mubr.bf16.gmra.mxu1 %v9940_v49  ;;  %v2419_v49 = vld [vmem:[#allocation2 + $0x30d] sm:$0xff]  ;;  %v4757_v45 = vpack.c.bf16 %v2608_v15, %v2607_v37 }
 0x34e   : > { %7177 = vmatprep.mubr.bf16.mxu1 %v9941_v32  ;;  %v2324_v36 = vld [vmem:[#allocation2 + $0x30c] sm:$0xff]  ;;  %v8980_v32 = vpop.f32.mrf.mxu0 }
 0x34f   : > { %v8978_v3 = vpop.f32.mrf.mxu1  ;;  %9943 = vst [vmem:[#allocation45_spill] sm:$0xff] %v8980_v32  ;;  %v2514_v28 = vmax.f32 %v2324_v36, %v2419_v49  ;;  %7353 = vmatprep.mubr.bf16.mxu0 %v4757_v45  ;;  %v9949_v36 = vld [vmem:[#allocation7_spill] sm:$0xff]  ;;  %v9950_v49 = vld [vmem:[#allocation8_spill] sm:$0xff] }
 0x350   : > { %v7300_v40 = vpop.f32.mrf.mxu0 }
 0x351   : > { %v7064_v44 = vpop.f32.mrf.mxu1  ;;  %v2609_v26 = vmax.f32 %v2229_v4, %v2514_v28  ;;  %v3684_v4 = vpack.c.bf16 %v8818_v17, %v8818_v17 }
 0x353   : > { %v3413_v48 = vpop.f32.mrf.mxu1  ;;  %v4758_v8 = vpack.c.bf16 %v2609_v26, %v2609_v26 }
 0x354   : > { %v8990_v48 = vpop.f32.mrf.mxu0 }
 0x355   : > { %v8982_v24 = vpop.f32.mrf.mxu1  ;;  %7178 = vmatmul.mubr.bf16.gmra.mxu1 %v8660_v57  ;;  %7354 = vmatmul.mubr.bf16.gmra.mxu0 %v4758_v8  ;;  %9944 = vst [vmem:[#allocation73_spill] sm:$0xff] %v8990_v48 }
 0x356   : > { %7181 = vmatprep.mubr.bf16.mxu1 %v8677_v13  ;;  %v8996_v57 = vpop.f32.mrf.mxu0 }
 0x357   : > { %v8986_v55 = vpop.f32.mrf.mxu1  ;;  %9946 = vst [vmem:[#allocation75_spill] sm:$0xff] %v8996_v57 }
 0x358   : > { %v4906_v37 = vpop.f32.mrf.mxu0 }
 0x359   : > { %v8988_v44 = vpop.f32.mrf.mxu1  ;;  %v9952_v37 = vld [vmem:[#allocation9_spill] sm:$0xff] }
 0x35a   : > { %v9005_v1 = vpop.f32.mrf.mxu0 }
 0x35b   : > { %v8992_v41 = vpop.f32.mrf.mxu1  ;;  %9948 = vst [vmem:[#allocation6_spill] sm:$0xff] %v9005_v1 }
 0x35c   : > { %9945 = vst [vmem:[#allocation74_spill] sm:$0xff] %v8992_v41  ;;  %v4909_v58 = vpop.f32.mrf.mxu0 }
 0x35d   : > { %v7071_v5 = vpop.f32.mrf.mxu1  ;;  %7182 = vmatmul.mubr.bf16.gmra.mxu1 %v8706_v47 }
 0x35e   : > { %7185 = vmatprep.mubr.bf16.mxu1 %v8814_v62  ;;  %v7307_v26 = vpop.f32.mrf.mxu0 }
 0x35f   : > { %v3442_v13 = vpop.f32.mrf.mxu1  ;;  %v9955_v26 = vld [vmem:[#allocation11_spill] sm:$0xff] }
 0x360   : > { %v9017_v8 = vpop.f32.mrf.mxu0 }
 0x361   : > { %v8998_v15 = vpop.f32.mrf.mxu1  ;;  %9951 = vst [vmem:[#allocation7_spill] sm:$0xff] %v9017_v8 }
 0x363   : > { %v3445_v28 = vpop.f32.mrf.mxu1 }
 0x364   : > { %v9953_v28 = vld [vmem:[#allocation10_spill] sm:$0xff] }
 0x365   : > { %v9002_v16 = vpop.f32.mrf.mxu1  ;;  %7186 = vmatmul.mubr.bf16.gmra.mxu1 %v3684_v4  ;;  %v7308_v4 = vpop.f32.mrf.mxu0 }
 0x366   : > { %7205 = vmatprep.mubr.bf16.mxu1 %v9947_v7 }
 0x367   : > { %v9007_v47 = vpop.f32.mrf.mxu1  ;;  %v9023_v58 = vpop.f32.mrf.mxu0 }
 0x368   : > { %9954 = vst [vmem:[#allocation8_spill] sm:$0xff] %v9023_v58  ;;  %v9961_v58 = vld [vmem:[#allocation14_spill] sm:$0xff] }
 0x369   : > { %v7076_v62 = vpop.f32.mrf.mxu1 }
 0x36b   : > { %v9009_v52 = vpop.f32.mrf.mxu1 }
 0x36d   : > { %v9011_v51 = vpop.f32.mrf.mxu1  ;;  %7206 = vmatmul.mubr.bf16.vlgmr.msra.gmra.mxu1 %v9949_v36 }
 0x36e   : > { %7209 = vmatprep.mubr.bf16.mxu1 %v9950_v49 }
 0x36f   : > { %v3474_v45 = vpop.f32.mrf.mxu1 }
 0x370   : > { %v9956_v45 = vld [vmem:[#allocation12_spill] sm:$0xff] }
 0x371   : > { %v9015_v40 = vpop.f32.mrf.mxu1 }
 0x373   : > { %v3477_v5 = vpop.f32.mrf.mxu1 }
 0x374   : > { %v9031_v5 = vpop.f32.mrf.mxu0 }
 0x375   : > { %v7083_v13 = vpop.f32.mrf.mxu1  ;;  %7210 = vmatmul.mubr.bf16.gmra.mxu1 %v9952_v37  ;;  %9957 = vst [vmem:[#allocation9_spill] sm:$0xff] %v9031_v5 }
 0x376   : > { %7213 = vmatprep.mubr.bf16.mxu1 %v9953_v28  ;;  %v4938_v28 = vpop.f32.mrf.mxu0 }
 0x377   : > { %v9021_v7 = vpop.f32.mrf.mxu1  ;;  %v9967_v28 = vld [vmem:[#allocation16_spill] sm:$0xff] }
 0x378   : > { %v9039_v8 = vpop.f32.mrf.mxu0 }
 0x379   : > { %v7084_v62 = vpop.f32.mrf.mxu1  ;;  %9962 = vst [vmem:[#allocation12_spill] sm:$0xff] %v9039_v8 }
 0x37a   : > { %v9960_v62 = vld [vmem:[#allocation13_spill] sm:$0xff]  ;;  %v9043_v57 = vpop.f32.mrf.mxu0 }
 0x37b   : > { %v9025_v36 = vpop.f32.mrf.mxu1  ;;  %9964 = vst [vmem:[#allocation14_spill] sm:$0xff] %v9043_v57  ;;  %v9973_v57 = vld [vmem:[#allocation18_spill] sm:$0xff] }
 0x37c   : > { %v7315_v48 = vpop.f32.mrf.mxu0 }
 0x37d   : > { %v9027_v49 = vpop.f32.mrf.mxu1  ;;  %7214 = vmatmul.mubr.bf16.gmra.mxu1 %v9955_v26 }
 0x37e   : > { %7217 = vmatprep.mubr.bf16.mxu1 %v9956_v45 }
 0x37f   : > { %v3506_v13 = vpop.f32.mrf.mxu1 }
 0x380   : > { %v9966_v13 = vld [vmem:[#allocation15_spill] sm:$0xff] }
 0x381   : > { %v9033_v37 = vpop.f32.mrf.mxu1 }
 0x382   : > { %9958 = vst [vmem:[#allocation10_spill] sm:$0xff] %v9033_v37 }
 0x383   : > { %v9035_v4 = vpop.f32.mrf.mxu1 }
 0x384   : > { %9959 = vst [vmem:[#allocation11_spill] sm:$0xff] %v9035_v4 }
 0x385   : > { %v7091_v41 = vpop.f32.mrf.mxu1  ;;  %7218 = vmatmul.mubr.bf16.gmra.mxu1 %v9960_v62 }
 0x386   : > { %7221 = vmatprep.mubr.bf16.mxu1 %v9961_v58  ;;  %v9053_v58 = vpop.f32.mrf.mxu0 }
 0x387   : > { %v9041_v1 = vpop.f32.mrf.mxu1  ;;  %9970 = vst [vmem:[#allocation77_spill] sm:$0xff] %v9053_v58  ;;  %v9978_v58 = vld [vmem:[#allocation20_spill] sm:$0xff] }
 0x388   : > { %9963 = vst [vmem:[#allocation13_spill] sm:$0xff] %v9041_v1 }
 0x389   : > { %v7092_v26 = vpop.f32.mrf.mxu1 }
 0x38a   : > { %v9972_v26 = vld [vmem:[#allocation17_spill] sm:$0xff] }
 0x38b   : > { %v3525_v45 = vpop.f32.mrf.mxu1 }
 0x38c   : > { %v7316_v45 = vpop.f32.mrf.mxu0 }
 0x38d   : > { %v9045_v5 = vpop.f32.mrf.mxu1  ;;  %7222 = vmatmul.mubr.bf16.gmra.mxu1 %v9966_v13 }
 0x38e   : > { %9965 = vst [vmem:[#allocation76_spill] sm:$0xff] %v9045_v5  ;;  %7225 = vmatprep.mubr.bf16.mxu1 %v9967_v28  ;;  %v4957_v13 = vpop.f32.mrf.mxu0 }
 0x38f   : > { %v9049_v41 = vpop.f32.mrf.mxu1 }
 0x390   : > { %9968 = vst [vmem:[#allocation15_spill] sm:$0xff] %v9049_v41  ;;  %v9061_v48 = vpop.f32.mrf.mxu0 }
 0x391   : > { %v9051_v62 = vpop.f32.mrf.mxu1  ;;  %9975 = vst [vmem:[#allocation18_spill] sm:$0xff] %v9061_v48  ;;  %v9984_v48 = vld [vmem:[#allocation21_spill] sm:$0xff] }
 0x392   : > { %9969 = vst [vmem:[#allocation16_spill] sm:$0xff] %v9051_v62  ;;  %v9977_v62 = vld [vmem:[#allocation19_spill] sm:$0xff] }
 0x393   : > { %v9055_v8 = vpop.f32.mrf.mxu1 }
 0x394   : > { %9971 = vst [vmem:[#allocation78_spill] sm:$0xff] %v9055_v8 }
 0x395   : > { %v7099_v32 = vpop.f32.mrf.mxu1  ;;  %7226 = vmatmul.mubr.bf16.gmra.mxu1 %v9972_v26 }
 0x396   : > { %7229 = vmatprep.mubr.bf16.mxu1 %v9973_v57  ;;  %v9069_v32 = vpop.f32.mrf.mxu0 }
 0x397   : > { %v3554_v5 = vpop.f32.mrf.mxu1  ;;  %9980 = vst [vmem:[#allocation20_spill] sm:$0xff] %v9069_v32  ;;  %v9987_v32 = vld [vmem:[#allocation40_spill] sm:$0xff] }
 0x398   : > { %v9982_v5 = vld [vmem:[#allocation36_spill] sm:$0xff]  ;;  %v9075_v13 = vpop.f32.mrf.mxu0 }
 0x399   : > { %v9059_v1 = vpop.f32.mrf.mxu1  ;;  %v3323_v45 = vadd.f32 %v8916_v31, %v9982_v5  ;;  %9983 = vst [vmem:[#allocation36_spill] sm:$0xff] %v9075_v13  ;;  %v9990_v5 = vld [vmem:[#allocation42_spill] sm:$0xff] }
 0x39a   : > { %9974 = vst [vmem:[#allocation17_spill] sm:$0xff] %v9059_v1  ;;  %v9087_v4 = vpop.f32.mrf.mxu0  ;;  %v3318_v13 = vadd.f32 %v8924_v59, %v9990_v5  ;;  %v9995_v5 = vld [vmem:[#allocation29_spill] sm:$0xff] }
 0x39b   : > { %v3557_v28 = vpop.f32.mrf.mxu1 }
 0x39c   : > { %v7323_v37 = vpop.f32.mrf.mxu0 }
 0x39d   : > { %v9063_v41 = vpop.f32.mrf.mxu1  ;;  %7230 = vmatmul.mubr.bf16.gmra.mxu1 %v9977_v62  ;;  %v9994_v37 = vld [vmem:[#allocation48_spill] sm:$0xff] }
 0x39e   : > { %9976 = vst [vmem:[#allocation79_spill] sm:$0xff] %v9063_v41  ;;  %7233 = vmatprep.mubr.bf16.mxu1 %v9978_v58  ;;  %v9985_v41 = vld [vmem:[#allocation38_spill] sm:$0xff]  ;;  %v9986_v58 = vld [vmem:[#allocation23_spill] sm:$0xff] }
 0x39f   : > { %v9067_v8 = vpop.f32.mrf.mxu1  ;;  %v3315_v62 = vadd.f32 %v8920_v50, %v9985_v41  ;;  %9989 = vst [vmem:[#allocation38_spill] sm:$0xff] %v9087_v4 }
 0x3a0   : > { %9979 = vst [vmem:[#allocation19_spill] sm:$0xff] %v9067_v8 }
 0x3a1   : > { %v7104_v26 = vpop.f32.mrf.mxu1 }
 0x3a2   : > { %v3326_v26 = vadd.f32 %v8922_v12, %v9987_v32  ;;  %v4986_v12 = vpop.f32.mrf.mxu0  ;;  %v9993_v32 = vld [vmem:[#allocation46_spill] sm:$0xff] }
 0x3a3   : > { %v9071_v57 = vpop.f32.mrf.mxu1 }
 0x3a4   : > { %9981 = vst [vmem:[#allocation80_spill] sm:$0xff] %v9071_v57  ;;  %v9101_v59 = vpop.f32.mrf.mxu0 }
 0x3a5   : > { %v7123_v28 = vpop.f32.mrf.mxu1  ;;  %7234 = vmatmul.mubr.bf16.gmra.mxu1 %v9984_v48 }
 0x3a6   : > { %v9080_v1 = vadd.f32 %v7123_v28, %v3323_v45  ;;  %7237 = vmatprep.mubr.bf16.mxu1 %v9986_v58  ;;  %v9991_v28 = vld [vmem:[#allocation25_spill] sm:$0xff]  ;;  %v9992_v58 = vld [vmem:[#allocation27_spill] sm:$0xff] }
 0x3a7   : > { %v3784_v8 = vpop.f32.mrf.mxu1 }
 0x3a8   : > { %v9085_v57 = vadd.f32 %v3784_v8, %v3315_v62  ;;  %v3342_v62 = vadd.f32 %v8928_v21, %v9993_v32  ;;  %v4989_v21 = vpop.f32.mrf.mxu0 }
 0x3a9   : > { %v7124_v31 = vpop.f32.mrf.mxu1 }
 0x3aa   : > { %9988 = vst [vmem:[#allocation21_spill] sm:$0xff] %v9085_v57  ;;  %v9091_v48 = vadd.f32 %v7124_v31, %v3326_v26  ;;  %v9113_v12 = vpop.f32.mrf.mxu0 }
 0x3ab   : > { %v3787_v50 = vpop.f32.mrf.mxu1 }
 0x3ac   : > { %v9093_v41 = vadd.f32 %v3787_v50, %v3318_v13  ;;  %v3355_v13 = vadd.f32 %v8930_v6, %v9994_v37  ;;  %v3347_v50 = vadd.f32 %v8936_v14, %v8667_v10  ;;  %v3350_v6 = vadd.f32 %v8940_v0, %v8690_v20  ;;  %v9121_v10 = vpop.f32.mrf.mxu0  ;;  %v9997_v37 = vld [vmem:[#allocation33_spill] sm:$0xff] }
 0x3ad   : > { %v7127_v45 = vpop.f32.mrf.mxu1  ;;  %7238 = vmatmul.mubr.bf16.gmra.mxu1 %v9991_v28  ;;  %v9996_v28 = vld [vmem:[#allocation31_spill] sm:$0xff] }
 0x3ae   : > { %7241 = vmatprep.mubr.bf16.mxu1 %v9992_v58  ;;  %v7328_v20 = vpop.f32.mrf.mxu0 }
 0x3af   : > { %v3800_v8 = vpop.f32.mrf.mxu1 }
 0x3b1   : > { %v7128_v4 = vpop.f32.mrf.mxu1 }
 0x3b2   : > { %v9099_v57 = vadd.f32 %v7128_v4, %v3342_v62  ;;  %v3371_v62 = vadd.f32 %v8942_v33, %v8698_v38  ;;  %v9131_v33 = vpop.f32.mrf.mxu0 }
 0x3b3   : > { %v3803_v26 = vpop.f32.mrf.mxu1 }
 0x3b5   : > { %v7131_v31 = vpop.f32.mrf.mxu1  ;;  %7242 = vmatmul.mubr.bf16.gmra.mxu1 %v9995_v5 }
 0x3b6   : > { %v9108_v45 = vadd.f32 %v7131_v31, %v3355_v13  ;;  %7245 = vmatprep.mubr.bf16.mxu1 %v9996_v28  ;;  %v9998_v31 = vld [vmem:[#allocation37_spill] sm:$0xff] }
 0x3b7   : > { %v3816_v58 = vpop.f32.mrf.mxu1 }
 0x3b8   : > { %v9111_v4 = vadd.f32 %v3816_v58, %v3347_v50  ;;  %v3374_v50 = vadd.f32 %v8954_v22, %v8722_v39  ;;  %v9999_v58 = vld [vmem:[#allocation41_spill] sm:$0xff]  ;;  %v3382_v22 = vadd.f32 %v8962_v25, %v8753_v19  ;;  %v3406_v19 = vadd.f32 %v8970_v18, %v8762_v63  ;;  %v10008_v63 = vld [vmem:[#allocation52_spill] sm:$0xff] }
 0x3b9   : > { %v7132_v8 = vpop.f32.mrf.mxu1  ;;  %v3411_v18 = vadd.f32 %v8978_v3, %v10008_v63 }
 0x3ba   : > { %v3379_v8 = vadd.f32 %v8960_v2, %v8739_v23  ;;  %v10001_v23 = vld [vmem:[#allocation47_spill] sm:$0xff] }
 0x3bb   : > { %v3819_v32 = vpop.f32.mrf.mxu1 }
 0x3bc   : > { %v9119_v26 = vadd.f32 %v3819_v32, %v3350_v6  ;;  %v10000_v6 = vld [vmem:[#allocation44_spill] sm:$0xff]  ;;  %v9137_v32 = vpop.f32.mrf.mxu0 }
 0x3bd   : > { %v7135_v14 = vpop.f32.mrf.mxu1  ;;  %7246 = vmatmul.mubr.bf16.gmra.mxu1 %v9997_v37 }
 0x3be   : > { %v9124_v13 = vadd.f32 %v7135_v14, %v3371_v62  ;;  %7249 = vmatprep.mubr.bf16.mxu1 %v9998_v31  ;;  %v5018_v37 = vpop.f32.mrf.mxu0 }
 0x3bf   : > { %v3832_v5 = vpop.f32.mrf.mxu1  ;;  %v10005_v37 = vld [vmem:[#allocation50_spill] sm:$0xff] }
 0x3c0   : > { %v3403_v5 = vadd.f32 %v8964_v54, %v8756_v61  ;;  %v3398_v61 = vadd.f32 %v8972_v29, %v8767_v27 }
 0x3c1   : > { %v7136_v0 = vpop.f32.mrf.mxu1 }
 0x3c2   : > { %v9129_v28 = vadd.f32 %v7136_v0, %v3374_v50  ;;  %v10002_v0 = vpack.c.bf16 %v8664_v30, %v8650_v46 }
 0x3c3   : > { %v3835_v38 = vpop.f32.mrf.mxu1 }
 0x3c4   : > { %v9153_v38 = vpop.f32.mrf.mxu0 }
 0x3c5   : > { %v7139_v21 = vpop.f32.mrf.mxu1  ;;  %7250 = vmatmul.mubr.bf16.gmra.mxu1 %v9999_v58 }
 0x3c6   : > { %7253 = vmatprep.mubr.bf16.mxu1 %v10000_v6  ;;  %v5021_v58 = vpop.f32.mrf.mxu0 }
 0x3c7   : > { %v3848_v62 = vpop.f32.mrf.mxu1  ;;  %v10010_v58 = vld [vmem:[#allocation62_spill] sm:$0xff] }
 0x3c8   : > { %v9139_v14 = vadd.f32 %v3848_v62, %v3379_v8  ;;  %v10003_v62 = vld [vmem:[#allocation51_spill] sm:$0xff]  ;;  %v7335_v30 = vpop.f32.mrf.mxu0 }
 0x3c9   : > { %v7140_v39 = vpop.f32.mrf.mxu1 }
 0x3ca   : > { %v10004_v39 = vld [vmem:[#allocation61_spill] sm:$0xff] }
 0x3cb   : > { %v3851_v31 = vpop.f32.mrf.mxu1  ;;  %v4216_v46 = vpack.c.bf16 %v10004_v39, %v10003_v62  ;;  %v10012_v62 = vld [vmem:[#allocation54_spill] sm:$0xff] }
 0x3cc   : > { %v9145_v50 = vadd.f32 %v3851_v31, %v3382_v22  ;;  %v10006_v31 = vld [vmem:[#allocation49_spill] sm:$0xff]  ;;  %v3427_v3 = vadd.f32 %v8986_v55, %v10012_v62 }
 0x3cd   : > { %v7143_v20 = vpop.f32.mrf.mxu1  ;;  %7254 = vmatmul.mubr.bf16.gmra.mxu1 %v10001_v23 }
 0x3ce   : > { %v9148_v2 = vadd.f32 %v7143_v20, %v3403_v5  ;;  %7257 = vmatprep.mubr.bf16.mxu1 %v10002_v0  ;;  %v10007_v5 = vpack.c.bf16 %v10005_v37, %v10006_v31  ;;  %v9172_v20 = vpop.f32.mrf.mxu0 }
 0x3cf   : > { %v3864_v21 = vpop.f32.mrf.mxu1 }
 0x3d0   : > { %v10009_v21 = vld [vmem:[#allocation53_spill] sm:$0xff] }
 0x3d1   : > { %v7144_v25 = vpop.f32.mrf.mxu1 }
 0x3d2   : > { %v9159_v54 = vadd.f32 %v7144_v25, %v3406_v19  ;;  %v3435_v19 = vadd.f32 %v8982_v24, %v10009_v21  ;;  %v7336_v25 = vpop.f32.mrf.mxu0 }
 0x3d3   : > { %v3867_v8 = vpop.f32.mrf.mxu1 }
 0x3d4   : > { %v9161_v6 = vadd.f32 %v3867_v8, %v3398_v61  ;;  %v10011_v8 = vpack.c.bf16 %v8818_v17, %v10010_v58  ;;  %v9190_v31 = vpop.f32.mrf.mxu0 }
 0x3d5   : > { %v7147_v22 = vpop.f32.mrf.mxu1  ;;  %7258 = vmatmul.mubr.bf16.gmra.mxu1 %v10007_v5 }
 0x3d6   : > { %7261 = vmatprep.mubr.bf16.mxu1 %v4216_v46  ;;  %v10013_v46 = vpack.c.bf16 %v8830_v9, %v8826_v43  ;;  %v10014_v22 = vld [vmem:[#allocation55_spill] sm:$0xff]  ;;  %v9196_v55 = vpop.f32.mrf.mxu0  ;;  %v10015_v9 = vpack.c.bf16 %v8843_v53, %v8832_v35 }
 0x3d7   : > { %v3880_v27 = vpop.f32.mrf.mxu1  ;;  %v3438_v37 = vadd.f32 %v8988_v44, %v10014_v22  ;;  %v10018_v53 = vld [vmem:[#allocation59_spill] sm:$0xff] }
 0x3d8   : > { %v9170_v29 = vadd.f32 %v3880_v27, %v3411_v18  ;;  %v4220_v18 = vpack.c.bf16 %v8945_v56, %v8845_v60  ;;  %v5050_v27 = vpop.f32.mrf.mxu0  ;;  %v10017_v60 = vld [vmem:[#allocation58_spill] sm:$0xff] }
 0x3d9   : > { %v7148_v23 = vpop.f32.mrf.mxu1  ;;  %v3467_v56 = vadd.f32 %v9002_v16, %v10017_v60 }
 0x3da   : > { %v10016_v23 = vld [vmem:[#allocation57_spill] sm:$0xff]  ;;  %v9209_v58 = vpop.f32.mrf.mxu0 }
 0x3db   : > { %v3883_v0 = vpop.f32.mrf.mxu1 }
 0x3dc   : > { %v3454_v0 = vadd.f32 %v8998_v15, %v10016_v23  ;;  %v10022_v23 = vld [vmem:[#allocation24_spill] sm:$0xff] }
 0x3dd   : > { %v7151_v61 = vpop.f32.mrf.mxu1  ;;  %7262 = vmatmul.mubr.bf16.gmra.mxu1 %v10011_v8  ;;  %v3459_v8 = vadd.f32 %v9007_v47, %v10018_v53 }
 0x3de   : > { %v9181_v39 = vadd.f32 %v7151_v61, %v3435_v19  ;;  %7265 = vmatprep.mubr.bf16.mxu1 %v10013_v46  ;;  %v4221_v61 = vpack.c.bf16 %v8947_v42, %v8947_v42  ;;  %v10019_v42 = vld [vmem:[#allocation22_spill] sm:$0xff] }
 0x3df   : > { %v3896_v30 = vpop.f32.mrf.mxu1 }
 0x3e0   : > { %v9188_v24 = vadd.f32 %v3896_v30, %v3427_v3  ;;  %v9217_v3 = vpop.f32.mrf.mxu0 }
 0x3e1   : > { %v7152_v5 = vpop.f32.mrf.mxu1 }
 0x3e2   : > { %v9192_v17 = vadd.f32 %v7152_v5, %v3438_v37  ;;  %v7343_v22 = vpop.f32.mrf.mxu0  ;;  %v3462_v37 = vadd.f32 %v9009_v52, %v10019_v42 }
 0x3e3   : > { %v9194_v63 = vpop.f32.mrf.mxu1  ;;  %v3494_v22 = vadd.f32 %v9025_v36, %v8853_v11  ;;  %v10030_v11 = vld [vmem:[#allocation11_spill] sm:$0xff] }
 0x3e4   : > { %v9227_v47 = vpop.f32.mrf.mxu0 }
 0x3e5   : > { %v7155_v43 = vpop.f32.mrf.mxu1  ;;  %7266 = vmatmul.mubr.bf16.gmra.mxu1 %v10015_v9  ;;  %10021 = vst [vmem:[#allocation23_spill] sm:$0xff] %v9227_v47 }
 0x3e6   : > { %7269 = vmatprep.mubr.bf16.mxu1 %v4220_v18  ;;  %v10020_v18 = vld [vmem:[#allocation60_spill] sm:$0xff] }
 0x3e7   : > { %v3912_v44 = vpop.f32.mrf.mxu1  ;;  %v3483_v16 = vadd.f32 %v9011_v51, %v10020_v18 }
 0x3e9   : > { %v7156_v21 = vpop.f32.mrf.mxu1 }
 0x3ea   : > { %v9205_v19 = vadd.f32 %v7156_v21, %v3454_v0  ;;  %v3486_v0 = vadd.f32 %v9015_v40, %v10022_v23  ;;  %v10028_v23 = vld [vmem:[#allocation10_spill] sm:$0xff] }
 0x3eb   : > { %v3915_v25 = vpop.f32.mrf.mxu1 }
 0x3ec   : > { %v7344_v25 = vpop.f32.mrf.mxu0 }
 0x3ed   : > { %v7159_v35 = vpop.f32.mrf.mxu1  ;;  %7270 = vmatmul.mubr.bf16.gmra.mxu1 %v4221_v61  ;;  %v10029_v25 = vld [vmem:[#allocation30_spill] sm:$0xff] }
 0x3ee   : > { %v9215_v62 = vadd.f32 %v7159_v35, %v3467_v56  ;;  %v5069_v56 = vpop.f32.mrf.mxu0  ;;  %v10023_v35 = vld [vmem:[#allocation26_spill] sm:$0xff]  ;;  %v3510_v36 = vadd.f32 %v10030_v11, %v10029_v25  ;;  %v10037_v11 = vld [vmem:[#allocation35_spill] sm:$0xff] }
 0x3ef   : > { %v3928_v15 = vpop.f32.mrf.mxu1  ;;  %v3491_v51 = vadd.f32 %v9021_v7, %v10023_v35 }
 0x3f0   : > { %v9219_v46 = vadd.f32 %v3928_v15, %v3459_v8 }
 0x3f1   : > { %v7160_v30 = vpop.f32.mrf.mxu1 }
 0x3f3   : > { %v3931_v5 = vpop.f32.mrf.mxu1 }
 0x3f4   : > { %v9225_v43 = vadd.f32 %v3931_v5, %v3462_v37  ;;  %v9237_v8 = vpop.f32.mrf.mxu0  ;;  %v3515_v37 = vadd.f32 %v9027_v49, %v8856_v34 }
 0x3f5   : > { %v7163_v9 = vpop.f32.mrf.mxu1  ;;  %10024 = vst [vmem:[#allocation40_spill] sm:$0xff] %v9237_v8 }
 0x3f6   : > { %v9229_v44 = vadd.f32 %v7163_v9, %v3483_v16  ;;  %v9243_v42 = vpop.f32.mrf.mxu0 }
 0x3f7   : > { %v3944_v27 = vpop.f32.mrf.mxu1  ;;  %10025 = vst [vmem:[#allocation42_spill] sm:$0xff] %v9243_v42 }
 0x3f8   : > { %v9251_v9 = vpop.f32.mrf.mxu0  ;;  %v10027_v27 = vld [vmem:[#allocation28_spill] sm:$0xff] }
 0x3f9   : > { %v7164_v21 = vpop.f32.mrf.mxu1  ;;  %10026 = vst [vmem:[#allocation25_spill] sm:$0xff] %v9251_v9 }
 0x3fa   : > { %v9233_v61 = vadd.f32 %v7164_v21, %v3486_v0  ;;  %v3518_v0 = vadd.f32 %v10028_v23, %v10027_v27  ;;  %v9259_v56 = vpop.f32.mrf.mxu0  ;;  %v10034_v27 = vld [vmem:[#allocation34_spill] sm:$0xff]  ;;  %v10035_v23 = vld [vmem:[#allocation76_spill] sm:$0xff] }
 0x3fb   : > { %v3947_v52 = vpop.f32.mrf.mxu1  ;;  %10031 = vst [vmem:[#allocation27_spill] sm:$0xff] %v9259_v56  ;;  %v10040_v56 = vld [vmem:[#allocation63_spill] sm:$0xff] }
 0x3fd   : > { %v7167_v60 = vpop.f32.mrf.mxu1 }
 0x3ff   : > { %v3960_v53 = vpop.f32.mrf.mxu1 }
 0x400   : > { %v9239_v15 = vadd.f32 %v3960_v53, %v3491_v51  ;;  %v10032_v51 = vld [vmem:[#allocation32_spill] sm:$0xff]  ;;  %v10033_v53 = vld [vmem:[#allocation13_spill] sm:$0xff] }
 0x401   : > { %v7168_v30 = vpop.f32.mrf.mxu1 }
 0x402   : > { %v3523_v30 = vadd.f32 %v10033_v53, %v10032_v51  ;;  %v10041_v51 = vld [vmem:[#allocation16_spill] sm:$0xff] }
 0x403   : > { %v3963_v40 = vpop.f32.mrf.mxu1  ;;  %v3550_v53 = vadd.f32 %v10041_v51, %v10040_v56  ;;  %v10049_v56 = vld [vmem:[#allocation65_spill] sm:$0xff] }
 0x404   : > { %v9247_v5 = vadd.f32 %v3963_v40, %v3494_v22 }
 0x405   : > { %v7171_v18 = vpop.f32.mrf.mxu1 }
 0x406   : > { %v9249_v16 = vadd.f32 %v7171_v18, %v3515_v37 }
 0x407   : > { %v3976_v7 = vpop.f32.mrf.mxu1 }
 0x409   : > { %v7172_v21 = vpop.f32.mrf.mxu1  ;;  %v7351_v35 = vpop.f32.mrf.mxu0 }
 0x40a   : > { %v9257_v52 = vadd.f32 %v7172_v21, %v3518_v0  ;;  %v3547_v0 = vadd.f32 %v10035_v23, %v10034_v27 }
 0x40b   : > { %v3979_v60 = vpop.f32.mrf.mxu1  ;;  %v5098_v18 = vpop.f32.mrf.mxu0 }
 0x40c   : > { %v9261_v34 = vadd.f32 %v3979_v60, %v3510_v36  ;;  %v10038_v36 = vld [vmem:[#allocation15_spill] sm:$0xff]  ;;  %v10043_v18 = vld [vmem:[#allocation64_spill] sm:$0xff] }
 0x40d   : > { %v7175_v49 = vpop.f32.mrf.mxu1  ;;  %v9269_v25 = vpop.f32.mrf.mxu0  ;;  %v3539_v60 = vadd.f32 %v10038_v36, %v10037_v11 }
 0x40e   : > { %10036 = vst [vmem:[#allocation46_spill] sm:$0xff] %v9269_v25 }
 0x40f   : > { %v3992_v22 = vpop.f32.mrf.mxu1 }
 0x410   : > { %v9265_v40 = vadd.f32 %v3992_v22, %v3523_v30 }
 0x411   : > { %v7176_v37 = vpop.f32.mrf.mxu1 }
 0x412   : > { %v5101_v37 = vpop.f32.mrf.mxu0 }
 0x413   : > { %v3995_v7 = vpop.f32.mrf.mxu1 }
 0x414   : > { %v10044_v7 = vld [vmem:[#allocation78_spill] sm:$0xff] }
 0x415   : > { %v7179_v21 = vpop.f32.mrf.mxu1  ;;  %v3542_v9 = vadd.f32 %v10044_v7, %v10043_v18  ;;  %v9283_v25 = vpop.f32.mrf.mxu0  ;;  %v10052_v18 = vld [vmem:[#allocation66_spill] sm:$0xff] }
 0x416   : > { %v9273_v49 = vadd.f32 %v7179_v21, %v3547_v0  ;;  %10046 = vst [vmem:[#allocation33_spill] sm:$0xff] %v9283_v25  ;;  %v10055_v25 = vld [vmem:[#allocation19_spill] sm:$0xff] }
 0x417   : > { %v4008_v35 = vpop.f32.mrf.mxu1  ;;  %v9287_v21 = vpop.f32.mrf.mxu0 }
 0x418   : > { %10039 = vst [vmem:[#allocation48_spill] sm:$0xff] %v9273_v49  ;;  %v9277_v30 = vadd.f32 %v4008_v35, %v3539_v60  ;;  %10048 = vst [vmem:[#allocation41_spill] sm:$0xff] %v9287_v21  ;;  %v10050_v60 = vld [vmem:[#allocation17_spill] sm:$0xff] }
 0x419   : > { %v7180_v22 = vpop.f32.mrf.mxu1  ;;  %v7356_v36 = vpop.f32.mrf.mxu0  ;;  %v3566_v35 = vadd.f32 %v10050_v60, %v10049_v56 }
 0x41a   : > { %10042 = vst [vmem:[#allocation29_spill] sm:$0xff] %v9277_v30  ;;  %v9281_v27 = vadd.f32 %v7180_v22, %v3550_v53  ;;  %v10053_v53 = vld [vmem:[#allocation79_spill] sm:$0xff]  ;;  %v10058_v36 = vld [vmem:[#allocation68_spill] sm:$0xff] }
 0x41b   : > { %v4011_v23 = vpop.f32.mrf.mxu1  ;;  %v3579_v22 = vadd.f32 %v10053_v53, %v10052_v18  ;;  %v9309_v18 = vld [vmem:[%s9793_s4] ss:$0 sm:$0xff] }
 0x41c   : > { %10045 = vst [vmem:[#allocation31_spill] sm:$0xff] %v9281_v27  ;;  %v9285_v42 = vadd.f32 %v4011_v23, %v3542_v9  ;;  %v10054_v27 = vld [vmem:[#allocation67_spill] sm:$0xff] }
 0x41d   : > { %v7183_v0 = vpop.f32.mrf.mxu1  ;;  %v3571_v9 = vadd.f32 %v10055_v25, %v10054_v27  ;;  %v10061_v27 = vld [vmem:[#allocation69_spill] sm:$0xff] }
 0x41e   : > { %10047 = vst [vmem:[#allocation37_spill] sm:$0xff] %v9285_v42  ;;  %v10059_v42 = vld [vmem:[#allocation80_spill] sm:$0xff] }
 0x41f   : > { %v4024_v11 = vpop.f32.mrf.mxu1  ;;  %v3574_v56 = vadd.f32 %v10059_v42, %v10058_v36  ;;  %v10063_v42 = vld [vmem:[#allocation70_spill] sm:$0xff] }
 0x421   : > { %v7184_v51 = vpop.f32.mrf.mxu1 }
 0x422   : > { %v9291_v37 = vadd.f32 %v7184_v51, %v3566_v35 }
 0x423   : > { %v4027_v30 = vpop.f32.mrf.mxu1 }
 0x424   : > { %10051 = vst [vmem:[#allocation44_spill] sm:$0xff] %v9291_v37 }
 0x425   : > { %v7187_v7 = vpop.f32.mrf.mxu1 }
 0x426   : > { %v9297_v23 = vadd.f32 %v7187_v7, %v3579_v22  ;;  %v10062_v22 = vld [vmem:[#allocation21_spill] sm:$0xff] }
 0x427   : > { %v4040_v0 = vpop.f32.mrf.mxu1 }
 0x428   : > { %10056 = vst [vmem:[#allocation47_spill] sm:$0xff] %v9297_v23  ;;  %v9299_v21 = vadd.f32 %v4040_v0, %v3571_v9 }
 0x429   : > { %v7188_v11 = vpop.f32.mrf.mxu1 }
 0x42a   : > { %10057 = vst [vmem:[#allocation51_spill] sm:$0xff] %v9299_v21 }
 0x42b   : > { %v4043_v60 = vpop.f32.mrf.mxu1 }
 0x42c   : > { %v9303_v35 = vadd.f32 %v4043_v60, %v3574_v56 }
 0x42d   : > { %v7207_v30 = vpop.f32.mrf.mxu1 }
 0x42e   : > { %10060 = vst [vmem:[#allocation61_spill] sm:$0xff] %v9303_v35  ;;  %v4593_v51 = vadd.f32 %v7207_v30, %v9080_v1  ;;  %v10064_v30 = vld [vmem:[#allocation71_spill] sm:$0xff] }
 0x42f   : > { %v4321_v25 = vpop.f32.mrf.mxu1 }
 0x430   : > { %v5130_v53 = vadd.f32 %v10061_v27, %v4593_v51  ;;  %v4591_v7 = vadd.f32 %v4321_v25, %v10062_v22 }
 0x431   : > { %v7208_v9 = vpop.f32.mrf.mxu1 }
 0x432   : > { %v5204_v0 = vadd.f32 %v9309_v18, %v5130_v53  ;;  %v5128_v11 = vadd.f32 %v10063_v42, %v4591_v7  ;;  %v4594_v36 = vadd.f32 %v7208_v9, %v9091_v48  ;;  %v10065_v53 = vld [vmem:[#allocation72_spill] sm:$0xff] }
 0x433   : > { %v4324_v56 = vpop.f32.mrf.mxu1 }
 0x434   : > { %vm5271_vm3 = vcmp.gt.f32.partialorder %v5204_v0, 0.0  ;;  %v5338_v1 = vmul.f32 0.1, %v5204_v0  ;;  %v5202_v60 = vadd.f32 %v9309_v18, %v5128_v11  ;;  %v5131_v35 = vadd.f32 %v10064_v30, %v4594_v36  ;;  %v7622_v30 = vld [vmem:[%s9794_s5 + $0x38] sm:$0xff]  }
 0x435   : > { %v4592_v21 = vadd.f32 %v4324_v56, %v9093_v41  ;;  %v7211_v23 = vpop.f32.mrf.mxu1 }
 0x436   : > { %v9319_v51 = vsel %vm5271_vm3, %v5204_v0, %v5338_v1  ;;  %vm5269_vm4 = vcmp.gt.f32.partialorder %v5202_v60, 0.0  ;;  %v5336_v25 = vmul.f32 0.1, %v5202_v60  ;;  %v5205_v27 = vadd.f32 %v9309_v18, %v5131_v35  ;;  %v10066_v35 = vld [vmem:[#allocation39_spill] sm:$0xff] }
 0x437   : > { %5472 = vst [vmem:[#allocation4 + $0x10] sm:$0xff] %v9319_v51  ;;  %v5129_v48 = vadd.f32 %v10065_v53, %v4592_v21  ;;  %v4337_v22 = vpop.f32.mrf.mxu1 }
 0x438   : > { %v5403_v7 = vsel %vm5269_vm4, %v5202_v60, %v5336_v25  ;;  %vm5272_vm5 = vcmp.gt.f32.partialorder %v5205_v27, 0.0  ;;  %v5339_v9 = vmul.f32 0.1, %v5205_v27  ;;  %v7621_v60 = vld [vmem:[%s9794_s5 + $0x78] sm:$0xff]   ;;  %v10067_v22 = vmov 0  }
 0x439   : > { %5470 = vst [vmem:[#allocation4] sm:$0xff] %v5403_v7  ;;  %v5203_v42 = vadd.f32 %v9309_v18, %v5129_v48  ;;  %v7212_v11 = vpop.f32.mrf.mxu1  ;;  %6897 = vmatprep.subr.bf16.mxu1 %v7621_v60  ;;  %v10068_v7 = vld [vmem:[#allocation43_spill] sm:$0xff] }
 0x43a   : > { %v5406_v41 = vsel %vm5272_vm5, %v5205_v27, %v5339_v9  ;;  %v4598_v23 = vadd.f32 %v7212_v11, %v9099_v57  ;;  %v7623_v57 = vld [vmem:[%s9794_s5 + $0xb8] sm:$0xff]   ;;  %6898 = vmatpush3.bf16.msra.mxu1 %v7622_v30  ;;  %v10070_v30 = vld [vmem:[#allocation73_spill] sm:$0xff] }
 0x43b   : > { %5473 = vst [vmem:[#allocation4 + $0x18] sm:$0xff] %v5406_v41  ;;  %vm5270_vm6 = vcmp.gt.f32.partialorder %v5203_v42, 0.0  ;;  %v5337_v0 = vmul.f32 0.1, %v5203_v42  ;;  %v4340_v36 = vpop.f32.mrf.mxu1  ;;  %6088 = vmatpush1.bf16.msra.mxu0 %v7623_v57 }
 0x43c   : > { %v5135_v56 = vadd.f32 %v10066_v35, %v4598_v23  ;;  %6089 = vmatprep.subr.bf16.mxu0 %v10067_v22 }
 0x43d   : > { %v9327_v1 = vsel %vm5270_vm6, %v5203_v42, %v5337_v0  ;;  %v7215_v21 = vpop.f32.mrf.mxu1  ;;  %v10069_v0 = vld [vmem:[#allocation45_spill] sm:$0xff] }
 0x43e   : > { %5471 = vst [vmem:[#allocation4 + $0x8] sm:$0xff] %v9327_v1  ;;  %v5209_v25 = vadd.f32 %v9309_v18, %v5135_v56  ;;  %v4601_v27 = vadd.f32 %v7215_v21, %v9108_v45 }
 0x43f   : > { %v4353_v53 = vpop.f32.mrf.mxu1 }
 0x440   : > { %vm5276_vm7 = vcmp.gt.f32.partialorder %v5209_v25, 0.0  ;;  %v5343_v48 = vmul.f32 0.1, %v5209_v25  ;;  %v5138_v9 = vadd.f32 %v10068_v7, %v4601_v27  ;;  %v4599_v42 = vadd.f32 %v4353_v53, %v9111_v4  ;;  %v10071_v7 = vld [vmem:[#allocation75_spill] sm:$0xff] }
 0x441   : > { %v7216_v11 = vpop.f32.mrf.mxu1 }
 0x442   : > { %v5410_v41 = vsel %vm5276_vm7, %v5209_v25, %v5343_v48  ;;  %v5212_v23 = vadd.f32 %v9309_v18, %v5138_v9  ;;  %v5136_v36 = vadd.f32 %v10069_v0, %v4599_v42  ;;  %v9356_v0 = vld [vmem:[#allocation4 + $0x12] sm:$0xff] }
 0x443   : > { %5477 = vst [vmem:[#allocation4 + $0x38] sm:$0xff] %v5410_v41  ;;  %v4356_v45 = vpop.f32.mrf.mxu1 }
 0x444   : > { %v4600_v35 = vadd.f32 %v4356_v45, %v9119_v26  ;;  %vm5279_vm8 = vcmp.gt.f32.partialorder %v5212_v23, 0.0  ;;  %v5346_v56 = vmul.f32 0.1, %v5212_v23  ;;  %v5210_v21 = vadd.f32 %v9309_v18, %v5136_v36 }
 0x445   : > { %v7219_v60 = vpop.f32.mrf.mxu1 }
 0x446   : > { %v5137_v57 = vadd.f32 %v10070_v30, %v4600_v35  ;;  %v4605_v27 = vadd.f32 %v7219_v60, %v9124_v13  ;;  %v5413_v4 = vsel %vm5279_vm8, %v5212_v23, %v5346_v56  ;;  %vm5277_vm9 = vcmp.gt.f32.partialorder %v5210_v21, 0.0  ;;  %v7624_v13 = vld [vmem:[%s9794_s5 + $0x70] sm:$0xff]   ;;  %v5546_v35 = vld [vmem:[#allocation4 + $0x4] sm:$0xff] }
 0x447   : > { %v5344_v25 = vmul.f32 0.1, %v5210_v21  ;;  %v4369_v53 = vpop.f32.mrf.mxu1  ;;  %5480 = vst [vmem:[#allocation4 + $0x50] sm:$0xff] %v5413_v4  ;;  %v7625_v23 = vld [vmem:[%s9794_s5 + $0x30] sm:$0xff]   ;;  %v5547_v56 = vld [vmem:[#allocation4 + $0x6] sm:$0xff]  ;;  %6899 = vmatprep.subr.bf16.mxu1 %v7624_v13 }
 0x448   : > { %v5211_v48 = vadd.f32 %v9309_v18, %v5137_v57  ;;  %v5142_v9 = vadd.f32 %v10071_v7, %v4605_v27  ;;  %v5560_v30 = vld [vmem:[#allocation4 + $0xa] sm:$0xff]  ;;  %v7626_v57 = vld [vmem:[%s9794_s5 + $0xb0] sm:$0xff]   ;;  %6900 = vmatpush3.bf16.msra.mxu1 %v7625_v23  ;;  %v10073_v7 = vld [vmem:[#allocation7_spill] sm:$0xff] }
 0x449   : > { %v9352_v42 = vsel %vm5277_vm9, %v5210_v21, %v5344_v25  ;;  %v7220_v26 = vpop.f32.mrf.mxu1  ;;  %v10072_v27 = vld [vmem:[#allocation6_spill] sm:$0xff]  ;;  %v5572_v53 = vld [vmem:[#allocation4 + $0xc] sm:$0xff]  ;;  %6090 = vmatpush1.bf16.msra.mxu0 %v7626_v57 }
 0x44a   : > { %5478 = vst [vmem:[#allocation4 + $0x40] sm:$0xff] %v9352_v42  ;;  %vm5278_vm10 = vcmp.gt.f32.partialorder %v5211_v48, 0.0  ;;  %v5345_v11 = vmul.f32 0.1, %v5211_v48  ;;  %v5216_v41 = vadd.f32 %v9309_v18, %v5142_v9  ;;  %v4606_v36 = vadd.f32 %v7220_v26, %v9129_v28  ;;  %v5573_v28 = vld [vmem:[#allocation4 + $0xe] sm:$0xff]  ;;  %v9376_v26 = vld [vmem:[#allocation4 + $0x2] sm:$0xff]  ;;  %6091 = vmatprep.subr.bf16.mxu0 %v10067_v22 }
 0x44b   : > { %v4372_v45 = vpop.f32.mrf.mxu1  ;;  %v5548_v9 = vmax.f32 %v5546_v35, %v5547_v56 }
 0x44c   : > { %v9365_v21 = vsel %vm5278_vm10, %v5211_v48, %v5345_v11  ;;  %vm5283_vm11 = vcmp.gt.f32.partialorder %v5216_v41, 0.0  ;;  %v5350_v60 = vmul.f32 0.1, %v5216_v41  ;;  %v5143_v4 = vadd.f32 %v10072_v27, %v4606_v36 }
 0x44d   : > { %5479 = vst [vmem:[#allocation4 + $0x48] sm:$0xff] %v9365_v21  ;;  %v7223_v25 = vpop.f32.mrf.mxu1  ;;  %v5561_v36 = vmax.f32 %v9327_v1, %v5560_v30  ;;  %v5574_v27 = vmax.f32 %v5572_v53, %v5573_v28 }
 0x44e   : > { %v9374_v48 = vsel %vm5283_vm11, %v5216_v41, %v5350_v60  ;;  %v5217_v11 = vadd.f32 %v9309_v18, %v5143_v4  ;;  %v5537_v25 = vld [vmem:[#allocation4] sm:$0xff]  ;;  %v5540_v4 = vld [vmem:[#allocation4 + $0x38] sm:$0xff] }
 0x44f   : > { %5484 = vst [vmem:[#allocation4 + $0x70] sm:$0xff] %v9374_v48  ;;  %v4385_v13 = vpop.f32.mrf.mxu1  ;;  %v5539_v57 = vmax.f32 %v5537_v25, %v9376_v26  ;;  %v7628_v25 = vld [vmem:[%s9794_s5 + $0x28] sm:$0xff]  }
 0x450   : > { %v4607_v45 = vadd.f32 %v4385_v13, %v9139_v14  ;;  %vm5284_vm12 = vcmp.gt.f32.partialorder %v5217_v11, 0.0  ;;  %v5351_v41 = vmul.f32 0.1, %v5217_v11 }
 0x451   : > { %v7224_v23 = vpop.f32.mrf.mxu1  ;;  %v5549_v35 = vld [vmem:[#allocation4 + $0x3c] sm:$0xff] }
 0x452   : > { %v5550_v56 = vld [vmem:[#allocation4 + $0x3e] sm:$0xff]  ;;  %v5144_v37 = vadd.f32 %v10073_v7, %v4607_v45  ;;  %v9385_v8 = vsel %vm5284_vm12, %v5217_v11, %v5351_v41  ;;  %v7627_v11 = vld [vmem:[%s9794_s5 + $0x68] sm:$0xff]  }
 0x453   : > { %v5541_v60 = vld [vmem:[#allocation4 + $0x3a] sm:$0xff]  ;;  %v4388_v1 = vpop.f32.mrf.mxu1  ;;  %v5551_v30 = vmax.f32 %v5549_v35, %v5550_v56  ;;  %5485 = vst [vmem:[#allocation4 + $0x78] sm:$0xff] %v9385_v8  ;;  %6901 = vmatprep.subr.bf16.mxu1 %v7627_v11  ;;  %v10077_v11 = vld [vmem:[#allocation12_spill] sm:$0xff] }
 0x454   : > { %v5542_v49 = vmax.f32 %v5540_v4, %v5541_v60  ;;  %v5218_v14 = vadd.f32 %v9309_v18, %v5144_v37  ;;  %v5563_v53 = vld [vmem:[#allocation4 + $0x42] sm:$0xff]  ;;  %v4608_v23 = vadd.f32 %v4388_v1, %v9145_v50  ;;  %v5589_v45 = vld [vmem:[#allocation4 + $0x4a] sm:$0xff]  ;;  %6902 = vmatpush3.bf16.msra.mxu1 %v7628_v25 }
 0x455   : > { %v5575_v28 = vld [vmem:[#allocation4 + $0x44] sm:$0xff]  ;;  %v7227_v47 = vpop.f32.mrf.mxu1  ;;  %v5552_v26 = vmax.f32 %v5548_v9, %v5551_v30  ;;  %v5564_v7 = vmax.f32 %v9352_v42, %v5563_v53  ;;  %v7629_v50 = vld [vmem:[%s9794_s5 + $0xa8] sm:$0xff]   ;;  %v5590_v53 = vmax.f32 %v9365_v21, %v5589_v45 }
 0x456   : > { %v5576_v13 = vld [vmem:[#allocation4 + $0x46] sm:$0xff]  ;;  %vm5285_vm14 = vcmp.gt.f32.partialorder %v5218_v14, 0.0  ;;  %v5352_v37 = vmul.f32 0.1, %v5218_v14  ;;  %v4613_v41 = vadd.f32 %v7227_v47, %v9148_v2  ;;  %v10075_v1 = vld [vmem:[#allocation9_spill] sm:$0xff]  ;;  %6092 = vmatpush1.bf16.msra.mxu0 %v7629_v50 }
 0x457   : > { %v10074_v9 = vld [vmem:[#allocation8_spill] sm:$0xff]  ;;  %5554 = vrot.lane.b32.xlu0 %v5552_v26, %s7675_s30  ;;  %v4401_v42 = vpop.f32.mrf.mxu1  ;;  %v5565_v56 = vmax.f32 %v5561_v36, %v5564_v7  ;;  %v5577_v60 = vmax.f32 %v5575_v28, %v5576_v13  ;;  %v10076_v28 = vmax.f32 %v9319_v51, %v9356_v0  ;;  %v5543_v7 = vmax.f32 %v5539_v57, %v5542_v49  ;;  %v10078_v51 = vld [vmem:[#allocation14_spill] sm:$0xff] }
 0x458   : > { %v5145_v35 = vadd.f32 %v10074_v9, %v4608_v23  ;;  %v9403_v4 = vsel %vm5285_vm14, %v5218_v14, %v5352_v37  ;;  %v5150_v30 = vadd.f32 %v10075_v1, %v4613_v41  ;;  %6093 = vmatprep.subr.bf16.mxu0 %v10067_v22 }
 0x459   : > { %5486 = vst [vmem:[#allocation4 + $0x80] sm:$0xff] %v9403_v4  ;;  %v7228_v47 = vpop.f32.mrf.mxu1  ;;  %5567 = vrot.lane.b32.xlu1 %v5565_v56, %s7676_s12  ;;  %v5578_v23 = vmax.f32 %v5574_v27, %v5577_v60  ;;  %v5591_v13 = vmax.f32 %v10076_v28, %v5590_v53  ;;  %5545 = vst.msk [vmem:[#allocation5] sm:$0xff] %vm5544_vm13, %v5543_v7  ;;  %v10079_v56 = vld [vmem:[#allocation77_spill] sm:$0xff] }
 0x45a   : > { %v5219_v2 = vadd.f32 %v9309_v18, %v5145_v35  ;;  %v5224_v36 = vadd.f32 %v9309_v18, %v5150_v30  ;;  %v4614_v14 = vadd.f32 %v7228_v47, %v9159_v54  ;;  %v10081_v47 = vld [vmem:[#allocation74_spill] sm:$0xff] }
 0x45b   : > { %v4404_v26 = vpop.f32.mrf.mxu1 }
 0x45c   : > { %vm5286_vm15 = vcmp.gt.f32.partialorder %v5219_v2, 0.0  ;;  %v5353_v21 = vmul.f32 0.1, %v5219_v2  ;;  %vm5291_vm0 = vcmp.gt.f32.partialorder %v5224_v36, 0.0  ;;  %v5358_v45 = vmul.f32 0.1, %v5224_v36 }
 0x45d   : > { %v5151_v27 = vadd.f32 %v10077_v11, %v4614_v14  ;;  %v4612_v37 = vadd.f32 %v4404_v26, %v9161_v6  ;;  %v7231_v41 = vpop.f32.mrf.mxu1  ;;  %5580 = vrot.lane.b32.xlu1 %v5578_v23, %s7677_s14  ;;  %v9442_v26 = vld [vmem:[#allocation4 + $0x76] sm:$0xff] }
 0x45e   : > { %v5420_v25 = vsel %vm5286_vm15, %v5219_v2, %v5353_v21  ;;  %v9420_v54 = vsel %vm5291_vm0, %v5224_v36, %v5358_v45  ;;  %v9433_v2 = vld [vmem:[#allocation4 + $0x72] sm:$0xff] }
 0x45f   : > { %5487 = vst [vmem:[#allocation4 + $0x88] sm:$0xff] %v5420_v25  ;;  %v5225_v49 = vadd.f32 %v9309_v18, %v5151_v27  ;;  %5492 = vst [vmem:[#allocation4 + $0xb0] sm:$0xff] %v9420_v54  ;;  %v5149_v0 = vadd.f32 %v10078_v51, %v4612_v37  ;;  %v4417_v57 = vpop.f32.mrf.mxu1  ;;  %v9440_v21 = vld [vmem:[#allocation4 + $0x74] sm:$0xff]  ;;  %v5600_v27 = vmax.f32 %v9374_v48, %v9433_v2 }
 0x460   : > { %v4615_v6 = vadd.f32 %v4417_v57, %v9170_v29  ;;  %v10080_v29 = vld [vmem:[#allocation56_spill] sm:$0xff]  ;;  %v10082_v41 = vld [vmem:[#allocation18_spill] sm:$0xff] }
 0x461   : > { %vm5292_vm1 = vcmp.gt.f32.partialorder %v5225_v49, 0.0  ;;  %v5359_v50 = vmul.f32 0.1, %v5225_v49  ;;  %v5223_v9 = vadd.f32 %v9309_v18, %v5149_v0  ;;  %v7232_v35 = vpop.f32.mrf.mxu1  ;;  %5593 = vrot.lane.b32.xlu1 %v5591_v13, %s7678_s15  ;;  %v3430_v23 = vadd.f32 %v10081_v47, %v10080_v29  ;;  %v5625_v13 = vld [vmem:[#allocation4 + $0x7a] sm:$0xff] }
 0x462   : > { %v5152_v60 = vadd.f32 %v10079_v56, %v4615_v6  ;;  %v5626_v57 = vmax.f32 %v9385_v8, %v5625_v13  ;;  %v10083_v35 = vld [vmem:[#allocation20_spill] sm:$0xff]  ;;  %v7634_v47 = vld [vmem:[%s9794_s5 + $0x98] sm:$0xff]  }
 0x463   : > { %v9428_v42 = vsel %vm5292_vm1, %v5225_v49, %v5359_v50  ;;  %vm5290_vm2 = vcmp.gt.f32.partialorder %v5223_v9, 0.0  ;;  %v5357_v1 = vmul.f32 0.1, %v5223_v9  ;;  %v4420_v30 = vpop.f32.mrf.mxu1  ;;  %v4083_v7 = vadd.f32 %v9194_v63, %v3430_v23 }
 0x464   : > { %5493 = vst [vmem:[#allocation4 + $0xb8] sm:$0xff] %v9428_v42  ;;  %v5226_v53 = vadd.f32 %v9309_v18, %v5152_v60  ;;  %v5613_v63 = vmax.f32 %v9440_v21, %v9442_v26  ;;  %v7632_v30 = vld [vmem:[%s9794_s5 + $0xa0] sm:$0xff]  }
 0x465   : > { %v9437_v36 = vsel %vm5290_vm2, %v5223_v9, %v5357_v1  ;;  %v7235_v14 = vpop.f32.mrf.mxu1  ;;  %v7630_v1 = vld [vmem:[%s9794_s5 + $0x60] sm:$0xff]   ;;  %6094 = vmatpush1.bf16.msra.mxu0 %v7632_v30 }
 0x466   : > { %5491 = vst [vmem:[#allocation4 + $0xa8] sm:$0xff] %v9437_v36  ;;  %vm5293_vm3 = vcmp.gt.f32.partialorder %v5226_v53, 0.0  ;;  %v5360_v28 = vmul.f32 0.1, %v5226_v53  ;;  %v4621_v45 = vadd.f32 %v7235_v14, %v9181_v39  ;;  %v9448_v37 = vld [vmem:[#allocation4 + $0x82] sm:$0xff]  ;;  %6903 = vmatprep.subr.bf16.mxu1 %v7630_v1  ;;  %6095 = vmatprep.subr.bf16.mxu0 %v10067_v22 }
 0x467   : > { %v4433_v11 = vpop.f32.mrf.mxu1  ;;  %v5647_v8 = vmax.f32 %v9403_v4, %v9448_v37  ;;  %v7633_v4 = vld [vmem:[%s9794_s5 + $0x58] sm:$0xff]   ;;  %v10085_v37 = vld [vmem:[#allocation38_spill] sm:$0xff] }
 0x468   : > { %v5427_v25 = vsel %vm5293_vm3, %v5226_v53, %v5360_v28  ;;  %v5158_v49 = vadd.f32 %v10082_v41, %v4621_v45  ;;  %v4619_v51 = vadd.f32 %v4433_v11, %v9188_v24  ;;  %v10084_v53 = vld [vmem:[#allocation36_spill] sm:$0xff] }
 0x469   : > { %5494 = vst [vmem:[#allocation4 + $0xc0] sm:$0xff] %v5427_v25  ;;  %v7236_v0 = vpop.f32.mrf.mxu1  ;;  %6096 = vmatpush1.bf16.msra.mxu0 %v7634_v47 }
 0x46a   : > { %v4622_v39 = vadd.f32 %v7236_v0, %v9192_v17  ;;  %v5232_v9 = vadd.f32 %v9309_v18, %v5158_v49  ;;  %v5156_v56 = vadd.f32 %v10083_v35, %v4619_v51  ;;  %v7631_v17 = vld [vmem:[%s9794_s5 + $0x20] sm:$0xff]   ;;  %v7635_v51 = vld [vmem:[%s9794_s5 + $0x18] sm:$0xff]   ;;  %6097 = vmatprep.subr.bf16.mxu0 %v10067_v22 }
 0x46b   : > { %v5628_v50 = vld [vmem:[#allocation4 + $0xb2] sm:$0xff]  ;;  %v4436_v60 = vpop.f32.mrf.mxu1  ;;  %6904 = vmatpush3.bf16.msra.mxu1 %v7631_v17  ;;  %v5637_v35 = vld [vmem:[#allocation4 + $0x7c] sm:$0xff] }
 0x46c   : > { %v9456_v6 = vld [vmem:[#allocation4 + $0xb4] sm:$0xff]  ;;  %v5629_v24 = vmax.f32 %v9420_v54, %v5628_v50  ;;  %v5159_v2 = vadd.f32 %v10084_v53, %v4622_v39  ;;  %v4620_v29 = vadd.f32 %v4436_v60, %v4083_v7  ;;  %vm5299_vm4 = vcmp.gt.f32.partialorder %v5232_v9, 0.0  ;;  %6905 = vmatprep.subr.bf16.mxu1 %v7633_v4 }
 0x46d   : > { %v9458_v48 = vld [vmem:[#allocation4 + $0xb6] sm:$0xff]  ;;  %v5366_v23 = vmul.f32 0.1, %v5232_v9  ;;  %v5230_v14 = vadd.f32 %v9309_v18, %v5156_v56  ;;  %v7239_v28 = vpop.f32.mrf.mxu1  ;;  %v5602_v45 = vld [vmem:[#allocation4 + $0xaa] sm:$0xff]  ;;  %v5638_v56 = vld [vmem:[#allocation4 + $0x7e] sm:$0xff] }
 0x46e   : > { %v5642_v54 = vmax.f32 %v9456_v6, %v9458_v48  ;;  %v5630_v13 = vmax.f32 %v5626_v57, %v5629_v24  ;;  %v5614_v11 = vld [vmem:[#allocation4 + $0xac] sm:$0xff]  ;;  %v5233_v25 = vadd.f32 %v9309_v18, %v5159_v2  ;;  %v5157_v41 = vadd.f32 %v10085_v37, %v4620_v29 }
 0x46f   : > { %v5615_v7 = vld [vmem:[#allocation4 + $0xae] sm:$0xff]  ;;  %v5603_v49 = vmax.f32 %v9437_v36, %v5602_v45  ;;  %v9490_v0 = vsel %vm5299_vm4, %v5232_v9, %v5366_v23  ;;  %vm5297_vm5 = vcmp.gt.f32.partialorder %v5230_v14, 0.0  ;;  %v5364_v57 = vmul.f32 0.1, %v5230_v14  ;;  %v4449_v39 = vpop.f32.mrf.mxu1  ;;  %6906 = vmatpush3.bf16.msra.mxu1 %v7635_v51 }
 0x470   : > { %5632 = vrot.lane.b32.xlu1 %v5630_v13, %s7679_s29  ;;  %v5616_v50 = vmax.f32 %v5614_v11, %v5615_v7  ;;  %5500 = vst [vmem:[#allocation4 + $0xf0] sm:$0xff] %v9490_v0  ;;  %vm5300_vm6 = vcmp.gt.f32.partialorder %v5233_v25, 0.0  ;;  %v5367_v36 = vmul.f32 0.1, %v5233_v25  ;;  %v5231_v6 = vadd.f32 %v9309_v18, %v5157_v41  ;;  %v5649_v48 = vld [vmem:[#allocation4 + $0xba] sm:$0xff] }
 0x471   : > { %v9496_v9 = vsel %vm5297_vm5, %v5230_v14, %v5364_v57  ;;  %v7240_v60 = vpop.f32.mrf.mxu1  ;;  %v5604_v24 = vmax.f32 %v5600_v27, %v5603_v49  ;;  %v5650_v1 = vmax.f32 %v9428_v42, %v5649_v48  ;;  %v5639_v27 = vmax.f32 %v5637_v35, %v5638_v56 }
 0x472   : > { %5498 = vst [vmem:[#allocation4 + $0xe0] sm:$0xff] %v9496_v9  ;;  %v5434_v17 = vsel %vm5300_vm6, %v5233_v25, %v5367_v36  ;;  %vm5298_vm7 = vcmp.gt.f32.partialorder %v5231_v6, 0.0  ;;  %v5365_v30 = vmul.f32 0.1, %v5231_v6  ;;  %v4626_v53 = vadd.f32 %v7240_v60, %v9205_v19 }
 0x473   : > { %5501 = vst [vmem:[#allocation4 + $0xf8] sm:$0xff] %v5434_v17  ;;  %v4452_v2 = vpop.f32.mrf.mxu1  ;;  %v5651_v29 = vmax.f32 %v5647_v8, %v5650_v1  ;;  %v5617_v23 = vmax.f32 %v5613_v63, %v5616_v50  ;;  %v5643_v19 = vmax.f32 %v5639_v27, %v5642_v54 }
 0x474   : > { %5606 = vrot.lane.b32.xlu1 %v5604_v24, %s7680_s16  ;;  %v9503_v4 = vsel %vm5298_vm7, %v5231_v6, %v5365_v30  ;;  %v5163_v42 = vadd.f32 %v9101_v59, %v4626_v53 }
 0x475   : > { %5499 = vst [vmem:[#allocation4 + $0xe8] sm:$0xff] %v9503_v4  ;;  %v7243_v47 = vpop.f32.mrf.mxu1  ;;  %5653 = vrot.lane.b32.xlu0 %v5651_v29, %s7675_s30  ;;  %5644 = vst.msk [vmem:[#allocation5 + $0x8] sm:$0xff] %vm5544_vm13, %v5643_v19 }
 0x476   : > { %v4629_v14 = vadd.f32 %v7243_v47, %v9215_v62  ;;  %v5237_v28 = vadd.f32 %v9309_v18, %v5163_v42 }
 0x477   : > { %v4465_v8 = vpop.f32.mrf.mxu1 }
 0x478   : > { %5619 = vrot.lane.b32.xlu1 %v5617_v23, %s7681_s19  ;;  %v5166_v59 = vadd.f32 %v9113_v12, %v4629_v14  ;;  %v4627_v13 = vadd.f32 %v4465_v8, %v9219_v46  ;;  %vm5304_vm8 = vcmp.gt.f32.partialorder %v5237_v28, 0.0  ;;  %v5371_v45 = vmul.f32 0.1, %v5237_v28 }
 0x479   : > { %v7244_v11 = vpop.f32.mrf.mxu1 }
 0x47a   : > { %v5240_v21 = vadd.f32 %v9309_v18, %v5166_v59  ;;  %v5164_v26 = vadd.f32 %v9121_v10, %v4627_v13  ;;  %v5438_v62 = vsel %vm5304_vm8, %v5237_v28, %v5371_v45 }
 0x47b   : > { %v4468_v63 = vpop.f32.mrf.mxu1  ;;  %5505 = vst [vmem:[#allocation4 + $0x118] sm:$0xff] %v5438_v62 }
 0x47c   : > { %vm5307_vm9 = vcmp.gt.f32.partialorder %v5240_v21, 0.0  ;;  %v5374_v54 = vmul.f32 0.1, %v5240_v21  ;;  %v5238_v7 = vadd.f32 %v9309_v18, %v5164_v26  ;;  %v4628_v25 = vadd.f32 %v4468_v63, %v9225_v43  ;;  %v5658_v35 = vld [vmem:[#allocation4 + $0xe2] sm:$0xff]  ;;  %v5682_v8 = vld [vmem:[#allocation4 + $0xea] sm:$0xff] }
 0x47d   : > { %v7247_v37 = vpop.f32.mrf.mxu1  ;;  %v5659_v1 = vmax.f32 %v9496_v9, %v5658_v35  ;;  %v5669_v17 = vld [vmem:[#allocation4 + $0xe4] sm:$0xff]  ;;  %v7636_v9 = vld [vmem:[%s9794_s5 + $0x90] sm:$0xff]  }
 0x47e   : > { %v5441_v12 = vsel %vm5307_vm9, %v5240_v21, %v5374_v54  ;;  %vm5305_vm10 = vcmp.gt.f32.partialorder %v5238_v7, 0.0  ;;  %v5372_v46 = vmul.f32 0.1, %v5238_v7  ;;  %v4633_v41 = vadd.f32 %v7247_v37, %v9229_v44  ;;  %v5670_v30 = vld [vmem:[#allocation4 + $0xe6] sm:$0xff]  ;;  %6098 = vmatpush1.bf16.msra.mxu0 %v7636_v9 }
 0x47f   : > { %5508 = vst [vmem:[#allocation4 + $0x130] sm:$0xff] %v5441_v12  ;;  %v5165_v49 = vadd.f32 %v9131_v33, %v4628_v25  ;;  %v4481_v51 = vpop.f32.mrf.mxu1  ;;  %v5671_v28 = vmax.f32 %v5669_v17, %v5670_v30  ;;  %v5693_v21 = vld [vmem:[#allocation4 + $0xec] sm:$0xff]  ;;  %6099 = vmatprep.subr.bf16.mxu0 %v10067_v22 }
 0x480   : > { %v9523_v10 = vsel %vm5305_vm10, %v5238_v7, %v5372_v46  ;;  %v5170_v57 = vadd.f32 %v9137_v32, %v4633_v41 }
 0x481   : > { %5506 = vst [vmem:[#allocation4 + $0x120] sm:$0xff] %v9523_v10  ;;  %v5239_v39 = vadd.f32 %v9309_v18, %v5165_v49  ;;  %v7248_v50 = vpop.f32.mrf.mxu1 }
 0x482   : > { %v5244_v43 = vadd.f32 %v9309_v18, %v5170_v57  ;;  %v4634_v36 = vadd.f32 %v7248_v50, %v9233_v61  ;;  %v5706_v57 = vld [vmem:[#allocation4 + $0xf2] sm:$0xff] }
 0x483   : > { %vm5306_vm11 = vcmp.gt.f32.partialorder %v5239_v39, 0.0  ;;  %v5373_v6 = vmul.f32 0.1, %v5239_v39  ;;  %v4484_v44 = vpop.f32.mrf.mxu1 }
 0x484   : > { %vm5311_vm12 = vcmp.gt.f32.partialorder %v5244_v43, 0.0  ;;  %v5378_v48 = vmul.f32 0.1, %v5244_v43  ;;  %v5171_v33 = vadd.f32 %v9153_v38, %v4634_v36 }
 0x485   : > { %v9531_v56 = vsel %vm5306_vm11, %v5239_v39, %v5373_v6  ;;  %v7251_v32 = vpop.f32.mrf.mxu1 }
 0x486   : > { %5507 = vst [vmem:[#allocation4 + $0x128] sm:$0xff] %v9531_v56  ;;  %v9534_v60 = vsel %vm5311_vm12, %v5244_v43, %v5378_v48  ;;  %v5245_v24 = vadd.f32 %v9309_v18, %v5171_v33  ;;  %v5707_v33 = vmax.f32 %v9490_v0, %v5706_v57 }
 0x487   : > { %5512 = vst [vmem:[#allocation4 + $0x150] sm:$0xff] %v9534_v60  ;;  %v4497_v61 = vpop.f32.mrf.mxu1 }
 0x488   : > { %vm5312_vm14 = vcmp.gt.f32.partialorder %v5245_v24, 0.0  ;;  %v5379_v53 = vmul.f32 0.1, %v5245_v24  ;;  %v4635_v38 = vadd.f32 %v4497_v61, %v9239_v15  ;;  %v5661_v2 = vld [vmem:[#allocation4 + $0x11a] sm:$0xff] }
 0x489   : > { %v5672_v29 = vld [vmem:[#allocation4 + $0x11c] sm:$0xff]  ;;  %v7252_v42 = vpop.f32.mrf.mxu1  ;;  %v5662_v47 = vmax.f32 %v5438_v62, %v5661_v2 }
 0x48a   : > { %v5673_v27 = vld [vmem:[#allocation4 + $0x11e] sm:$0xff]  ;;  %v9540_v19 = vsel %vm5312_vm14, %v5245_v24, %v5379_v53  ;;  %v5172_v14 = vadd.f32 %v9172_v20, %v4635_v38  ;;  %v5683_v20 = vmax.f32 %v9503_v4, %v5682_v8  ;;  %vm5557_vm14 = vcmask 261248  }
 0x48b   : > { %v5674_v23 = vmax.f32 %v5672_v29, %v5673_v27  ;;  %5513 = vst [vmem:[#allocation4 + $0x158] sm:$0xff] %v9540_v19  ;;  %v4500_v59 = vpop.f32.mrf.mxu1  ;;  %v5663_v15 = vmax.f32 %v5659_v1, %v5662_v47  ;;  %v7638_v4 = vld [vmem:[%s9794_s5 + $0x10] sm:$0xff]  }
 0x48c   : > { %v5246_v13 = vadd.f32 %v9309_v18, %v5172_v14  ;;  %v4636_v45 = vadd.f32 %v4500_v59, %v9247_v5  ;;  %v5694_v5 = vld [vmem:[#allocation4 + $0xee] sm:$0xff]  ;;  %v7637_v18 = vld [vmem:[%s9794_s5 + $0x50] sm:$0xff]  }
 0x48d   : > { %v5675_v11 = vmax.f32 %v5671_v28, %v5674_v23  ;;  %v7255_v26 = vpop.f32.mrf.mxu1  ;;  %5665 = vrot.lane.b32.xlu1 %v5663_v15, %s7676_s12  ;;  %v5685_v62 = vld [vmem:[#allocation4 + $0x122] sm:$0xff]  ;;  %v5709_v39 = vld [vmem:[#allocation4 + $0x12a] sm:$0xff]  ;;  %6907 = vmatprep.subr.bf16.mxu1 %v7637_v18 }
 0x48e   : > { %v5696_v63 = vld [vmem:[#allocation4 + $0x124] sm:$0xff]  ;;  %vm5313_vm15 = vcmp.gt.f32.partialorder %v5246_v13, 0.0  ;;  %v5380_v7 = vmul.f32 0.1, %v5246_v13  ;;  %v5173_v25 = vadd.f32 %v9190_v31, %v4636_v45  ;;  %v4641_v37 = vadd.f32 %v7255_v26, %v9249_v16  ;;  %6908 = vmatpush3.bf16.msra.mxu1 %v7638_v4  ;;  %v10089_v4 = vld [vmem:[#allocation29_spill] sm:$0xff] }
 0x48f   : > { %v5697_v54 = vld [vmem:[#allocation4 + $0x126] sm:$0xff]  ;;  %5677 = vrot.lane.b32.xlu0 %v5675_v11, %s7677_s14  ;;  %v4513_v12 = vpop.f32.mrf.mxu1  ;;  %v5686_v46 = vmax.f32 %v9523_v10, %v5685_v62  ;;  %v5695_v10 = vmax.f32 %v5693_v21, %v5694_v5  ;;  %v5710_v35 = vmax.f32 %v9531_v56, %v5709_v39  ;;  %v10090_v39 = vld [vmem:[#allocation42_spill] sm:$0xff] }
 0x490   : > { %v5698_v41 = vmax.f32 %v5696_v63, %v5697_v54  ;;  %v9562_v49 = vsel %vm5313_vm15, %v5246_v13, %v5380_v7  ;;  %v9567_v31 = vld [vmem:[%s9793_s4] ss:$0 sm:$0xff]  ;;  %v5178_v16 = vadd.f32 %v9196_v55, %v4641_v37  ;;  %v7640_v63 = vld [vmem:[%s9794_s5 + $0x48] sm:$0xff]   ;;  %vm5570_vm15 = vcmask 392448  }
 0x491   : > { %v5247_v51 = vadd.f32 %v9567_v31, %v5173_v25  ;;  %5514 = vst [vmem:[#allocation4 + $0x160] sm:$0xff] %v9562_v49  ;;  %v7256_v50 = vpop.f32.mrf.mxu1  ;;  %v5687_v43 = vmax.f32 %v5683_v20, %v5686_v46  ;;  %v10087_v21 = vld [vmem:[#allocation48_spill] sm:$0xff]  ;;  %v7641_v54 = vld [vmem:[%s9794_s5 + $0x8] sm:$0xff]   ;;  %6909 = vmatprep.subr.bf16.mxu1 %v7640_v63 }
 0x492   : > { %v4642_v6 = vadd.f32 %v7256_v50, %v9257_v52  ;;  %v5252_v44 = vadd.f32 %v9567_v31, %v5178_v16  ;;  %v5699_v61 = vmax.f32 %v5695_v10, %v5698_v41  ;;  %v5711_v52 = vmax.f32 %v5707_v33, %v5710_v35  ;;  %v9589_v42 = vld [vmem:[#allocation4 + $0x152] sm:$0xff]  ;;  %v10088_v5 = vld [vmem:[#allocation40_spill] sm:$0xff]  ;;  %6910 = vmatpush3.bf16.msra.mxu1 %v7641_v54 }
 0x493   : > { %vm5314_vm0 = vcmp.gt.f32.partialorder %v5247_v51, 0.0  ;;  %v5381_v36 = vmul.f32 0.1, %v5247_v51  ;;  %5689 = vrot.lane.b32.xlu0 %v5687_v43, %s7678_s15  ;;  %v4516_v48 = vpop.f32.mrf.mxu1  ;;  %v9594_v14 = vld [vmem:[#allocation4 + $0x154] sm:$0xff]  ;;  %v5719_v11 = vmax.f32 %v9534_v60, %v9589_v42  ;;  %v7642_v33 = vld [vmem:[%s9794_s5 + $0x40] sm:$0xff]  }
 0x494   : > { %v5179_v55 = vadd.f32 %v9209_v58, %v4642_v6  ;;  %v4640_v24 = vadd.f32 %v4516_v48, %v9261_v34  ;;  %vm5319_vm1 = vcmp.gt.f32.partialorder %v5252_v44, 0.0  ;;  %v5386_v1 = vmul.f32 0.1, %v5252_v44  ;;  %v9596_v28 = vld [vmem:[#allocation4 + $0x156] sm:$0xff]  ;;  %6911 = vmatprep.subr.bf16.mxu1 %v7642_v33 }
 0x495   : > { %v5448_v32 = vsel %vm5314_vm0, %v5247_v51, %v5381_v36  ;;  %v7259_v17 = vpop.f32.mrf.mxu1  ;;  %v5731_v62 = vmax.f32 %v9594_v14, %v9596_v28  ;;  %v10091_v36 = vld [vmem:[#allocation31_spill] sm:$0xff]  ;;  %vm5583_vm0 = vcmask 523648  }
 0x496   : > { %5515 = vst [vmem:[#allocation4 + $0x168] sm:$0xff] %v5448_v32  ;;  %v5253_v30 = vadd.f32 %v9567_v31, %v5179_v55  ;;  %v5177_v53 = vadd.f32 %v9217_v3, %v4640_v24  ;;  %v9581_v38 = vsel %vm5319_vm1, %v5252_v44, %v5386_v1  ;;  %v10086_v3 = vld [vmem:[#allocation23_spill] sm:$0xff]  ;;  %v10092_v24 = vld [vmem:[#allocation25_spill] sm:$0xff]  ;;  %vm5596_vm1 = vcmask 654848  }
 0x497   : > { %5701 = vrot.lane.b32.xlu0 %v5699_v61, %s7680_s16  ;;  %v4529_v0 = vpop.f32.mrf.mxu1  ;;  %5520 = vst [vmem:[#allocation4 + $0x190] sm:$0xff] %v9581_v38  ;;  %v10093_v1 = vld [vmem:[#allocation37_spill] sm:$0xff] }
 0x498   : > { %vm5320_vm2 = vcmp.gt.f32.partialorder %v5253_v30, 0.0  ;;  %v5387_v58 = vmul.f32 0.1, %v5253_v30  ;;  %v5251_v34 = vadd.f32 %v9567_v31, %v5177_v53  ;;  %v4643_v56 = vadd.f32 %v4529_v0, %v9265_v40  ;;  %v7639_v40 = vld [vmem:[%s9794_s5 + $0x88] sm:$0xff]   ;;  %v5749_v9 = vld [vmem:[#allocation4 + $0x15c] sm:$0xff] }
 0x499   : > { %v7260_v2 = vpop.f32.mrf.mxu1  ;;  %v5750_v59 = vld [vmem:[#allocation4 + $0x15e] sm:$0xff]  ;;  %6100 = vmatpush1.bf16.msra.mxu0 %v7639_v40 }
 0x49a   : > { %v9587_v29 = vsel %vm5320_vm2, %v5253_v30, %v5387_v58  ;;  %vm5318_vm3 = vcmp.gt.f32.partialorder %v5251_v34, 0.0  ;;  %v5385_v27 = vmul.f32 0.1, %v5251_v34  ;;  %v5180_v47 = vadd.f32 %v10086_v3, %v4643_v56  ;;  %v5738_v45 = vld [vmem:[#allocation4 + $0x15a] sm:$0xff]  ;;  %6101 = vmatprep.subr.bf16.mxu0 %v10067_v22 }
 0x49b   : > { %5521 = vst [vmem:[#allocation4 + $0x198] sm:$0xff] %v9587_v29  ;;  %5713 = vrot.lane.b32.xlu0 %v5711_v52, %s7681_s19  ;;  %v4532_v23 = vpop.f32.mrf.mxu1  ;;  %v5751_v25 = vmax.f32 %v5749_v9, %v5750_v59  ;;  %v5739_v12 = vmax.f32 %v9540_v19, %v5738_v45  ;;  %v10094_v2 = vld [vmem:[#allocation27_spill] sm:$0xff]  ;;  %v7644_v45 = vld [vmem:[%s9794_s5 + $0x80] sm:$0xff]   ;;  %vm5609_vm2 = vcmask 786048  }
 0x49c   : > { %v9601_v8 = vsel %vm5318_vm3, %v5251_v34, %v5385_v27  ;;  %v5254_v15 = vadd.f32 %v9567_v31, %v5180_v47  ;;  %vm5622_vm3 = vcmask 917248  }
 0x49d   : > { %5519 = vst [vmem:[#allocation4 + $0x188] sm:$0xff] %v9601_v8  ;;  %v7263_v13 = vpop.f32.mrf.mxu1  ;;  %v9608_v20 = vld [vmem:[#allocation4 + $0x162] sm:$0xff]  ;;  %6102 = vmatpush1.bf16.msra.mxu0 %v7644_v45 }
 0x49e   : > { %v4649_v26 = vadd.f32 %v7263_v13, %v10087_v21  ;;  %vm5321_vm4 = vcmp.gt.f32.partialorder %v5254_v15, 0.0  ;;  %v5388_v60 = vmul.f32 0.1, %v5254_v15  ;;  %v5763_v51 = vmax.f32 %v9562_v49, %v9608_v20  ;;  %v7643_v49 = vld [vmem:[%s9794_s5] sm:$0xff]   ;;  %6117 = vmatprep.subr.bf16.mxu0 %v10067_v22  ;;  %v10099_v22 = vld [vmem:[#allocation33_spill] sm:$0xff] }
 0x49f   : > { %v4545_v7 = vpop.f32.mrf.mxu1  ;;  %6912 = vmatpush3.bf16.msra.mxu1 %v7643_v49  ;;  %v10095_v21 = vld [vmem:[#allocation44_spill] sm:$0xff] }
 0x4a0   : > { %v5186_v18 = vadd.f32 %v10088_v5, %v4649_v26  ;;  %v4647_v37 = vadd.f32 %v4545_v7, %v10089_v4  ;;  %v5455_v46 = vsel %vm5321_vm4, %v5254_v15, %v5388_v60  ;;  %v10097_v4 = vld [vmem:[#allocation47_spill] sm:$0xff]  ;;  %vm5635_vm4 = vcmask 1048448  }
 0x4a1   : > { %v7264_v41 = vpop.f32.mrf.mxu1  ;;  %5522 = vst [vmem:[#allocation4 + $0x1a0] sm:$0xff] %v5455_v46 }
 0x4a2   : > { %v5260_v57 = vadd.f32 %v9567_v31, %v5186_v18  ;;  %v5184_v16 = vadd.f32 %v10090_v39, %v4647_v37  ;;  %v5752_v50 = vld [vmem:[#allocation4 + $0x194] sm:$0xff]  ;;  %v4650_v6 = vadd.f32 %v7264_v41, %v10091_v36 }
 0x4a3   : > { %v5753_v43 = vld [vmem:[#allocation4 + $0x196] sm:$0xff]  ;;  %v4548_v44 = vpop.f32.mrf.mxu1 }
 0x4a4   : > { %v5741_v10 = vld [vmem:[#allocation4 + $0x192] sm:$0xff]  ;;  %v5754_v48 = vmax.f32 %v5752_v50, %v5753_v43  ;;  %vm5327_vm5 = vcmp.gt.f32.partialorder %v5260_v57, 0.0  ;;  %v5394_v35 = vmul.f32 0.1, %v5260_v57  ;;  %v5258_v32 = vadd.f32 %v9567_v31, %v5184_v16  ;;  %v5721_v55 = vld [vmem:[#allocation4 + $0x18a] sm:$0xff] }
 0x4a5   : > { %v5742_v19 = vmax.f32 %v9581_v38, %v5741_v10  ;;  %v5187_v61 = vadd.f32 %v10092_v24, %v4650_v6  ;;  %v4648_v17 = vadd.f32 %v4548_v44, %v10093_v1  ;;  %v7267_v52 = vpop.f32.mrf.mxu1  ;;  %v5732_v38 = vld [vmem:[#allocation4 + $0x18c] sm:$0xff]  ;;  %v5722_v3 = vmax.f32 %v9601_v8, %v5721_v55  ;;  %v5117_v6 = vpop.f32.mrf.mxu0 }
 0x4a6   : > { %v5755_v30 = vmax.f32 %v5751_v25, %v5754_v48  ;;  %v5733_v0 = vld [vmem:[#allocation4 + $0x18e] sm:$0xff]  ;;  %v9637_v58 = vsel %vm5327_vm5, %v5260_v57, %v5394_v35  ;;  %vm5325_vm6 = vcmp.gt.f32.partialorder %v5258_v32, 0.0  ;;  %v5392_v34 = vmul.f32 0.1, %v5258_v32 }
 0x4a7   : > { %v5743_v53 = vmax.f32 %v5739_v12, %v5742_v19  ;;  %5528 = vst [vmem:[#allocation4 + $0x1d0] sm:$0xff] %v9637_v58  ;;  %v5261_v56 = vadd.f32 %v9567_v31, %v5187_v61  ;;  %v5185_v27 = vadd.f32 %v10094_v2, %v4648_v17  ;;  %v4561_v42 = vpop.f32.mrf.mxu1  ;;  %v5734_v23 = vmax.f32 %v5732_v38, %v5733_v0  ;;  %v10101_v10 = vld [vmem:[#allocation61_spill] sm:$0xff] }
 0x4a8   : > { %5757 = vrot.lane.b32.xlu1 %v5755_v30, %s7676_s12  ;;  %v9645_v47 = vsel %vm5325_vm6, %v5258_v32, %v5392_v34  ;;  %v5723_v15 = vmax.f32 %v5719_v11, %v5722_v3  ;;  %v5765_v13 = vld [vmem:[#allocation4 + $0x19a] sm:$0xff]  ;;  %v7645_v32 = vld [vmem:[%s9794_s5 + $0xc0] sm:$0xff]  }
 0x4a9   : > { %5745 = vrot.lane.b32.xlu0 %v5743_v53, %s7675_s30  ;;  %5526 = vst [vmem:[#allocation4 + $0x1c0] sm:$0xff] %v9645_v47  ;;  %vm5328_vm7 = vcmp.gt.f32.partialorder %v5261_v56, 0.0  ;;  %v5395_v40 = vmul.f32 0.1, %v5261_v56  ;;  %v5259_v9 = vadd.f32 %v9567_v31, %v5185_v27  ;;  %v7268_v59 = vpop.f32.mrf.mxu1  ;;  %v5766_v8 = vmax.f32 %v9587_v29, %v5765_v13  ;;  %v10096_v11 = vld [vmem:[#allocation46_spill] sm:$0xff]  ;;  %6118 = vmatpush2.bf16.msra.mxu0 %v7645_v32  ;;  %v7648_v32 = vld [vmem:[%s9796_s7 + $0x28] sm:$0xff]  }
 0x4aa   : > { %v4654_v26 = vadd.f32 %v7268_v59, %v10095_v21  ;;  %v5735_v60 = vmax.f32 %v5731_v62, %v5734_v23  ;;  %v10098_v62 = vld [vmem:[#allocation51_spill] sm:$0xff] }
 0x4ab   : > { %v5462_v20 = vsel %vm5328_vm7, %v5261_v56, %v5395_v40  ;;  %vm5326_vm8 = vcmp.gt.f32.partialorder %v5259_v9, 0.0  ;;  %v5393_v63 = vmul.f32 0.1, %v5259_v9  ;;  %v4564_v54 = vpop.f32.mrf.mxu1  ;;  %v5767_v29 = vmax.f32 %v5763_v51, %v5766_v8  ;;  %v10100_v51 = vld [vmem:[#allocation41_spill] sm:$0xff] }
 0x4ac   : > { %5529 = vst [vmem:[#allocation4 + $0x1d8] sm:$0xff] %v5462_v20  ;;  %v5191_v7 = vadd.f32 %v10096_v11, %v4654_v26  ;;  %5736 = vst.msk [vmem:[#allocation5 + $0x10] sm:$0xff] %vm5544_vm13, %v5735_v60 }
 0x4ad   : > { %5725 = vrot.lane.b32.xlu0 %v5723_v15, %s7679_s29  ;;  %v9660_v25 = vsel %vm5326_vm8, %v5259_v9, %v5393_v63  ;;  %v7271_v5 = vpop.f32.mrf.mxu1 }
 0x4ae   : > { %5527 = vst [vmem:[#allocation4 + $0x1c8] sm:$0xff] %v9660_v25  ;;  %v5265_v18 = vadd.f32 %v9567_v31, %v5191_v7  ;;  %v4657_v37 = vadd.f32 %v7271_v5, %v10097_v4 }
 0x4af   : > { %v4577_v14 = vpop.f32.mrf.mxu1 }
 0x4b0   : > { %vm5332_vm9 = vcmp.gt.f32.partialorder %v5265_v18, 0.0  ;;  %v5399_v28 = vmul.f32 0.1, %v5265_v18  ;;  %v4655_v12 = vadd.f32 %v4577_v14, %v10098_v62  ;;  %v5194_v46 = vadd.f32 %v10099_v22, %v4657_v37 }
 0x4b1   : > { %5769 = vrot.lane.b32.xlu0 %v5767_v29, %s7677_s14  ;;  %v7272_v41 = vpop.f32.mrf.mxu1 }
 0x4b2   : > { %v5466_v57 = vsel %vm5332_vm9, %v5265_v18, %v5399_v28  ;;  %v5192_v39 = vadd.f32 %v10100_v51, %v4655_v12  ;;  %v5268_v16 = vadd.f32 %v9567_v31, %v5194_v46 }
 0x4b3   : > { %5533 = vst [vmem:[#allocation4 + $0x1f8] sm:$0xff] %v5466_v57  ;;  %v4580_v50 = vpop.f32.mrf.mxu1  ;;  %v5822_v56 = vld [vmem:[#allocation4 + $0x1d2] sm:$0xff] }
 0x4b4   : > { %v5266_v43 = vadd.f32 %v9567_v31, %v5192_v39  ;;  %v4656_v36 = vadd.f32 %v4580_v50, %v10101_v10  ;;  %vm5335_vm10 = vcmp.gt.f32.partialorder %v5268_v16, 0.0  ;;  %v5402_v44 = vmul.f32 0.1, %v5268_v16 }
 0x4b5   : > { %v5774_v61 = vld [vmem:[#allocation4 + $0x1c2] sm:$0xff]  ;;  %v5798_v2 = vld [vmem:[#allocation4 + $0x1ca] sm:$0xff]  ;;  %v5823_v40 = vmax.f32 %v9637_v58, %v5822_v56 }
 0x4b6   : > { %vm5333_vm11 = vcmp.gt.f32.partialorder %v5266_v43, 0.0  ;;  %v5400_v48 = vmul.f32 0.1, %v5266_v43  ;;  %v5193_v19 = vadd.f32 %v5117_v6, %v4656_v36  ;;  %v5469_v33 = vsel %vm5335_vm10, %v5268_v16, %v5402_v44  ;;  %v5785_v1 = vld [vmem:[#allocation4 + $0x1c4] sm:$0xff]  ;;  %v5809_v3 = vld [vmem:[#allocation4 + $0x1cc] sm:$0xff] }
 0x4b7   : > { %5536 = vst [vmem:[#allocation4 + $0x210] sm:$0xff] %v5469_v33  ;;  %v5786_v17 = vld [vmem:[#allocation4 + $0x1c6] sm:$0xff]  ;;  %v5775_v38 = vmax.f32 %v9645_v47, %v5774_v61  ;;  %v5810_v23 = vld [vmem:[#allocation4 + $0x1ce] sm:$0xff]  ;;  %v5799_v47 = vmax.f32 %v9660_v25, %v5798_v2  ;;  %v7651_v61 = vld [vmem:[%s9796_s7 + $0x10] sm:$0xff]  }
 0x4b8   : > { %v5467_v49 = vsel %vm5333_vm11, %v5266_v43, %v5400_v48  ;;  %v5267_v35 = vadd.f32 %v9567_v31, %v5193_v19  ;;  %v5787_v31 = vmax.f32 %v5785_v1, %v5786_v17  ;;  %v5811_v26 = vmax.f32 %v5809_v3, %v5810_v23  ;;  %v7646_v33 = vld [vmem:[%s9796_s7 + $0x38] sm:$0xff]   ;;  %v7652_v1 = vld [vmem:[%s9796_s7 + $0x8] sm:$0xff]   ;;  %v7653_v17 = vld [vmem:[%s9796_s7] sm:$0xff]  }
 0x4b9   : > { %5534 = vst [vmem:[#allocation4 + $0x200] sm:$0xff] %v5467_v49  ;;  %v6640_v3 = vld [vmem:[%s9795_s6] ss:$0 sm:$0xff] }
 0x4ba   : > { %vm5334_vm12 = vcmp.gt.f32.partialorder %v5267_v35, 0.0  ;;  %v5401_v55 = vmul.f32 0.1, %v5267_v35 }
 0x4bc   : > { %v5468_v24 = vsel %vm5334_vm12, %v5267_v35, %v5401_v55  ;;  %v7647_v35 = vld [vmem:[%s9796_s7 + $0x30] sm:$0xff]   ;;  %v7649_v55 = vld [vmem:[%s9796_s7 + $0x20] sm:$0xff]  }
 0x4bd   : > { %5535 = vst [vmem:[#allocation4 + $0x208] sm:$0xff] %v5468_v24 }
 0x4c0   : > { %v5777_v52 = vld [vmem:[#allocation4 + $0x1fa] sm:$0xff] }
 0x4c1   : > { %v5788_v30 = vld [vmem:[#allocation4 + $0x1fc] sm:$0xff]  ;;  %v5778_v0 = vmax.f32 %v5466_v57, %v5777_v52 }
 0x4c2   : > { %v5789_v53 = vld [vmem:[#allocation4 + $0x1fe] sm:$0xff] }
 0x4c3   : > { %v5790_v34 = vmax.f32 %v5788_v30, %v5789_v53  ;;  %v5779_v27 = vmax.f32 %v5775_v38, %v5778_v0  ;;  %v7654_v52 = vld [vmem:[%s9798_s9 + $0x38] sm:$0xff]   ;;  %v7655_v30 = vld [vmem:[%s9798_s9 + $0x30] sm:$0xff]   ;;  %v7656_v53 = vld [vmem:[%s9798_s9 + $0x28] sm:$0xff]  }
 0x4c4   : > { %v5825_v9 = vld [vmem:[#allocation4 + $0x20a] sm:$0xff]  ;;  %v5801_v59 = vld [vmem:[#allocation4 + $0x202] sm:$0xff] }
 0x4c5   : > { %v5791_v42 = vmax.f32 %v5787_v31, %v5790_v34  ;;  %v5812_v15 = vld [vmem:[#allocation4 + $0x204] sm:$0xff]  ;;  %5781 = vrot.lane.b32.xlu1 %v5779_v27, %s7678_s15  ;;  %v5826_v13 = vmax.f32 %v5468_v24, %v5825_v9  ;;  %v5802_v45 = vmax.f32 %v5467_v49, %v5801_v59  ;;  %v7682_v49 = vmov 0.0   ;;  %v7659_v31 = vld [vmem:[%s9798_s9 + $0x10] sm:$0xff]  }
 0x4c6   : > { %v5813_v21 = vld [vmem:[#allocation4 + $0x206] sm:$0xff]  ;;  %7357 = vmatprep.subr.bf16.mxu1 %v7682_v49  ;;  %7377 = vmatprep.subr.bf16.mxu0 %v7682_v49 }
 0x4c7   : > { %5793 = vrot.lane.b32.xlu0 %v5791_v42, %s7680_s16  ;;  %v5814_v8 = vmax.f32 %v5812_v15, %v5813_v21  ;;  %v5827_v20 = vmax.f32 %v5823_v40, %v5826_v13  ;;  %v5803_v63 = vmax.f32 %v5799_v47, %v5802_v45  ;;  %v7650_v24 = vld [vmem:[%s9796_s7 + $0x18] sm:$0xff]   ;;  %v7657_v38 = vld [vmem:[%s9798_s9 + $0x20] sm:$0xff]  }
 0x4c8   : > { %v7658_v0 = vld [vmem:[%s9798_s9 + $0x18] sm:$0xff]  }
 0x4c9   : > { %v5815_v54 = vmax.f32 %v5811_v26, %v5814_v8  ;;  %5828 = vst.msk [vmem:[#allocation5 + $0x18] sm:$0xff] %vm5544_vm13, %v5827_v20  ;;  %v5555_v58 = vpop.permute.xlu0 %5554  ;;  %5805 = vrot.lane.b32.xlu1 %v5803_v63, %s7681_s19  ;;  %v7660_v26 = vld [vmem:[%s9798_s9 + $0x8] sm:$0xff]   ;;  %v7661_v8 = vld [vmem:[%s9798_s9] sm:$0xff]  }
 0x4ca   : > { %5558 = vst.msk [vmem:[#allocation5] sm:$0xff] %vm5557_vm14, %v5555_v58  ;;  %v6667_v20 = vld [vmem:[%s9797_s8] ss:$0 sm:$0xff] }
 0x4cb   : > { %5817 = vrot.lane.b32.xlu0 %v5815_v54, %s7679_s29  ;;  %v5568_v60 = vpop.permute.xlu1 %5567  ;;  %s6417_s29 = sshll.u32 %s10103_s18, 3 }
 0x4cc   : > { %5571 = vst.msk [vmem:[#allocation5] sm:$0xff] %vm5570_vm15, %v5568_v60  ;;  %s384_s22 = scalar_lea.vmem %s9800_s11, %s6417_s29 }
 0x4cf   : > { %v5581_v11 = vpop.permute.xlu1 %5580 }
 0x4d0   : > { %5584 = vst.msk [vmem:[#allocation5] sm:$0xff] %vm5583_vm0, %v5581_v11  ;;  %v5832_v7 = vld [vmem:[#allocation5 + $0x18] sm:$0xff] }
 0x4d1   : > { %v5836_v25 = vpack.c.bf16 %v5832_v7, %v5832_v7 }
 0x4d3   : > { %6666 = vmatprep.mubr.msk.bf16.mxu0 %vm5544_vm13, %v5836_v25  ;;  %v5594_v5 = vpop.permute.xlu1 %5593  ;;  %vm7683_vm13 = vmmov 0  }
 0x4d4   : > { %5597 = vst.msk [vmem:[#allocation5] sm:$0xff] %vm5596_vm1, %v5594_v5 }
 0x4e2   : > { %v5633_v29 = vpop.permute.xlu1 %5632 }
 0x4e6   : > { %v5607_v18 = vpop.permute.xlu1 %5606 }
 0x4e7   : > { %5610 = vst.msk [vmem:[#allocation5] sm:$0xff] %vm5609_vm2, %v5607_v18  ;;  %v5654_v4 = vpop.permute.xlu0 %5653 }
 0x4e8   : > { %5656 = vst.msk [vmem:[#allocation5 + $0x8] sm:$0xff] %vm5557_vm14, %v5654_v4 }
 0x4ea   : > { %v5620_v37 = vpop.permute.xlu1 %5619 }
 0x4eb   : > { %5623 = vst.msk [vmem:[#allocation5] sm:$0xff] %vm5622_vm3, %v5620_v37 }
 0x4ec   : > { %5636 = vst.msk [vmem:[#allocation5] sm:$0xff] %vm5635_vm4, %v5633_v29  ;;  %v6676_v29 = vld [vmem:[%s9799_s10] ss:$0 sm:$0xff] }
 0x4f3   : > { %v5829_v39 = vld [vmem:[#allocation5] sm:$0xff] }
 0x4f4   : > { %v5833_v43 = vpack.c.bf16 %v5829_v39, %v5829_v39 }
 0x4ff   : > { %v5666_v14 = vpop.permute.xlu1 %5665 }
 0x500   : > { %5668 = vst.msk [vmem:[#allocation5 + $0x8] sm:$0xff] %vm5570_vm15, %v5666_v14 }
 0x501   : > { %v5678_v28 = vpop.permute.xlu0 %5677 }
 0x502   : > { %5680 = vst.msk [vmem:[#allocation5 + $0x8] sm:$0xff] %vm5583_vm0, %v5678_v28 }
 0x505   : > { %v5690_v62 = vpop.permute.xlu0 %5689 }
 0x506   : > { %5692 = vst.msk [vmem:[#allocation5 + $0x8] sm:$0xff] %vm5596_vm1, %v5690_v62 }
 0x509   : > { %v5702_v12 = vpop.permute.xlu0 %5701 }
 0x50a   : > { %5704 = vst.msk [vmem:[#allocation5 + $0x8] sm:$0xff] %vm5609_vm2, %v5702_v12 }
 0x50d   : > { %v5714_v22 = vpop.permute.xlu0 %5713 }
 0x50e   : > { %5716 = vst.msk [vmem:[#allocation5 + $0x8] sm:$0xff] %vm5622_vm3, %v5714_v22 }
 0x51a   : > { %v5758_v46 = vpop.permute.xlu1 %5757 }
 0x51b   : > { %v5746_v41 = vpop.permute.xlu0 %5745 }
 0x51c   : > { %5748 = vst.msk [vmem:[#allocation5 + $0x10] sm:$0xff] %vm5557_vm14, %v5746_v41 }
 0x51d   : > { %5760 = vst.msk [vmem:[#allocation5 + $0x10] sm:$0xff] %vm5570_vm15, %v5758_v46 }
 0x51f   : > { %v5726_v57 = vpop.permute.xlu0 %5725 }
 0x520   : > { %5728 = vst.msk [vmem:[#allocation5 + $0x8] sm:$0xff] %vm5635_vm4, %v5726_v57 }
 0x523   : > { %v5770_v51 = vpop.permute.xlu0 %5769 }
 0x524   : > { %5772 = vst.msk [vmem:[#allocation5 + $0x10] sm:$0xff] %vm5583_vm0, %v5770_v51 }
 0x527   : > { %v5830_v16 = vld [vmem:[#allocation5 + $0x8] sm:$0xff] }
 0x528   : > { %v5834_v50 = vpack.c.bf16 %v5830_v16, %v5830_v16 }
 0x52a   : > { %6079 = vmatprep.mubr.bf16.mxu1 %v5834_v50 }
 0x52b   : > { %6080 = vmatmul.mubr.bf16.vlgmr.msra.gmra.mxu1 %v5833_v43 }
 0x52c   : > { %7358 = vmatpush3.bf16.msra.mxu1 %v7646_v33  ;;  %7373 = vmatprep.mubr.msk.bf16.mxu1 %vm7683_vm13, %v7682_v49 }
 0x52d   : > { %7359 = vmatprep.subr.bf16.mxu1 %v7682_v49 }
 0x530   : > { %7360 = vmatpush3.bf16.msra.mxu1 %v7647_v35 }
 0x531   : > { %7361 = vmatprep.subr.bf16.mxu1 %v7682_v49 }
 0x534   : > { %7362 = vmatpush3.bf16.msra.mxu1 %v7648_v32 }
 0x535   : > { %7363 = vmatprep.subr.bf16.mxu1 %v7682_v49 }
 0x537   : > { %v5782_v10 = vpop.permute.xlu1 %5781 }
 0x538   : > { %5784 = vst.msk [vmem:[#allocation5 + $0x10] sm:$0xff] %vm5596_vm1, %v5782_v10  ;;  %7364 = vmatpush3.bf16.msra.mxu1 %v7649_v55 }
 0x539   : > { %v5794_v36 = vpop.permute.xlu0 %5793  ;;  %7365 = vmatprep.subr.bf16.mxu1 %v7682_v49 }
 0x53a   : > { %5796 = vst.msk [vmem:[#allocation5 + $0x10] sm:$0xff] %vm5609_vm2, %v5794_v36 }
 0x53b   : > { %v5806_v6 = vpop.permute.xlu1 %5805 }
 0x53c   : > { %5808 = vst.msk [vmem:[#allocation5 + $0x10] sm:$0xff] %vm5622_vm3, %v5806_v6  ;;  %7366 = vmatpush3.bf16.msra.mxu1 %v7650_v24 }
 0x53d   : > { %v5818_v44 = vpop.permute.xlu0 %5817  ;;  %7367 = vmatprep.subr.bf16.mxu1 %v7682_v49 }
 0x53e   : > { %5820 = vst.msk [vmem:[#allocation5 + $0x10] sm:$0xff] %vm5635_vm4, %v5818_v44 }
 0x540   : > { %7368 = vmatpush3.bf16.msra.mxu1 %v7651_v61 }
 0x541   : > { %7369 = vmatprep.subr.bf16.mxu1 %v7682_v49 }
 0x544   : > { %7370 = vmatpush3.bf16.msra.mxu1 %v7652_v1 }
 0x545   : > { %v5831_v48 = vld [vmem:[#allocation5 + $0x10] sm:$0xff]  ;;  %7371 = vmatprep.subr.bf16.mxu1 %v7682_v49 }
 0x546   : > { %v5835_v19 = vpack.c.bf16 %v5831_v48, %v5831_v48 }
 0x548   : > { %6120 = vmatmul.mubr.bf16.vlgmr.msra.gmra.mxu0 %v5835_v19  ;;  %7372 = vmatpush3.bf16.msra.mxu1 %v7653_v17 }
 0x549   : > { %7393 = vmatprep.mubr.msk.bf16.mxu0 %vm7683_vm13, %v7682_v49  ;;  %7378 = vmatpush3.bf16.msra.mxu0 %v7654_v52 }
 0x54a   : > { %7379 = vmatprep.subr.bf16.mxu0 %v7682_v49 }
 0x54d   : > { %7380 = vmatpush3.bf16.msra.mxu0 %v7655_v30 }
 0x54e   : > { %7381 = vmatprep.subr.bf16.mxu0 %v7682_v49 }
 0x551   : > { %7382 = vmatpush3.bf16.msra.mxu0 %v7656_v53 }
 0x552   : > { %7383 = vmatprep.subr.bf16.mxu0 %v7682_v49 }
 0x555   : > { %7384 = vmatpush3.bf16.msra.mxu0 %v7657_v38 }
 0x556   : > { %7385 = vmatprep.subr.bf16.mxu0 %v7682_v49 }
 0x559   : > { %7386 = vmatpush3.bf16.msra.mxu0 %v7658_v0 }
 0x55a   : > { %7387 = vmatprep.subr.bf16.mxu0 %v7682_v49 }
 0x55d   : > { %7388 = vmatpush3.bf16.msra.mxu0 %v7659_v31 }
 0x55e   : > { %7389 = vmatprep.subr.bf16.mxu0 %v7682_v49 }
 0x561   : > { %7390 = vmatpush3.bf16.msra.mxu0 %v7660_v26 }
 0x562   : > { %7391 = vmatprep.subr.bf16.mxu0 %v7682_v49 }
 0x565   : > { %7392 = vmatpush3.bf16.msra.mxu0 %v7661_v8 }
 0x5eb   : > { %v6913_v34 = vpop.f32.mrf.mxu1 }
 0x5ed   : > { %v6914_v56 = vpop.f32.mrf.mxu1 }
 0x5ee   : > { %v6915_v42 = vadd.f32 %v6914_v56, %v6913_v34 }
 0x5ef   : > { %v6916_v2 = vpop.f32.mrf.mxu1 }
 0x5f0   : > { %v6082_v23 = vadd.f32 %v6915_v42, %v6640_v3 }
 0x5f1   : > { %v6917_v27 = vpop.f32.mrf.mxu1 }
 0x608   : > { %v6121_v40 = vpop.f32.mrf.mxu0 }
 0x609   : > { %v6122_v9 = vadd.f32 %v6121_v40, %v6082_v23 }
 0x60a   : > { %v6123_v59 = vpop.f32.mrf.mxu0 }
 0x60b   : > { %vm6127_vm5 = vcmp.gt.f32.partialorder %v6122_v9, 0.0  ;;  %v6128_v15 = vmul.f32 0.1, %v6122_v9 }
 0x60c   : > { %v6124_v13 = vpop.f32.mrf.mxu0 }
 0x60d   : > { %v6129_v47 = vsel %vm6127_vm5, %v6122_v9, %v6128_v15 }
 0x60e   : > { %v6130_v45 = vpack.c.bf16 %v6129_v47, %v6129_v47  ;;  %v6125_v21 = vpop.f32.mrf.mxu0 }
 0x610   : > { %7374 = vmatmul.mubr.bf16.vlgmr.msra.gmra.mxu1 %v6130_v45 }
 0x6d0   : > { %v6236_v63 = vpop.f32.mrf.mxu1 }
 0x6d1   : > { %v6237_v54 = vadd.f32 %v6667_v20, %v6236_v63 }
 0x6d2   : > { %v7375_v58 = vpop.f32.mrf.mxu1 }
 0x6d3   : > { %vm6242_vm6 = vcmp.gt.f32.partialorder %v6237_v54, 0.0  ;;  %v6243_v60 = vmul.f32 0.1, %v6237_v54 }
 0x6d4   : > { %v6239_v11 = vpop.f32.mrf.mxu1 }
 0x6d5   : > { %v6244_v7 = vsel %vm6242_vm6, %v6237_v54, %v6243_v60 }
 0x6d6   : > { %v6245_v25 = vpack.c.bf16 %v6244_v7, %v6244_v7  ;;  %v7376_v5 = vpop.f32.mrf.mxu1 }
 0x6d8   : > { %7394 = vmatmul.mubr.bf16.vlgmr.msra.gmra.mxu0 %v6245_v25 }
 0x798   : > { %v6351_v18 = vpop.f32.mrf.mxu0 }
 0x799   : > { %v6352_v4 = vadd.f32 %v6676_v29, %v6351_v18 }
 0x79a   : > { %v7395_v37 = vpop.f32.mrf.mxu0 }
 0x79b   : > { %6357 = vst [vmem:[%s384_s22] sm:$0xff] %v6352_v4 }
 0x79c   : > { %v6354_v14 = vpop.f32.mrf.mxu0 }
 0x79e   : > { %v7396_v28 = vpop.f32.mrf.mxu0 }
 0x79f PF: > { %s21_s17 = sadd.s32 1, %s7672_s17  }
 0x7a0   : > { %p18_p4 = scmp.ge.s32.totalorder %s21_s17, 4  }
 0x7a2   :  { %20 = sbr.rel (!%p18_p4) target bundleno = 1 (0x1), region = 98 }

</bundles_post_ra>
